<compile_context>
chip_gen: v7x
topology: tpu7x:2x2x1
jax: 0.10.0
libtpu: 0.0.40
codegen_flags: <defaults>
</compile_context>

<pallas_src>
import jax
import jax.numpy as jnp
from jax.experimental import pallas as pl
from jax.experimental.pallas import tpu as pltpu

INPUT_DIM = 10
SAMPLES_PER_ROW = 128                     # samples packed per lane-dense row
ROW_LEN = SAMPLES_PER_ROW * INPUT_DIM     # 1280 lanes per row (10 full vregs)
TR_MAX = 512                              # 512 * 1280 * 4 B = 2.5 MiB x-block
MIN_GRID_STEPS = 8                        # keep several steps for v7x's 2 TCs


def linear_kernel(x_ref, w_ref, b_ref, o_ref):
    # x_ref: (TR, 1280) lane-dense samples (128 samples x 10 features per row)
    # w_ref: (1280, 128) block-diagonal replicated weight (resident)
    # b_ref: (1, 1) SMEM scalar bias
    # o_ref: (TR, 128) lane-dense outputs: sample 128*row + lane
    y = jnp.dot(x_ref[...], w_ref[...],
                preferred_element_type=jnp.float32,
                precision=jax.lax.Precision.HIGHEST)
    o_ref[...] = (y + b_ref[0, 0]).astype(o_ref.dtype)


def _block_diag_weight(w):
    # w: (1, D). Returns (D*S, S) with W[s*D + d, s] = w[0, d] and 0 elsewhere,
    # so (x_row @ W)[s] = sum_d x_row[s*D + d] * w[0, d]  (per-sample dot).
    d = w.shape[1]
    eye = jnp.eye(SAMPLES_PER_ROW, dtype=w.dtype)                 # (S, S)
    wb = eye[:, None, :] * w[0][None, :, None]                    # (S, D, S)
    return wb.reshape(SAMPLES_PER_ROW * d, SAMPLES_PER_ROW)       # (S*D, S)


def linear_regression_forward(x, w, b):
    """x: (B, INPUT_DIM) f32, w: (1, INPUT_DIM) f32, b: (1,) f32 -> (B, 1) f32."""
    B, D = x.shape
    n_rows = pl.cdiv(B, SAMPLES_PER_ROW)
    b_pad = n_rows * SAMPLES_PER_ROW

    flat = x.reshape(-1)                     # free: contiguous row-major view
    if b_pad != B:
        # Only when B % 128 != 0; pads < 1280 f32 elements. Pass batch sizes
        # that are multiples of 128 to make the whole input path copy-free.
        flat = jnp.pad(flat, (0, (b_pad - B) * D))
    x2 = flat.reshape(n_rows, ROW_LEN)       # lane-dense: 128 samples per row

    w_big = _block_diag_weight(w)            # (1280, 128) ~640 KiB, resident
    b2 = b.reshape(1, 1)

    # Row-tile size: big enough to amortize per-step overhead, small enough to
    # give the batch grid several steps (megacore) and stay inside VMEM.
    tr = min(TR_MAX, max(64, pl.cdiv(n_rows, MIN_GRID_STEPS)))
    if tr < n_rows:
        tr = ((tr + 7) // 8) * 8             # sublane-aligned tile
    if tr >= n_rows:
        tr = n_rows                          # single full-extent block
    grid = (pl.cdiv(n_rows, tr),)            # partial trailing block is masked

    out = pl.pallas_call(
        linear_kernel,
        out_shape=jax.ShapeDtypeStruct((n_rows, SAMPLES_PER_ROW), x.dtype),
        grid_spec=pltpu.PrefetchScalarGridSpec(
            num_scalar_prefetch=0,
            grid=grid,
            in_specs=[
                pl.BlockSpec((tr, ROW_LEN), lambda i: (i, 0)),        # x tiles
                pl.BlockSpec((ROW_LEN, SAMPLES_PER_ROW),
                             lambda i: (0, 0)),                       # weight
                pl.BlockSpec(memory_space=pltpu.MemorySpace.SMEM),    # bias
            ],
            out_specs=pl.BlockSpec((tr, SAMPLES_PER_ROW), lambda i: (i, 0)),
        ),
        compiler_params=pltpu.CompilerParams(
            dimension_semantics=("parallel",),
        ),
    )(x2, w_big, b2)

    # Lane-dense (n_rows, 128) -> (B, 1); output is 10x smaller than the input,
    # so this slice/reshape is cheap (and the only output-side copy).
    return out.reshape(-1, 1)[:B]


if __name__ == "__main__":
    key = jax.random.PRNGKey(0)
    k_x, k_w, k_b = jax.random.split(key, 3)

    batch = 200  # not a multiple of 128: exercises the padded-remainder path
    x = jax.random.normal(k_x, (batch, INPUT_DIM), dtype=jnp.float32)

    # Deterministic init mimicking nn.Linear: U(-1/sqrt(fan_in), 1/sqrt(fan_in))
    bound = 1.0 / jnp.sqrt(float(INPUT_DIM))
    w = jax.random.uniform(k_w, (1, INPUT_DIM), dtype=jnp.float32,
                           minval=-bound, maxval=bound)
    b = jax.random.uniform(k_b, (1,), dtype=jnp.float32,
                           minval=-bound, maxval=bound)

    out = linear_regression_forward(x, w, b)
    out = jax.block_until_ready(out)

    # Reference check in plain JAX
    ref = x @ w.T + b
    assert out.shape == (batch, 1), out.shape
    assert jnp.allclose(out, ref, atol=1e-4, rtol=1e-4), "mismatch vs reference"

    print("KERNEL_OK")
</pallas_src>

<mosaic_0001>
module attributes {stable_mosaic.version = 11 : i64} {
  func.func @linear_kernel(%arg0: i32, %arg1: memref<2x1280xf32, #tpu.memory_space<vmem>>, %arg2: memref<1280x128xf32, #tpu.memory_space<vmem>>, %arg3: memref<1x1xf32, #tpu.memory_space<smem>>, %arg4: memref<2x128xf32, #tpu.memory_space<vmem>>) attributes {dimension_semantics = [#tpu.dimension_semantics<parallel>], iteration_bounds = array<i64: 1>, scalar_prefetch = 0 : i64, scratch_operands = 0 : i64, tpu.core_type = #tpu.core_type<tc>, window_params = [{transform_indices = @transform_0, window_bounds = array<i64: 2, 1280>}, {pipeline_mode = #tpu.pipeline_mode<synchronous>, transform_indices = @transform_1, window_bounds = array<i64: 1280, 128>}, {transform_indices = @transform_2, window_bounds = array<i64: 1, 1>}, {transform_indices = @transform_3, window_bounds = array<i64: 2, 128>}]} {
    %c0 = arith.constant 0 : index
    %c0_0 = arith.constant 0 : index
    %0 = vector.load %arg1[%c0, %c0_0] : memref<2x1280xf32, #tpu.memory_space<vmem>>, vector<2x1280xf32>
    %c0_1 = arith.constant 0 : index
    %c0_2 = arith.constant 0 : index
    %1 = vector.load %arg2[%c0_1, %c0_2] : memref<1280x128xf32, #tpu.memory_space<vmem>>, vector<1280x128xf32>
    %cst = arith.constant dense<0.000000e+00> : vector<2x128xf32>
    %2 = tpu.matmul %0, %1, %cst {dimension_numbers = #tpu.dot_dimension_numbers<[1], [0], [0], [1], [0, 0, 1, 1], [], []>, precision = #tpu.contract_precision<fp32>} : vector<2x1280xf32>, vector<1280x128xf32>, vector<2x128xf32> -> vector<2x128xf32>
    %c0_3 = arith.constant 0 : index
    %c0_4 = arith.constant 0 : index
    %3 = memref.load %arg3[%c0_3, %c0_4] : memref<1x1xf32, #tpu.memory_space<smem>>
    %4 = vector.broadcast %3 : f32 to vector<2x128xf32>
    %5 = arith.addf %2, %4 : vector<2x128xf32>
    %c0_5 = arith.constant 0 : index
    %c0_6 = arith.constant 0 : index
    %6 = vector.load %arg4[%c0_5, %c0_6] : memref<2x128xf32, #tpu.memory_space<vmem>>, vector<2x128xf32>
    tpu.vector_store %arg4[%c0_5, %c0_6], %5 {strides = array<i32>} : memref<2x128xf32, #tpu.memory_space<vmem>>, vector<2x128xf32>,
    return
  }
  func.func @transform_0(%arg0: i32) -> (i32, i32) {
    %c0_i32 = arith.constant 0 : i32
    %c0_i32_0 = arith.constant 0 : i32
    return %arg0, %c0_i32 : i32, i32
  }
  func.func @transform_1(%arg0: i32) -> (i32, i32) {
    %c0_i32 = arith.constant 0 : i32
    %c0_i32_0 = arith.constant 0 : i32
    %c0_i32_1 = arith.constant 0 : i32
    return %c0_i32, %c0_i32_0 : i32, i32
  }
  func.func @transform_2(%arg0: i32) -> (i32, i32) {
    %c0_i32 = arith.constant 0 : i32
    %c0_i32_0 = arith.constant 0 : i32
    %c0_i32_1 = arith.constant 0 : i32
    return %c0_i32, %c0_i32_0 : i32, i32
  }
  func.func @transform_3(%arg0: i32) -> (i32, i32) {
    %c0_i32 = arith.constant 0 : i32
    %c0_i32_0 = arith.constant 0 : i32
    return %arg0, %c0_i32 : i32, i32
  }
}

</mosaic_0001>

<bundles_post_ra>
// kernel: tpu_custom_call.1
= control target key start
LH: loop header
LB: loop body
LE: loop exit
PB: predicated region body
PF: predicated region fallthrough
CT: control target
= control target key end

     0   :  { %9 = vsyncpa [#allocation4], 0  ;;  %s10091_s0 = inlined_call_operand.hbm [shape: f32[2,1280], index: 0, kind: input, shape index: {}]   ;;  %s10092_s1 = inlined_call_operand.hbm [shape: f32[1280,128], index: 1, kind: input, shape index: {}]   ;;  %s10093_s2 = inlined_call_operand.<no memory space> [shape: f32[1,1], index: 2, kind: input, shape index: {}]   ;;  %s10094_s3 = inlined_call_operand.hbm [shape: f32[2,128], index: 3, kind: output, shape index: {}]  }
   0x1   :  { %10 = vsyncpa [#allocation7], 0 }
   0x2   :  { %11 = vsyncpa [#allocation5], 0  ;;  %s6680_s12 = smov [#allocation3]   ;;  %s6681_s14 = smov [#allocation6]  }
   0x3   :  { %s18_s13 = sshll.u32 %s6680_s12, 4  ;;  %s27_s15 = sshll.u32 %s6681_s14, 4  ;;  %s19_s13 = int_to_ptr.vmem [resolvable:$true] %s18_s13  ;;  %s6706_s15 = int_to_ptr.vmem [resolvable:$true] %s27_s15 }
   0x4   :  { %s6608_s18 = scalar_lea.hbm %s10091_s0, 320 }
   0x5   :  { %p6609_p0 = scmp.ne.s32.totalorder %s10091_s0, %s6608_s18  ;;  %p6612_p1 = scmp.lt.u32.totalorder %s6608_s18, %s10091_s0 }
   0x7   :  { %p6614_p2 = pnand %p6612_p1, %p6609_p0 }
   0x9   :  { %6617 = shalt.err (!%p6614_p2)
}
   0xa   :  { %s6618_s23 = scalar_lea.vmem %s19_s13, 320  ;;  %p6623_p4 = scmp.lt.s32.totalorder %s19_s13, %s19_s13 }
   0xb   :  { %p6619_p3 = scmp.ne.s32.totalorder %s19_s13, %s6618_s23  ;;  %p6624_p5 = scmp.lt.s32.totalorder %s6618_s23, %s6618_s23 }
   0xd   :  { %p6625_p6 = por %p6624_p5, %p6623_p4 }
   0xf   :  { %p6626_p7 = pnand %p6625_p6, %p6619_p3 }
  0x11   :  { %6629 = shalt.err (!%p6626_p7)
}
  0x12   :  { %21 = dma.hbm_to_vmem [thread:$0]  %s10091_s0, 320, %s19_s13, [#allocation4]  }
  0x13   :  { %s6630_s28 = scalar_lea.hbm %s10092_s1, 20480 }
  0x14   :  { %p6631_p8 = scmp.ne.s32.totalorder %s10092_s1, %s6630_s28  ;;  %p6634_p9 = scmp.lt.u32.totalorder %s6630_s28, %s10092_s1 }
  0x16   :  { %p6636_p10 = pnand %p6634_p9, %p6631_p8 }
  0x18   :  { %6639 = shalt.err (!%p6636_p10)
}
  0x19   :  { %s6640_s6 = scalar_lea.vmem %s6706_s15, 20480  ;;  %p6645_p12 = scmp.lt.s32.totalorder %s6706_s15, %s6706_s15 }
  0x1a   :  { %p6641_p11 = scmp.ne.s32.totalorder %s6706_s15, %s6640_s6  ;;  %p6646_p13 = scmp.lt.s32.totalorder %s6640_s6, %s6640_s6 }
  0x1c   :  { %p6647_p0 = por %p6646_p13, %p6645_p12 }
  0x1e   :  { %p6648_p1 = pnand %p6647_p0, %p6641_p11 }
  0x20   :  { %6651 = shalt.err (!%p6648_p1)
}
  0x21   :  { %s6682_s0 = smov 128   ;;  %s6683_s7 = smov 8  }
  0x22   :  { %33 = dma.hbm_to_vmem [thread:$0]  %s10092_s1, 20480, %s6706_s15, [#allocation7], %s6682_s0, %s6682_s0, %s6683_s7  }
  0x23   :  { %6674 = dma.done.wait [#allocation4], 320  }
  0x24   :  { %6675 = vsyncadd [#allocation4], 4294966976 }
  0x25   :  { %6676 = dma.done.wait [#allocation7], 20480  }
  0x26   :  { %6677 = vsyncadd [#allocation7], 4294946816  ;;  %v214_v0 = vlaneseq  ;;  %v6684_v1 = vmov 1983009808   ;;  %v61_v3 = vld [vmem:[#allocation6 + $0x80] sm:$0xff]  ;;  %v62_v4 = vld [vmem:[#allocation6 + $0x88] sm:$0xff] }
  0x27   :  { %v212_v2 = vunpack.c.l.s4 %v6684_v1  ;;  %v45_v5 = vld [vmem:[#allocation6] sm:$0xff]  ;;  %v311_v7 = vand.u32 4294901760, %v61_v3  ;;  %v314_v8 = vand.u32 4294901760, %v62_v4  ;;  %v46_v9 = vld [vmem:[#allocation6 + $0x8] sm:$0xff]  ;;  %v63_v11 = vld [vmem:[#allocation6 + $0x90] sm:$0xff] }
  0x28   :  { %v215_v6 = vshrl.u32 %v214_v0, 7  ;;  %v263_v10 = vand.u32 4294901760, %v45_v5  ;;  %v64_v12 = vld [vmem:[#allocation6 + $0x98] sm:$0xff]  ;;  %v266_v14 = vand.u32 4294901760, %v46_v9  ;;  %v317_v15 = vand.u32 4294901760, %v63_v11  ;;  %v47_v17 = vld [vmem:[#allocation6 + $0x10] sm:$0xff] }
  0x29   :  { %v213_v13 = vunpack.c.0.s8 %v212_v2  ;;  %v320_v16 = vand.u32 4294901760, %v64_v12  ;;  %v48_v18 = vld [vmem:[#allocation6 + $0x18] sm:$0xff]  ;;  %v6737_v19 = vpack.c.bf16 %v314_v8, %v311_v7  ;;  %v269_v21 = vand.u32 4294901760, %v47_v17  ;;  %v65_v23 = vld [vmem:[#allocation6 + $0xa0] sm:$0xff]  ;;  %v66_v24 = vld [vmem:[#allocation6 + $0xa8] sm:$0xff] }
  0x2a   :  { %v6739_v20 = vsub.f32 %v45_v5, %v263_v10  ;;  %v272_v22 = vand.u32 4294901760, %v48_v18  ;;  %v6741_v25 = vpack.c.bf16 %v266_v14, %v263_v10  ;;  %v6743_v26 = vsub.f32 %v46_v9, %v266_v14  ;;  %v49_v28 = vld [vmem:[#allocation6 + $0x20] sm:$0xff]  ;;  %v50_v29 = vld [vmem:[#allocation6 + $0x28] sm:$0xff]  ;;  %v67_v42 = vld [vmem:[#allocation6 + $0xb0] sm:$0xff] }
  0x2b   :  { %v6745_v27 = vpack.c.bf16 %v320_v16, %v317_v15  ;;  %5641 = vmatprep.subr.bf16.mxu0 %v6737_v19  ;;  %v6748_v30 = vsub.f32 %v63_v11, %v317_v15  ;;  %v6750_v31 = vsub.f32 %v64_v12, %v320_v16  ;;  %v6754_v33 = vsub.s32 %v213_v13, %v215_v6  ;;  %v68_v47 = vld [vmem:[#allocation6 + $0xb8] sm:$0xff]  ;;  %v51_v60 = vld [vmem:[#allocation6 + $0x30] sm:$0xff]  ;;  %v69_v10 = vld [vmem:[#allocation6 + $0xc0] sm:$0xff] }
  0x2c   :  { %v6752_v32 = vpack.c.bf16 %v272_v22, %v269_v21  ;;  %5643 = vmatpush3.bf16.msra.mxu0 %v6741_v25  ;;  %v323_v34 = vand.u32 4294901760, %v65_v23  ;;  %v326_v35 = vand.u32 4294901760, %v66_v24  ;;  %v6757_v36 = vsub.f32 %v61_v3, %v311_v7  ;;  %v52_v61 = vld [vmem:[#allocation6 + $0x38] sm:$0xff]  ;;  %v70_v11 = vld [vmem:[#allocation6 + $0xc8] sm:$0xff]  ;;  %v53_v16 = vld [vmem:[#allocation6 + $0x40] sm:$0xff] }
  0x2d   :  { %10434 = vst [vmem:[#allocation12_spill] sm:$0xff] %v6754_v33  ;;  %v6759_v37 = vsub.f32 %v62_v4, %v314_v8  ;;  %5645 = vmatprep.subr.bf16.mxu0 %v6745_v27  ;;  %v275_v38 = vand.u32 4294901760, %v49_v28  ;;  %v278_v39 = vand.u32 4294901760, %v50_v29  ;;  %v10109_v40 = vand.u32 4294901760, %v6739_v20 }
  0x2e   :  { %v10107_v41 = vand.u32 4294901760, %v6743_v26  ;;  %v6764_v43 = vsub.f32 %v47_v17, %v269_v21  ;;  %v6766_v44 = vsub.f32 %v48_v18, %v272_v22  ;;  %v6768_v45 = vpack.c.bf16 %v326_v35, %v323_v34 }
  0x2f   :  { %v10112_v46 = vand.u32 4294901760, %v6757_v36  ;;  %v6771_v48 = vsub.f32 %v65_v23, %v323_v34  ;;  %v6773_v49 = vsub.f32 %v66_v24, %v326_v35  ;;  %v10111_v50 = vand.u32 4294901760, %v6759_v37  ;;  %v54_v34 = vld [vmem:[#allocation6 + $0x48] sm:$0xff] }
  0x30   :  { %v6776_v51 = vpack.c.bf16 %v278_v39, %v275_v38  ;;  %5647 = vmatpush3.bf16.msra.mxu0 %v6752_v32  ;;  %v378_v53 = vsub.f32 %v6739_v20, %v10109_v40  ;;  %v385_v54 = vsub.f32 %v6743_v26, %v10107_v41  ;;  %v329_v55 = vand.u32 4294901760, %v67_v42  ;;  %v76_v41 = vld [vmem:[#allocation6 + $0xf8] sm:$0xff] }
  0x31   :  { %v490_v52 = vsub.f32 %v6757_v36, %v10112_v46  ;;  %5649 = vmatprep.subr.bf16.mxu0 %v6768_v45  ;;  %v497_v56 = vsub.f32 %v6759_v37, %v10111_v50  ;;  %v332_v57 = vand.u32 4294901760, %v68_v47  ;;  %v10106_v58 = vand.u32 4294901760, %v6748_v30 }
  0x32   :  { %v10104_v59 = vand.u32 4294901760, %v6750_v31  ;;  %v6794_v63 = vsub.f32 %v49_v28, %v275_v38  ;;  %v379_v0 = vand.u32 4294901760, %v378_v53  ;;  %v386_v1 = vand.u32 4294901760, %v385_v54 }
  0x33   :  { %v491_v62 = vand.u32 4294901760, %v490_v52  ;;  %v498_v2 = vand.u32 4294901760, %v497_v56  ;;  %v6796_v3 = vsub.f32 %v50_v29, %v278_v39  ;;  %v6798_v4 = vpack.c.bf16 %v332_v57, %v329_v55 }
  0x34   :  { %v504_v5 = vsub.f32 %v6748_v30, %v10106_v58  ;;  %5651 = vmatpush3.bf16.msra.mxu0 %v6776_v51  ;;  %v5674_v6 = vpack.c.bf16 %v386_v1, %v379_v0  ;;  %v511_v7 = vsub.f32 %v6750_v31, %v10104_v59  ;;  %v281_v8 = vand.u32 4294901760, %v51_v60  ;;  %v71_v0 = vld [vmem:[#allocation6 + $0xd0] sm:$0xff]  ;;  %v72_v1 = vld [vmem:[#allocation6 + $0xd8] sm:$0xff] }
  0x35   :  { %v284_v9 = vand.u32 4294901760, %v52_v61  ;;  %v5672_v12 = vpack.c.bf16 %v498_v2, %v491_v62  ;;  %5653 = vmatprep.subr.bf16.mxu0 %v6798_v4  ;;  %v10102_v14 = vand.u32 4294901760, %v6764_v43  ;;  %v10101_v15 = vand.u32 4294901760, %v6766_v44  ;;  %v75_v58 = vld [vmem:[#allocation6 + $0xf0] sm:$0xff] }
  0x36   :  { %v505_v13 = vand.u32 4294901760, %v504_v5  ;;  %v6810_v17 = vsub.f32 %v67_v42, %v329_v55  ;;  %v6812_v18 = vsub.f32 %v68_v47, %v332_v57  ;;  %v512_v21 = vand.u32 4294901760, %v511_v7 }
  0x37   :  { %v6814_v22 = vpack.c.bf16 %v284_v9, %v281_v8  ;;  %5673 = vmatprep.subr.bf16.mxu1 %v5672_v12  ;;  %v392_v23 = vsub.f32 %v6764_v43, %v10102_v14  ;;  %v399_v24 = vsub.f32 %v6766_v44, %v10101_v15  ;;  %v335_v28 = vand.u32 4294901760, %v69_v10 }
  0x38   :  { %v338_v29 = vand.u32 4294901760, %v70_v11  ;;  %5675 = vmatpush3.bf16.msra.mxu1 %v5674_v6  ;;  %v5676_v35 = vpack.c.bf16 %v512_v21, %v505_v13  ;;  %v10099_v38 = vand.u32 4294901760, %v6771_v48  ;;  %v10097_v39 = vand.u32 4294901760, %v6773_v49  ;;  %v55_v6 = vld [vmem:[#allocation6 + $0x50] sm:$0xff] }
  0x39   :  { %5655 = vmatpush3.bf16.msra.mxu0 %v6814_v22  ;;  %v287_v42 = vand.u32 4294901760, %v53_v16  ;;  %v6825_v47 = vsub.f32 %v51_v60, %v281_v8  ;;  %v393_v52 = vand.u32 4294901760, %v392_v23  ;;  %v400_v53 = vand.u32 4294901760, %v399_v24  ;;  %v56_v24 = vld [vmem:[#allocation6 + $0x58] sm:$0xff] }
  0x3a   :  { %v6827_v54 = vpack.c.bf16 %v338_v29, %v335_v28  ;;  %5677 = vmatprep.subr.bf16.mxu1 %v5676_v35  ;;  %v6829_v55 = vsub.f32 %v52_v61, %v284_v9  ;;  %v518_v56 = vsub.f32 %v6771_v48, %v10099_v38  ;;  %v525_v57 = vsub.f32 %v6773_v49, %v10097_v39  ;;  %v74_v39 = vld [vmem:[#allocation6 + $0xe8] sm:$0xff] }
  0x3b   :  { %v290_v62 = vand.u32 4294901760, %v54_v34  ;;  %v5678_v60 = vpack.c.bf16 %v400_v53, %v393_v52  ;;  %v6838_v2 = vsub.f32 %v69_v10, %v335_v28  ;;  %v10096_v5 = vand.u32 4294901760, %v6794_v63 }
  0x3c   :  { %5657 = vmatprep.subr.bf16.mxu0 %v6827_v54  ;;  %v10095_v61 = vand.u32 4294901760, %v6796_v3  ;;  %v6842_v7 = vsub.f32 %v70_v11, %v338_v29  ;;  %v519_v8 = vand.u32 4294901760, %v518_v56  ;;  %v526_v9 = vand.u32 4294901760, %v525_v57 }
  0x3d   :  { %v6844_v12 = vpack.c.bf16 %v290_v62, %v287_v42  ;;  %5679 = vmatpush3.bf16.msra.mxu1 %v5678_v60  ;;  %v406_v13 = vsub.f32 %v6794_v63, %v10096_v5  ;;  %v341_v21 = vand.u32 4294901760, %v71_v0  ;;  %v344_v23 = vand.u32 4294901760, %v72_v1  ;;  %v73_v5 = vld [vmem:[#allocation6 + $0xe0] sm:$0xff] }
  0x3e   :  { %v413_v10 = vsub.f32 %v6796_v3, %v10095_v61  ;;  %v5680_v28 = vpack.c.bf16 %v526_v9, %v519_v8  ;;  %v10098_v11 = vand.u32 4294901760, %v6810_v17  ;;  %v10100_v29 = vand.u32 4294901760, %v6812_v18 }
  0x3f   :  { %5659 = vmatpush3.bf16.msra.mxu0 %v6844_v12  ;;  %v293_v35 = vand.u32 4294901760, %v55_v6  ;;  %v6855_v52 = vsub.f32 %v53_v16, %v287_v42  ;;  %v407_v53 = vand.u32 4294901760, %v406_v13  ;;  %v6857_v57 = vpack.c.bf16 %v344_v23, %v341_v21 }
  0x40   :  { %v414_v56 = vand.u32 4294901760, %v413_v10  ;;  %5681 = vmatprep.subr.bf16.mxu1 %v5680_v28  ;;  %v6859_v60 = vsub.f32 %v54_v34, %v290_v62  ;;  %v532_v8 = vsub.f32 %v6810_v17, %v10098_v11  ;;  %v539_v9 = vsub.f32 %v6812_v18, %v10100_v29  ;;  %v57_v62 = vld [vmem:[#allocation6 + $0x60] sm:$0xff]  ;;  %v58_v29 = vld [vmem:[#allocation6 + $0x68] sm:$0xff] }
  0x41   :  { %10435 = vst [vmem:[#allocation13_spill] sm:$0xff] %v6857_v57  ;;  %v296_v61 = vand.u32 4294901760, %v56_v24  ;;  %5661 = vmatprep.subr.bf16.mxu0 %v6857_v57  ;;  %v6868_v42 = vsub.f32 %v71_v0, %v341_v21  ;;  %v10103_v13 = vand.u32 4294901760, %v6825_v47  ;;  %v10105_v34 = vand.u32 4294901760, %v6829_v55 }
  0x42   :  { %v5682_v16 = vpack.c.bf16 %v414_v56, %v407_v53  ;;  %v6872_v10 = vsub.f32 %v72_v1, %v344_v23  ;;  %v533_v28 = vand.u32 4294901760, %v532_v8  ;;  %v540_v11 = vand.u32 4294901760, %v539_v9 }
  0x43   :  { %v6874_v38 = vpack.c.bf16 %v296_v61, %v293_v35  ;;  %v420_v53 = vsub.f32 %v6825_v47, %v10103_v13  ;;  %v427_v0 = vsub.f32 %v6829_v55, %v10105_v34  ;;  %v347_v21 = vand.u32 4294901760, %v73_v5 }
  0x44   :  { %5683 = vmatpush3.bf16.msra.mxu1 %v5682_v16  ;;  %v350_v56 = vand.u32 4294901760, %v74_v39  ;;  %v5684_v15 = vpack.c.bf16 %v540_v11, %v533_v28  ;;  %v10108_v1 = vand.u32 4294901760, %v6838_v2  ;;  %v10110_v23 = vand.u32 4294901760, %v6842_v7 }
  0x45   :  { %10436 = vst [vmem:[#allocation14_spill] sm:$0xff] %v6874_v38  ;;  %5663 = vmatpush3.bf16.msra.mxu0 %v6874_v38  ;;  %v299_v8 = vand.u32 4294901760, %v57_v62  ;;  %v6885_v9 = vsub.f32 %v55_v6, %v293_v35  ;;  %v421_v16 = vand.u32 4294901760, %v420_v53  ;;  %v428_v14 = vand.u32 4294901760, %v427_v0 }
  0x46   :  { %v6887_v13 = vpack.c.bf16 %v350_v56, %v347_v21  ;;  %5685 = vmatprep.subr.bf16.mxu1 %v5684_v15  ;;  %v6889_v59 = vsub.f32 %v56_v24, %v296_v61  ;;  %v546_v11 = vsub.f32 %v6838_v2, %v10108_v1  ;;  %v553_v28 = vsub.f32 %v6842_v7, %v10110_v23  ;;  %v59_v24 = vld [vmem:[#allocation6 + $0x70] sm:$0xff]  ;;  %v60_v23 = vld [vmem:[#allocation6 + $0x78] sm:$0xff] }
  0x47   :  { %v302_v34 = vand.u32 4294901760, %v58_v29  ;;  %v5686_v6 = vpack.c.bf16 %v428_v14, %v421_v16  ;;  %v6898_v35 = vsub.f32 %v73_v5, %v347_v21  ;;  %v10113_v15 = vand.u32 4294901760, %v6855_v52 }
  0x48   :  { %10437 = vst [vmem:[#allocation15_spill] sm:$0xff] %v6887_v13  ;;  %5665 = vmatprep.subr.bf16.mxu0 %v6887_v13  ;;  %v10116_v61 = vand.u32 4294901760, %v6859_v60  ;;  %v6902_v53 = vsub.f32 %v74_v39, %v350_v56  ;;  %v547_v0 = vand.u32 4294901760, %v546_v11  ;;  %v554_v1 = vand.u32 4294901760, %v553_v28 }
  0x49   :  { %v6904_v40 = vpack.c.bf16 %v302_v34, %v299_v8  ;;  %5687 = vmatpush3.bf16.msra.mxu1 %v5686_v6  ;;  %v434_v14 = vsub.f32 %v6855_v52, %v10113_v15  ;;  %v353_v21 = vand.u32 4294901760, %v75_v58  ;;  %v356_v16 = vand.u32 4294901760, %v76_v41 }
  0x4a   :  { %v441_v5 = vsub.f32 %v6859_v60, %v10116_v61  ;;  %v5688_v50 = vpack.c.bf16 %v554_v1, %v547_v0  ;;  %v10119_v39 = vand.u32 4294901760, %v6868_v42  ;;  %v10120_v56 = vand.u32 4294901760, %v6872_v10 }
  0x4b   :  { %10438 = vst [vmem:[#allocation16_spill] sm:$0xff] %v6904_v40  ;;  %5667 = vmatpush3.bf16.msra.mxu0 %v6904_v40  ;;  %v305_v11 = vand.u32 4294901760, %v59_v24  ;;  %v6915_v28 = vsub.f32 %v57_v62, %v299_v8  ;;  %v435_v6 = vand.u32 4294901760, %v434_v14  ;;  %v6917_v15 = vpack.c.bf16 %v356_v16, %v353_v21  ;;  %v6927_v40 = vld [vmem:[#allocation3] sm:$0xff] }
  0x4c   :  { %v442_v46 = vand.u32 4294901760, %v441_v5  ;;  %5689 = vmatprep.subr.bf16.mxu1 %v5688_v50  ;;  %v6919_v13 = vsub.f32 %v58_v29, %v302_v34  ;;  %v560_v1 = vsub.f32 %v6868_v42, %v10119_v39  ;;  %v567_v0 = vsub.f32 %v6872_v10, %v10120_v56  ;;  %10440 = vst [vmem:[#allocation18_spill] sm:$0xff] %v6927_v40 }
  0x4d   :  { %10439 = vst [vmem:[#allocation17_spill] sm:$0xff] %v6917_v15  ;;  %v308_v61 = vand.u32 4294901760, %v60_v23  ;;  %5669 = vmatprep.subr.bf16.mxu0 %v6917_v15  ;;  %v6930_v8 = vsub.f32 %v75_v58, %v353_v21  ;;  %v10122_v50 = vand.u32 4294901760, %v6885_v9  ;;  %v10121_v29 = vand.u32 4294901760, %v6889_v59 }
  0x4e   :  { %v5690_v62 = vpack.c.bf16 %v442_v46, %v435_v6  ;;  %v6934_v34 = vsub.f32 %v76_v41, %v356_v16  ;;  %v561_v14 = vand.u32 4294901760, %v560_v1  ;;  %v568_v5 = vand.u32 4294901760, %v567_v0 }
  0x4f   :  { %v6936_v39 = vpack.c.bf16 %v308_v61, %v305_v11  ;;  %v6938_v56 = vsub.f32 %v59_v24, %v305_v11  ;;  %v448_v46 = vsub.f32 %v6885_v9, %v10122_v50  ;;  %v455_v58 = vsub.f32 %v6889_v59, %v10121_v29 }
  0x50   :  { %10441 = vst [vmem:[#allocation19_spill] sm:$0xff] %v6934_v34  ;;  %5691 = vmatpush3.bf16.msra.mxu1 %v5690_v62  ;;  %v217_v21 = vrot.slane %v6927_v40, %v6754_v33  ;;  %v5692_v41 = vpack.c.bf16 %v568_v5, %v561_v14  ;;  %v10129_v16 = vand.u32 4294901760, %v6898_v35  ;;  %v10132_v6 = vand.u32 4294901760, %v6902_v53 }
  0x51   :  { %10442 = vst [vmem:[#allocation20_spill] sm:$0xff] %v6936_v39  ;;  %5671 = vmatpush3.bf16.msra.mxu0 %v6936_v39  ;;  %v5704_v24 = vpack.c.bf16 %v6759_v37, %v6757_v36  ;;  %v449_v11 = vand.u32 4294901760, %v448_v46  ;;  %v456_v1 = vand.u32 4294901760, %v455_v58  ;;  %v10130_v5 = vand.u32 4294901760, %v6915_v28 }
  0x52   :  { %v225_v0 = vcombine.high %v217_v21, %v217_v21  ;;  %v6953_v62 = vand.u32 4294901760, %v217_v21  ;;  %5693 = vmatprep.subr.bf16.mxu1 %v5692_v41  ;;  %v574_v29 = vsub.f32 %v6898_v35, %v10129_v16  ;;  %v581_v14 = vsub.f32 %v6902_v53, %v10132_v6 }
  0x53   :  { %5705 = vmatprep.subr.bf16.mxu0 %v5704_v24  ;;  %v10131_v50 = vand.u32 4294901760, %v6919_v13  ;;  %v6963_v33 = vsub.f32 %v60_v23, %v308_v61  ;;  %v5694_v46 = vpack.c.bf16 %v456_v1, %v449_v11  ;;  %v462_v16 = vsub.f32 %v6915_v28, %v10130_v5 }
  0x54   :  { %v6965_v58 = vand.u32 4294901760, %v225_v0  ;;  %v6968_v41 = vsub.f32 %v217_v21, %v6953_v62  ;;  %v575_v39 = vand.u32 4294901760, %v574_v29  ;;  %v582_v15 = vand.u32 4294901760, %v581_v14 }
  0x55   :  { %v469_v24 = vsub.f32 %v6919_v13, %v10131_v50  ;;  %5695 = vmatpush3.bf16.msra.mxu1 %v5694_v46  ;;  %v587_v11 = vand.u32 4294901760, %v6930_v8  ;;  %v594_v21 = vand.u32 4294901760, %v6934_v34  ;;  %v463_v1 = vand.u32 4294901760, %v462_v16 }
  0x56   :  { %10443 = vst [vmem:[#allocation21_spill] sm:$0xff] %v6965_v58  ;;  %10444 = vst [vmem:[#allocation22_spill] sm:$0xff] %v6968_v41  ;;  %v6977_v23 = vsub.f32 %v225_v0, %v6965_v58  ;;  %v10139_v61 = vand.u32 4294901760, %v6968_v41  ;;  %599 = vmatprep.mubr.f32.mxu1 %v6965_v58  ;;  %v5696_v29 = vpack.c.bf16 %v582_v15, %v575_v39  ;;  %v475_v40 = vand.u32 4294901760, %v6938_v56 }
  0x57   :  { %v470_v14 = vand.u32 4294901760, %v469_v24  ;;  %v588_v0 = vsub.f32 %v6930_v8, %v587_v11  ;;  %v595_v50 = vsub.f32 %v6934_v34, %v594_v21  ;;  %v482_v38 = vand.u32 4294901760, %v6963_v33 }
  0x58   :  { %v360_v5 = vand.u32 4294901760, %v6977_v23  ;;  %v367_v46 = vsub.f32 %v6968_v41, %v10139_v61  ;;  %5697 = vmatprep.subr.bf16.mxu1 %v5696_v29  ;;  %v476_v58 = vsub.f32 %v6938_v56, %v475_v40  ;;  %v5706_v57 = vpack.c.bf16 %v6743_v26, %v6739_v20 }
  0x59   :  { %v5698_v6 = vpack.c.bf16 %v470_v14, %v463_v1  ;;  %v589_v39 = vand.u32 4294901760, %v588_v0  ;;  %v596_v16 = vand.u32 4294901760, %v595_v50  ;;  %v483_v61 = vsub.f32 %v6963_v33, %v482_v38 }
  0x5a   :  { %v361_v15 = vsub.f32 %v6977_v23, %v360_v5  ;;  %v368_v24 = vand.u32 4294901760, %v367_v46  ;;  %v5708_v1 = vpack.c.bf16 %v6750_v31, %v6748_v30  ;;  %v477_v14 = vand.u32 4294901760, %v476_v58 }
  0x5b   :  { %5699 = vmatpush3.bf16.msra.mxu1 %v5698_v6  ;;  %v5700_v29 = vpack.c.bf16 %v596_v16, %v589_v39  ;;  %v484_v34 = vand.u32 4294901760, %v483_v61  ;;  %v5710_v6 = vpack.c.bf16 %v6766_v44, %v6764_v43  ;;  %v5712_v46 = vpack.c.bf16 %v6773_v49, %v6771_v48 }
  0x5c   :  { %v362_v41 = vand.u32 4294901760, %v361_v15  ;;  %v10445_v0 = vand.u32 4294901760, %v6757_v36  ;;  %v10446_v15 = vand.u32 4294901760, %v6759_v37  ;;  %v10447_v58 = vand.u32 4294901760, %v6739_v20 }
  0x5d   :  { %5701 = vmatprep.subr.bf16.mxu1 %v5700_v29  ;;  %v5702_v50 = vpack.c.bf16 %v484_v34, %v477_v14  ;;  %v10449_v61 = vand.u32 4294901760, %v6748_v30  ;;  %v10450_v16 = vand.u32 4294901760, %v6750_v31  ;;  %v10451_v36 = vand.u32 4294901760, %v6764_v43 }
  0x5e   :  { %363 = vmatprep.mubr.f32.mxu0 %v362_v41  ;;  %v7007_v39 = vpack.c.bf16 %v10446_v15, %v10445_v0  ;;  %v10448_v41 = vand.u32 4294901760, %v6743_v26  ;;  %v10452_v37 = vand.u32 4294901760, %v6766_v44  ;;  %v10453_v20 = vand.u32 4294901760, %v6771_v48 }
  0x5f   :  { %369 = vmatmul.mubr.f32.vlgmr.msra.gmra.mrb[0].mxu0 %v368_v24  ;;  %v7019_v24 = vpack.c.bf16 %v10450_v16, %v10449_v61  ;;  %5703 = vmatpush3.bf16.msra.mxu1 %v5702_v50  ;;  %v10454_v26 = vand.u32 4294901760, %v6773_v49  ;;  %v10455_v30 = vand.u32 4294901760, %v6794_v63  ;;  %v10456_v31 = vand.u32 4294901760, %v6796_v3 }
  0x60   :  { %5707 = vmatpush3.bf16.msra.mxu0 %v5706_v57  ;;  %736 = vmatprep.mubr.f32.mxu0 %v6977_v23  ;;  %v7013_v34 = vpack.c.bf16 %v10448_v41, %v10447_v58  ;;  %v7025_v57 = vpack.c.bf16 %v10452_v37, %v10451_v36  ;;  %v10457_v43 = vand.u32 4294901760, %v6810_v17  ;;  %v10458_v44 = vand.u32 4294901760, %v6812_v18 }
  0x61   :  { %5709 = vmatprep.subr.bf16.mxu0 %v5708_v1  ;;  %v7031_v23 = vpack.c.bf16 %v10454_v26, %v10453_v20  ;;  %v7037_v29 = vpack.c.bf16 %v10456_v31, %v10455_v30  ;;  %5737 = vmatprep.subr.bf16.mxu1 %v6737_v19  ;;  %v10459_v48 = vand.u32 4294901760, %v6825_v47  ;;  %v10460_v49 = vand.u32 4294901760, %v6829_v55 }
  0x62   :  { %v7044_v1 = vpack.c.bf16 %v10458_v44, %v10457_v43  ;;  %v10461_v50 = vand.u32 4294901760, %v6838_v2  ;;  %v10462_v0 = vand.u32 4294901760, %v6842_v7  ;;  %v10463_v58 = vand.u32 4294901760, %v6855_v52  ;;  %601 = vmatmul.mubr.f32.vlgmr.msra.gmra.mrb[0].mxu1 %v6953_v62 }
  0x63   :  { %v7050_v14 = vpack.c.bf16 %v10460_v49, %v10459_v48  ;;  %v10464_v41 = vand.u32 4294901760, %v6859_v60  ;;  %v10465_v16 = vand.u32 4294901760, %v6868_v42  ;;  %v10466_v36 = vand.u32 4294901760, %v6872_v10  ;;  %5739 = vmatpush3.bf16.msra.mxu1 %v6741_v25  ;;  %843 = vmatprep.mubr.f32.mxu1 %v360_v5  ;;  %v96_v5 = vld [vmem:[#allocation6 + $0x198] sm:$0xff] }
  0x64   :  { %v7056_v15 = vpack.c.bf16 %v10462_v0, %v10461_v50  ;;  %v10467_v20 = vand.u32 4294901760, %v6885_v9  ;;  %v10468_v26 = vand.u32 4294901760, %v6889_v59  ;;  %v10469_v31 = vand.u32 4294901760, %v6898_v35  ;;  %5711 = vmatpush3.bf16.msra.mxu0 %v5710_v6  ;;  %5741 = vmatprep.subr.bf16.mxu1 %v6745_v27 }
  0x65   :  { %v7062_v61 = vpack.c.bf16 %v10464_v41, %v10463_v58  ;;  %v7068_v37 = vpack.c.bf16 %v10466_v36, %v10465_v16  ;;  %v10470_v43 = vand.u32 4294901760, %v6902_v53  ;;  %v10471_v48 = vand.u32 4294901760, %v6915_v28  ;;  %5713 = vmatprep.subr.bf16.mxu0 %v5712_v46 }
  0x66   :  { %v7074_v30 = vpack.c.bf16 %v10468_v26, %v10467_v20  ;;  %v10472_v49 = vand.u32 4294901760, %v6919_v13  ;;  %v5714_v0 = vpack.c.bf16 %v6796_v3, %v6794_v63  ;;  %v7091_v58 = vpack.c.bf16 %v594_v21, %v587_v11  ;;  %v10476_v11 = vld [vmem:[#allocation15_spill] sm:$0xff] }
  0x67   :  { %v7080_v44 = vpack.c.bf16 %v10470_v43, %v10469_v31  ;;  %v7093_v41 = vpack.c.bf16 %v482_v38, %v475_v40  ;;  %v5716_v16 = vpack.c.bf16 %v6812_v18, %v6810_v17  ;;  %v5718_v6 = vpack.c.bf16 %v6829_v55, %v6825_v47  ;;  %5743 = vmatpush3.bf16.msra.mxu1 %v6752_v32  ;;  %v93_v18 = vld [vmem:[#allocation6 + $0x180] sm:$0xff]  ;;  %v94_v38 = vld [vmem:[#allocation6 + $0x188] sm:$0xff]  ;;  %v7133_v31 = vld [vmem:[#allocation6 + $0x110] sm:$0xff] }
  0x68   :  { %v7086_v50 = vpack.c.bf16 %v10472_v49, %v10471_v48  ;;  %5715 = vmatpush3.bf16.msra.mxu0 %v5714_v0  ;;  %v5720_v40 = vpack.c.bf16 %v6842_v7, %v6838_v2  ;;  %5745 = vmatprep.subr.bf16.mxu1 %v6768_v45  ;;  %v5722_v63 = vpack.c.bf16 %v6859_v60, %v6855_v52  ;;  %v1173_v55 = vand.u32 4294901760, %v93_v18  ;;  %v10474_v60 = vld [vmem:[#allocation13_spill] sm:$0xff]  ;;  %v7139_v43 = vld [vmem:[#allocation6 + $0x1a0] sm:$0xff]  ;;  %v10479_v48 = vld [vmem:[#allocation18_spill] sm:$0xff] }
  0x69   :  { %5717 = vmatprep.subr.bf16.mxu0 %v5716_v16  ;;  %v5724_v3 = vpack.c.bf16 %v6872_v10, %v6868_v42  ;;  %v5726_v17 = vpack.c.bf16 %v6889_v59, %v6885_v9  ;;  %v5728_v47 = vpack.c.bf16 %v6902_v53, %v6898_v35  ;;  %v1176_v2 = vand.u32 4294901760, %v94_v38  ;;  %v10473_v59 = vld [vmem:[#allocation19_spill] sm:$0xff]  ;;  %v78_v35 = vld [vmem:[#allocation6 + $0x108] sm:$0xff] }
  0x6a   :  { %v5730_v7 = vpack.c.bf16 %v6919_v13, %v6915_v28  ;;  %v5732_v52 = vpack.c.bf16 %v10473_v59, %v6930_v8  ;;  %v7123_v42 = vsub.f32 %v93_v18, %v1173_v55  ;;  %v77_v9 = vld [vmem:[#allocation6 + $0x100] sm:$0xff]  ;;  %v5734_v53 = vpack.c.bf16 %v6963_v33, %v6938_v56  ;;  %v10475_v13 = vld [vmem:[#allocation14_spill] sm:$0xff]  ;;  %10478 = vst [vmem:[#allocation19_spill] sm:$0xff] %v7139_v43  ;;  %v10480_v0 = vld [vmem:[#allocation17_spill] sm:$0xff] }
  0x6b   :  { %5747 = vmatpush3.bf16.msra.mxu1 %v6776_v51  ;;  %v7125_v10 = vsub.f32 %v94_v38, %v1176_v2  ;;  %v95_v28 = vld [vmem:[#allocation6 + $0x190] sm:$0xff]  ;;  %v1125_v8 = vand.u32 4294901760, %v77_v9  ;;  %v1128_v21 = vand.u32 4294901760, %v78_v35  ;;  %v1182_v26 = vand.u32 4294901760, %v96_v5  ;;  %v10477_v33 = vld [vmem:[#allocation16_spill] sm:$0xff]  ;;  %v7137_v56 = vld [vmem:[#allocation6 + $0x118] sm:$0xff] }
  0x6c   :  { %5719 = vmatpush3.bf16.msra.mxu0 %v5718_v6  ;;  %5749 = vmatprep.subr.bf16.mxu1 %v6798_v4  ;;  %v10146_v46 = vand.u32 4294901760, %v7123_v42  ;;  %v1179_v20 = vand.u32 4294901760, %v95_v28  ;;  %v10147_v18 = vand.u32 4294901760, %v7133_v31  ;;  %v10487_v59 = vld [vmem:[#allocation21_spill] sm:$0xff] }
  0x6d   :  { %5721 = vmatprep.subr.bf16.mxu0 %v5720_v40  ;;  %v10145_v36 = vand.u32 4294901760, %v7125_v10  ;;  %v7144_v16 = vsub.f32 %v77_v9, %v1125_v8  ;;  %v7146_v6 = vsub.f32 %v78_v35, %v1128_v21  ;;  %v7148_v40 = vld [vmem:[#allocation6 + $0x1a8] sm:$0xff]  ;;  %v7174_v35 = vld [vmem:[#allocation6 + $0x1b8] sm:$0xff] }
  0x6e   :  { %10481 = vst [vmem:[#allocation13_spill] sm:$0xff] %v7148_v40  ;;  %v1352_v38 = vsub.f32 %v7123_v42, %v10146_v46  ;;  %10488 = vst [vmem:[#allocation17_spill] sm:$0xff] %v7174_v35  ;;  %v10154_v46 = vand.u32 4294901760, %v7174_v35 }
  0x6f   :  { %5751 = vmatpush3.bf16.msra.mxu1 %v6814_v22  ;;  %v10150_v49 = vand.u32 4294901760, %v7144_v16  ;;  %v10151_v9 = vand.u32 4294901760, %v7146_v6 }
  0x70   :  { %5723 = vmatpush3.bf16.msra.mxu0 %v5722_v63  ;;  %5753 = vmatprep.subr.bf16.mxu1 %v6827_v54  ;;  %v7150_v63 = vld [vmem:[#allocation6 + $0x120] sm:$0xff] }
  0x71   :  { %5725 = vmatprep.subr.bf16.mxu0 %v5724_v3  ;;  %10482 = vst [vmem:[#allocation14_spill] sm:$0xff] %v7150_v63  ;;  %v10484_v3 = vld [vmem:[#allocation22_spill] sm:$0xff] }
  0x73   :  { %5755 = vmatpush3.bf16.msra.mxu1 %v6844_v12 }
  0x74   :  { %5727 = vmatpush3.bf16.msra.mxu0 %v5726_v17  ;;  %5757 = vmatprep.subr.bf16.mxu1 %v10474_v60  ;;  %v7155_v17 = vpack.c.bf16 %v1176_v2, %v1173_v55  ;;  %v7170_v55 = vsub.f32 %v96_v5, %v1182_v26  ;;  %v10148_v2 = vand.u32 4294901760, %v7137_v56  ;;  %v7184_v5 = vpack.c.bf16 %v1182_v26, %v1179_v20 }
  0x75   :  { %5729 = vmatprep.subr.bf16.mxu0 %v5728_v47  ;;  %v1359_v47 = vsub.f32 %v7125_v10, %v10145_v36  ;;  %v7178_v36 = vpack.c.bf16 %v1128_v21, %v1125_v8  ;;  %v7192_v8 = vsub.f32 %v7133_v31, %v10147_v18  ;;  %v1353_v21 = vand.u32 4294901760, %v1352_v38  ;;  %v7210_v18 = vld [vmem:[#allocation6 + $0x130] sm:$0xff] }
  0x76   :  { %10485 = vst [vmem:[#allocation16_spill] sm:$0xff] %v7155_v17  ;;  %10491 = vst [vmem:[#allocation21_spill] sm:$0xff] %v7184_v5  ;;  %v10493_v26 = vand.u32 4294901760, %v7139_v43 }
  0x77   :  { %5759 = vmatpush3.bf16.msra.mxu1 %v10475_v13  ;;  %10490 = vst [vmem:[#allocation22_spill] sm:$0xff] %v7178_v36  ;;  %v10517_v38 = vand.u32 4294901760, %v7192_v8 }
  0x78   :  { %5731 = vmatpush3.bf16.msra.mxu0 %v5730_v7  ;;  %5761 = vmatprep.subr.bf16.mxu1 %v10476_v11  ;;  %v7164_v7 = vld [vmem:[#allocation6 + $0x1b0] sm:$0xff] }
  0x79   :  { %5733 = vmatprep.subr.bf16.mxu0 %v5732_v52  ;;  %10486 = vst [vmem:[#allocation18_spill] sm:$0xff] %v7164_v7  ;;  %v7168_v52 = vsub.f32 %v95_v28, %v1179_v20  ;;  %v7201_v20 = vsub.f32 %v7137_v56, %v10148_v2 }
  0x7b   :  { %5763 = vmatpush3.bf16.msra.mxu1 %v10477_v33 }
  0x7c   :  { %5735 = vmatpush3.bf16.msra.mxu0 %v5734_v53  ;;  %5765 = vmatprep.subr.bf16.mxu1 %v10480_v0  ;;  %v10489_v53 = vld [vmem:[#allocation20_spill] sm:$0xff] }
  0x7d   :  { %5769 = vmatprep.subr.bf16.mxu0 %v7007_v39  ;;  %v7152_v39 = vld [vmem:[#allocation6 + $0x128] sm:$0xff]  ;;  %10494 = vst [vmem:[#allocation20_spill] sm:$0xff] %v7210_v18 }
  0x7e   :  { %10483 = vst [vmem:[#allocation15_spill] sm:$0xff] %v7152_v39  ;;  %v10149_v28 = vand.u32 4294901760, %v7152_v39 }
  0x7f   :  { %739 = vmatmul.mubr.f32.vlgmr.msra.gmra.mrb[2].mxu0 %v10484_v3  ;;  %5767 = vmatpush3.bf16.msra.mxu1 %v10489_v53 }
  0x80   :  { %5771 = vmatpush3.bf16.msra.mxu0 %v7013_v34  ;;  %1013 = vmatprep.mubr.f32.mxu0 %v10487_v59  ;;  %v1360_v34 = vand.u32 4294901760, %v1359_v47  ;;  %v7229_v47 = vsub.f32 %v7152_v39, %v10149_v28  ;;  %v7248_v28 = vld [vmem:[#allocation6 + $0x1c0] sm:$0xff] }
  0x81   :  { %5773 = vmatprep.subr.bf16.mxu0 %v7019_v24  ;;  %5801 = vmatprep.subr.bf16.mxu1 %v6737_v19  ;;  %v10492_v19 = vand.u32 4294901760, %v10484_v3  ;;  %v7206_v24 = vsub.f32 %v7139_v43, %v10493_v26  ;;  %v10496_v3 = vand.u32 4294901760, %v7148_v40  ;;  %v10497_v26 = vand.u32 4294901760, %v7150_v63  ;;  %10502 = vst [vmem:[#allocation27_spill] sm:$0xff] %v7248_v28  ;;  %v7261_v39 = vld [vmem:[#allocation6 + $0x140] sm:$0xff] }
  0x82   :  { %10505 = vst [vmem:[#allocation30_spill] sm:$0xff] %v7261_v39 }
  0x83   :  { %847 = vmatmul.mubr.f32.vlgmr.msra.gmra.mrb[2].mxu1 %v10492_v19  ;;  %v7219_v19 = vsub.f32 %v7148_v40, %v10496_v3  ;;  %v7224_v2 = vsub.f32 %v7150_v63, %v10497_v26  ;;  %v10500_v3 = vand.u32 4294901760, %v7164_v7 }
  0x84   :  { %5775 = vmatpush3.bf16.msra.mxu0 %v7025_v57  ;;  %v7212_v57 = vld [vmem:[#allocation6 + $0x138] sm:$0xff]  ;;  %5803 = vmatpush3.bf16.msra.mxu1 %v6741_v25  ;;  %v7236_v25 = vsub.f32 %v7144_v16, %v10150_v49  ;;  %v7257_v49 = vsub.f32 %v7174_v35, %v10154_v46  ;;  %v7276_v35 = vld [vmem:[#allocation6 + $0x148] sm:$0xff]  ;;  %v10513_v46 = vcombine.high %v10479_v48, %v10479_v48 }
  0x85   :  { %10495 = vst [vmem:[#allocation23_spill] sm:$0xff] %v7212_v57  ;;  %5777 = vmatprep.subr.bf16.mxu0 %v7031_v23  ;;  %5805 = vmatprep.subr.bf16.mxu1 %v6745_v27  ;;  %v7241_v23 = vsub.f32 %v7146_v6, %v10151_v9  ;;  %v7246_v26 = vsub.f32 %v7164_v7, %v10500_v3  ;;  %v7250_v27 = vld [vmem:[#allocation6 + $0x1c8] sm:$0xff]  ;;  %v10506_v3 = vand.u32 4294901760, %v7168_v52  ;;  %10510 = vst [vmem:[#allocation33_spill] sm:$0xff] %v7276_v35  ;;  %v7278_v9 = vld [vmem:[#allocation6 + $0x1d0] sm:$0xff] }
  0x86   :  { %1117 = vmatprep.mubr.f32.mxu1 %v10487_v59  ;;  %10498 = vst [vmem:[#allocation24_spill] sm:$0xff] %v7236_v25  ;;  %10503 = vst [vmem:[#allocation28_spill] sm:$0xff] %v7250_v27  ;;  %v7252_v59 = vpack.c.bf16 %v1360_v34, %v1353_v21  ;;  %v10508_v34 = vand.u32 4294901760, %v7170_v55  ;;  %v10516_v40 = vand.u32 4294901760, %v7212_v57  ;;  %v10520_v48 = vand.u32 4294901760, %v7250_v27  ;;  %v7384_v25 = vld [vmem:[#allocation6 + $0x170] sm:$0xff] }
  0x87   :  { %10499 = vst [vmem:[#allocation25_spill] sm:$0xff] %v7241_v23  ;;  %10501 = vst [vmem:[#allocation26_spill] sm:$0xff] %v7246_v26  ;;  %v7267_v7 = vsub.f32 %v7168_v52, %v10506_v3  ;;  %v10515_v3 = vand.u32 4294901760, %v7210_v18  ;;  %v7382_v23 = vld [vmem:[#allocation6 + $0x1f8] sm:$0xff] }
  0x88   :  { %10504 = vst [vmem:[#allocation29_spill] sm:$0xff] %v7252_v59  ;;  %5779 = vmatpush3.bf16.msra.mxu0 %v7037_v29  ;;  %v7272_v21 = vsub.f32 %v7170_v55, %v10508_v34  ;;  %10511 = vst [vmem:[#allocation34_spill] sm:$0xff] %v7278_v9  ;;  %5807 = vmatpush3.bf16.msra.mxu1 %v6752_v32  ;;  %v10512_v34 = vld [vmem:[#allocation12_spill] sm:$0xff]  ;;  %v7313_v29 = vsub.f32 %v7192_v8, %v10517_v38 }
  0x89   :  { %10507 = vst [vmem:[#allocation31_spill] sm:$0xff] %v7267_v7  ;;  %5781 = vmatprep.subr.bf16.mxu0 %v7044_v1  ;;  %v7289_v59 = vrot.slane %v10513_v46, %v10512_v34  ;;  %5809 = vmatprep.subr.bf16.mxu1 %v6768_v45  ;;  %v7299_v63 = vsub.f32 %v7210_v18, %v10515_v3  ;;  %v10518_v3 = vand.u32 4294901760, %v7201_v20  ;;  %v10519_v1 = vand.u32 4294901760, %v7248_v28  ;;  %v7362_v18 = vld [vmem:[#allocation6 + $0x160] sm:$0xff] }
  0x8a   :  { %10509 = vst [vmem:[#allocation32_spill] sm:$0xff] %v7272_v21  ;;  %v7304_v46 = vsub.f32 %v7212_v57, %v10516_v40  ;;  %v7320_v40 = vld [vmem:[#allocation6 + $0x1d8] sm:$0xff]  ;;  %v10521_v34 = vand.u32 4294901760, %v7206_v24  ;;  %v7360_v57 = vld [vmem:[#allocation6 + $0x1e8] sm:$0xff]  ;;  %10527 = vst [vmem:[#allocation39_spill] sm:$0xff] %v7362_v18 }
  0x8b   :  { %10514 = vst [vmem:[#allocation35_spill] sm:$0xff] %v7289_v59  ;;  %v7318_v32 = vsub.f32 %v7201_v20, %v10518_v3  ;;  %v226_v45 = vcombine.high %v7289_v59, %v7289_v59  ;;  %v7330_v38 = vsub.f32 %v7248_v28, %v10519_v1  ;;  %v7335_v3 = vsub.f32 %v7250_v27, %v10520_v48  ;;  %v7364_v21 = vld [vmem:[#allocation6 + $0x168] sm:$0xff] }
  0x8c   :  { %5783 = vmatpush3.bf16.msra.mxu0 %v7050_v14  ;;  %5811 = vmatpush3.bf16.msra.mxu1 %v6776_v51  ;;  %v7340_v59 = vsub.f32 %v7206_v24, %v10521_v34  ;;  %v7344_v51 = vld [vmem:[#allocation6 + $0x158] sm:$0xff]  ;;  %v7346_v14 = vld [vmem:[#allocation6 + $0x1e0] sm:$0xff]  ;;  %v10523_v1 = vand.u32 4294901760, %v7219_v19  ;;  %v10525_v48 = vand.u32 4294901760, %v7261_v39  ;;  %10526 = vst [vmem:[#allocation38_spill] sm:$0xff] %v7360_v57  ;;  %10528 = vst [vmem:[#allocation40_spill] sm:$0xff] %v7364_v21 }
  0x8d   :  { %5785 = vmatprep.subr.bf16.mxu0 %v7056_v15  ;;  %v7342_v15 = vld [vmem:[#allocation6 + $0x150] sm:$0xff]  ;;  %5813 = vmatprep.subr.bf16.mxu1 %v6798_v4  ;;  %v7366_v7 = vand.u32 4294901760, %v226_v45  ;;  %v10530_v4 = vand.u32 4294901760, %v7276_v35  ;;  %10534 = vst [vmem:[#allocation44_spill] sm:$0xff] %v7382_v23  ;;  %10535 = vst [vmem:[#allocation45_spill] sm:$0xff] %v7384_v25 }
  0x8e   :  { %10522 = vst [vmem:[#allocation36_spill] sm:$0xff] %v7340_v59  ;;  %v7352_v28 = vsub.f32 %v7219_v19, %v10523_v1  ;;  %v7357_v27 = vsub.f32 %v7261_v39, %v10525_v48  ;;  %v10532_v39 = vand.u32 4294901760, %v7278_v9  ;;  %v7380_v59 = vld [vmem:[#allocation6 + $0x1f0] sm:$0xff] }
  0x8f   :  { %10529 = vst [vmem:[#allocation41_spill] sm:$0xff] %v7366_v7  ;;  %v7371_v1 = vsub.f32 %v7276_v35, %v10530_v4  ;;  %10533 = vst [vmem:[#allocation43_spill] sm:$0xff] %v7380_v59  ;;  %v7391_v48 = vsub.f32 %v226_v45, %v7366_v7  ;;  %v7399_v4 = vld [vmem:[#allocation6 + $0x178] sm:$0xff] }
  0x90   :  { %10524 = vst [vmem:[#allocation37_spill] sm:$0xff] %v7352_v28  ;;  %v7378_v34 = vsub.f32 %v7278_v9, %v10532_v39  ;;  %5787 = vmatpush3.bf16.msra.mxu0 %v7062_v61  ;;  %5815 = vmatpush3.bf16.msra.mxu1 %v6814_v22  ;;  %v10537_v39 = vand.u32 4294901760, %v7320_v40  ;;  %v10539_v22 = vand.u32 4294901760, %v7344_v51 }
  0x91   :  { %10531 = vst [vmem:[#allocation42_spill] sm:$0xff] %v7371_v1  ;;  %10536 = vst [vmem:[#allocation46_spill] sm:$0xff] %v7391_v48  ;;  %5789 = vmatprep.subr.bf16.mxu0 %v7068_v37  ;;  %5817 = vmatprep.subr.bf16.mxu1 %v6827_v54  ;;  %v10538_v54 = vand.u32 4294901760, %v7342_v15 }
  0x92   :  { %v7409_v9 = vsub.f32 %v7320_v40, %v10537_v39  ;;  %v7423_v37 = vsub.f32 %v7344_v51, %v10539_v22  ;;  %v10540_v39 = vand.u32 4294901760, %v7346_v14  ;;  %v10542_v22 = vand.u32 4294901760, %v7362_v18 }
  0x93   :  { %v7418_v45 = vsub.f32 %v7342_v15, %v10538_v54 }
  0x94   :  { %5791 = vmatpush3.bf16.msra.mxu0 %v7074_v30  ;;  %v7428_v43 = vsub.f32 %v7346_v14, %v10540_v39  ;;  %5819 = vmatpush3.bf16.msra.mxu1 %v6844_v12  ;;  %v10541_v30 = vand.u32 4294901760, %v7360_v57  ;;  %v7442_v28 = vsub.f32 %v7362_v18, %v10542_v22  ;;  %v10543_v39 = vand.u32 4294901760, %v7364_v21 }
  0x95   :  { %5793 = vmatprep.subr.bf16.mxu0 %v7080_v44  ;;  %5821 = vmatprep.subr.bf16.mxu1 %v10474_v60  ;;  %v10544_v12 = vand.u32 4294901760, %v7380_v59  ;;  %v10546_v22 = vand.u32 4294901760, %v7384_v25 }
  0x96   :  { %v7436_v54 = vsub.f32 %v7360_v57, %v10541_v30  ;;  %v7447_v61 = vsub.f32 %v7364_v21, %v10543_v39  ;;  %v10545_v30 = vand.u32 4294901760, %v7382_v23  ;;  %v10548_v39 = vand.u32 4294901760, %v7391_v48 }
  0x97   :  { %v7453_v44 = vsub.f32 %v7380_v59, %v10544_v12  ;;  %v7463_v18 = vsub.f32 %v7384_v25, %v10546_v22  ;;  %v10554_v59 = vand.u32 4294901760, %v7144_v16  ;;  %v10561_v25 = vand.u32 4294901760, %v7201_v20 }
  0x98   :  { %v7458_v35 = vsub.f32 %v7382_v23, %v10545_v30  ;;  %v1223_v21 = vsub.f32 %v7391_v48, %v10548_v39  ;;  %5795 = vmatpush3.bf16.msra.mxu0 %v7086_v50  ;;  %v10549_v23 = vand.u32 4294901760, %v7399_v4  ;;  %5823 = vmatpush3.bf16.msra.mxu1 %v10475_v13  ;;  %v10552_v13 = vand.u32 4294901760, %v7125_v10 }
  0x99   :  { %10547 = vst [vmem:[#allocation47_spill] sm:$0xff] %v7463_v18  ;;  %5797 = vmatprep.subr.bf16.mxu0 %v7091_v58  ;;  %5825 = vmatprep.subr.bf16.mxu1 %v10476_v11  ;;  %v10551_v58 = vand.u32 4294901760, %v7123_v42  ;;  %v10555_v50 = vand.u32 4294901760, %v7146_v6  ;;  %v10557_v11 = vand.u32 4294901760, %v7168_v52  ;;  %v10560_v39 = vand.u32 4294901760, %v7192_v8 }
  0x9a   :  { %v7477_v22 = vsub.f32 %v7399_v4, %v10549_v23  ;;  %v1224_v23 = vand.u32 4294901760, %v1223_v21  ;;  %v10558_v21 = vand.u32 4294901760, %v7170_v55 }
  0x9b   :  { %v7495_v12 = vpack.c.bf16 %v10552_v13, %v10551_v58  ;;  %v7501_v30 = vpack.c.bf16 %v10555_v50, %v10554_v59  ;;  %v7513_v60 = vpack.c.bf16 %v10561_v25, %v10560_v39  ;;  %v10563_v58 = vand.u32 4294901760, %v7206_v24 }
  0x9c   :  { %10550 = vst [vmem:[#allocation48_spill] sm:$0xff] %v7477_v22  ;;  %v7507_v57 = vpack.c.bf16 %v10558_v21, %v10557_v11  ;;  %5799 = vmatpush3.bf16.msra.mxu0 %v7093_v41  ;;  %v10564_v13 = vand.u32 4294901760, %v7219_v19  ;;  %v10566_v50 = vand.u32 4294901760, %v7224_v2  ;;  %v10569_v21 = vand.u32 4294901760, %v7246_v26  ;;  %5827 = vmatpush3.bf16.msra.mxu1 %v10477_v33 }
  0x9d   :  { %10553 = vst [vmem:[#allocation49_spill] sm:$0xff] %v7495_v12  ;;  %10556 = vst [vmem:[#allocation50_spill] sm:$0xff] %v7501_v30  ;;  %v10567_v30 = vand.u32 4294901760, %v7229_v47  ;;  %v10572_v41 = vand.u32 4294901760, %v7299_v63  ;;  %v10573_v39 = vand.u32 4294901760, %v7304_v46  ;;  %5833 = vmatprep.subr.bf16.mxu0 %v7155_v17  ;;  %5829 = vmatprep.subr.bf16.mxu1 %v10480_v0  ;;  %v10584_v33 = vand.u32 4294901760, %v7418_v45 }
  0x9e   :  { %10559 = vst [vmem:[#allocation51_spill] sm:$0xff] %v7507_v57  ;;  %10562 = vst [vmem:[#allocation52_spill] sm:$0xff] %v7513_v60  ;;  %v7520_v59 = vpack.c.bf16 %v10564_v13, %v10563_v58  ;;  %v10570_v57 = vand.u32 4294901760, %v7257_v49  ;;  %v10576_v13 = vand.u32 4294901760, %v7335_v3  ;;  %v10585_v58 = vand.u32 4294901760, %v7423_v37  ;;  %v10614_v12 = vld [vmem:[#allocation37_spill] sm:$0xff] }
  0x9f   :  { %v7526_v11 = vpack.c.bf16 %v10567_v30, %v10566_v50  ;;  %v7538_v60 = vpack.c.bf16 %v10573_v39, %v10572_v41  ;;  %v10575_v30 = vand.u32 4294901760, %v7330_v38  ;;  %v10581_v41 = vand.u32 4294901760, %v7378_v34  ;;  %1015 = vmatmul.mubr.f32.vlgmr.msra.gmra.mrb[4].mxu0 %v6953_v62 }
  0xa0   :  { %10565 = vst [vmem:[#allocation53_spill] sm:$0xff] %v7520_v59  ;;  %v7532_v25 = vpack.c.bf16 %v10570_v57, %v10569_v21  ;;  %v10578_v57 = vand.u32 4294901760, %v7357_v27  ;;  %v10579_v21 = vand.u32 4294901760, %v7371_v1  ;;  %v10582_v39 = vand.u32 4294901760, %v7409_v9  ;;  %5835 = vmatpush3.bf16.msra.mxu0 %v7178_v36  ;;  %1225 = vmatprep.mubr.f32.mxu0 %v1224_v23  ;;  %v10615_v23 = vld [vmem:[#allocation29_spill] sm:$0xff] }
  0xa1   :  { %10568 = vst [vmem:[#allocation54_spill] sm:$0xff] %v7526_v11  ;;  %10574 = vst [vmem:[#allocation56_spill] sm:$0xff] %v7538_v60  ;;  %v7547_v50 = vpack.c.bf16 %v10576_v13, %v10575_v30  ;;  %v7566_v30 = vpack.c.bf16 %v10585_v58, %v10584_v33  ;;  %v10587_v13 = vand.u32 4294901760, %v7428_v43  ;;  %v10593_v0 = vand.u32 4294901760, %v7453_v44  ;;  %5837 = vmatprep.subr.bf16.mxu0 %v7184_v5  ;;  %v10613_v11 = vld [vmem:[#allocation36_spill] sm:$0xff]  ;;  %v10616_v5 = vld [vmem:[#allocation31_spill] sm:$0xff] }
  0xa2   :  { %10571 = vst [vmem:[#allocation55_spill] sm:$0xff] %v7532_v25  ;;  %v7553_v25 = vpack.c.bf16 %v10579_v21, %v10578_v57  ;;  %v7559_v60 = vpack.c.bf16 %v10582_v39, %v10581_v41  ;;  %v10590_v21 = vand.u32 4294901760, %v7442_v28  ;;  %v10594_v39 = vand.u32 4294901760, %v7458_v35  ;;  %5831 = vmatpush3.bf16.msra.mxu1 %v10489_v53  ;;  %v10618_v53 = vld [vmem:[#allocation32_spill] sm:$0xff] }
  0xa3   :  { %10577 = vst [vmem:[#allocation57_spill] sm:$0xff] %v7547_v50  ;;  %10586 = vst [vmem:[#allocation60_spill] sm:$0xff] %v7566_v30  ;;  %v10588_v50 = vand.u32 4294901760, %v7436_v54  ;;  %v10596_v58 = vand.u32 4294901760, %v7133_v31  ;;  %v10597_v33 = vand.u32 4294901760, %v7137_v56  ;;  %v10603_v56 = vand.u32 4294901760, %v7229_v47  ;;  %5865 = vmatprep.subr.bf16.mxu1 %v10615_v23 }
  0xa4   :  { %10580 = vst [vmem:[#allocation58_spill] sm:$0xff] %v7553_v25  ;;  %10583 = vst [vmem:[#allocation59_spill] sm:$0xff] %v7559_v60  ;;  %v10591_v25 = vand.u32 4294901760, %v7447_v61  ;;  %v7584_v60 = vpack.c.bf16 %v10594_v39, %v10593_v0  ;;  %v1262_v0 = vand.u32 4294901760, %v7318_v32  ;;  %v10602_v39 = vand.u32 4294901760, %v7224_v2  ;;  %v10609_v32 = vld [vmem:[#allocation24_spill] sm:$0xff] }
  0xa5   :  { %v7572_v57 = vpack.c.bf16 %v10588_v50, %v10587_v13  ;;  %v7591_v50 = vpack.c.bf16 %v10597_v33, %v10596_v58  ;;  %v10599_v13 = vand.u32 4294901760, %v7463_v18  ;;  %v1275_v58 = vsub.f32 %v7229_v47, %v10603_v56  ;;  %1119 = vmatmul.mubr.f32.vlgmr.msra.gmra.mrb[4].mxu1 %v6953_v62 }
  0xa6   :  { %v7578_v41 = vpack.c.bf16 %v10591_v25, %v10590_v21  ;;  %10595 = vst [vmem:[#allocation63_spill] sm:$0xff] %v7584_v60  ;;  %v1255_v21 = vand.u32 4294901760, %v7313_v29  ;;  %v1268_v31 = vsub.f32 %v7224_v2, %v10602_v39  ;;  %v10610_v60 = vand.u32 4294901760, %v10609_v32  ;;  %1461 = vmatprep.mubr.f32.mxu1 %v7366_v7 }
  0xa7   :  { %10589 = vst [vmem:[#allocation61_spill] sm:$0xff] %v7572_v57  ;;  %10598 = vst [vmem:[#allocation64_spill] sm:$0xff] %v7591_v50  ;;  %v10600_v57 = vand.u32 4294901760, %v7477_v22  ;;  %v1381_v59 = vand.u32 4294901760, %v10613_v11  ;;  %v1388_v56 = vand.u32 4294901760, %v10614_v12  ;;  %v10617_v36 = vand.u32 4294901760, %v10616_v5  ;;  %5839 = vmatpush3.bf16.msra.mxu0 %v7591_v50 }
  0xa8   :  { %10592 = vst [vmem:[#allocation62_spill] sm:$0xff] %v7578_v41  ;;  %v10611_v41 = vld [vmem:[#allocation25_spill] sm:$0xff]  ;;  %v10619_v17 = vand.u32 4294901760, %v10618_v53  ;;  %v10624_v11 = vld [vmem:[#allocation15_spill] sm:$0xff]  ;;  %v10627_v5 = vld [vmem:[#allocation18_spill] sm:$0xff]  ;;  %v1269_v48 = vand.u32 4294901760, %v1268_v31 }
  0xa9   :  { %v7597_v25 = vpack.c.bf16 %v10600_v57, %v10599_v13  ;;  %v10604_v57 = vld [vmem:[#allocation19_spill] sm:$0xff]  ;;  %v10606_v13 = vld [vmem:[#allocation13_spill] sm:$0xff]  ;;  %v10612_v30 = vand.u32 4294901760, %v10611_v41  ;;  %v10625_v32 = vand.u32 4294901760, %v10624_v11  ;;  %v10633_v11 = vand.u32 4294901760, %v7304_v46 }
  0xaa   :  { %v10605_v33 = vand.u32 4294901760, %v10604_v57  ;;  %v5868_v57 = vpack.c.bf16 %v10619_v17, %v10617_v36  ;;  %v10628_v36 = vand.u32 4294901760, %v10627_v5  ;;  %v10629_v17 = vld [vmem:[#allocation17_spill] sm:$0xff]  ;;  %v10645_v7 = vand.u32 4294901760, %v7371_v1 }
  0xab   :  { %10601 = vst [vmem:[#allocation65_spill] sm:$0xff] %v7597_v25  ;;  %v10607_v25 = vand.u32 4294901760, %v10606_v13  ;;  %v5866_v39 = vpack.c.bf16 %v10612_v30, %v10610_v60  ;;  %v10620_v13 = vand.u32 4294901760, %v7246_v26  ;;  %v10622_v60 = vld [vmem:[#allocation14_spill] sm:$0xff]  ;;  %v10630_v23 = vand.u32 4294901760, %v10629_v17  ;;  %v10652_v50 = vld [vmem:[#allocation33_spill] sm:$0xff] }
  0xac   :  { %v10623_v30 = vand.u32 4294901760, %v10622_v60  ;;  %v10632_v60 = vand.u32 4294901760, %v7299_v63  ;;  %v1289_v62 = vsub.f32 %v7304_v46, %v10633_v11 }
  0xad   :  { %v7614_v29 = vpack.c.bf16 %v10607_v25, %v10605_v33  ;;  %v1394_v25 = vsub.f32 %v7246_v26, %v10620_v13  ;;  %v10621_v33 = vand.u32 4294901760, %v7257_v49  ;;  %v7645_v53 = vpack.c.bf16 %v10630_v23, %v10628_v36  ;;  %5867 = vmatpush3.bf16.msra.mxu1 %v5866_v39  ;;  %v10638_v39 = vld [vmem:[#allocation23_spill] sm:$0xff] }
  0xae   :  { %v7637_v12 = vpack.c.bf16 %v10625_v32, %v10623_v30  ;;  %v5870_v13 = vpack.c.bf16 %v1262_v0, %v1255_v21  ;;  %v1276_v26 = vand.u32 4294901760, %v1275_v58  ;;  %v1282_v30 = vsub.f32 %v7299_v63, %v10632_v60  ;;  %5869 = vmatprep.subr.bf16.mxu1 %v5868_v57  ;;  %v10643_v60 = vld [vmem:[#allocation28_spill] sm:$0xff] }
  0xaf   :  { %10608 = vst [vmem:[#allocation19_spill] sm:$0xff] %v7614_v29  ;;  %v1401_v41 = vsub.f32 %v7257_v49, %v10621_v33  ;;  %10631 = vst [vmem:[#allocation24_spill] sm:$0xff] %v7645_v53  ;;  %5841 = vmatprep.subr.bf16.mxu0 %v7614_v29  ;;  %v5872_v33 = vpack.c.bf16 %v1388_v56, %v1381_v59  ;;  %v1395_v32 = vand.u32 4294901760, %v1394_v25  ;;  %v10634_v36 = vand.u32 4294901760, %v7330_v38  ;;  %v10636_v59 = vld [vmem:[#allocation20_spill] sm:$0xff] }
  0xb0   :  { %10626 = vst [vmem:[#allocation13_spill] sm:$0xff] %v7637_v12  ;;  %v10635_v0 = vand.u32 4294901760, %v7335_v3  ;;  %v10637_v58 = vand.u32 4294901760, %v10636_v59  ;;  %v10639_v56 = vand.u32 4294901760, %v10638_v39  ;;  %v10640_v57 = vand.u32 4294901760, %v7357_v27  ;;  %5843 = vmatpush3.bf16.msra.mxu0 %v7637_v12  ;;  %v10646_v39 = vld [vmem:[#allocation35_spill] sm:$0xff] }
  0xb1   :  { %v1402_v5 = vand.u32 4294901760, %v1401_v41  ;;  %v1408_v21 = vsub.f32 %v7330_v38, %v10634_v36  ;;  %v10641_v41 = vld [vmem:[#allocation27_spill] sm:$0xff]  ;;  %v10644_v11 = vand.u32 4294901760, %v10643_v60  ;;  %v1303_v59 = vsub.f32 %v7371_v1, %v10645_v7  ;;  %5845 = vmatprep.subr.bf16.mxu0 %v7645_v53  ;;  %5871 = vmatpush3.bf16.msra.mxu1 %v5870_v13 }
  0xb2   :  { %v1415_v31 = vsub.f32 %v7335_v3, %v10635_v0  ;;  %v7665_v17 = vpack.c.bf16 %v10639_v56, %v10637_v58  ;;  %v1296_v25 = vsub.f32 %v7357_v27, %v10640_v57  ;;  %v10642_v23 = vand.u32 4294901760, %v10641_v41  ;;  %5873 = vmatprep.subr.bf16.mxu1 %v5872_v33 }
  0xb3   :  { %v5874_v0 = vpack.c.bf16 %v1276_v26, %v1269_v48  ;;  %v7681_v58 = vand.u32 4294901760, %v10646_v39  ;;  %v1283_v56 = vand.u32 4294901760, %v1282_v30  ;;  %v1290_v57 = vand.u32 4294901760, %v1289_v62 }
  0xb4   :  { %v7675_v36 = vpack.c.bf16 %v10644_v11, %v10642_v23  ;;  %v10648_v12 = vand.u32 4294901760, %v7378_v34  ;;  %v10649_v23 = vand.u32 4294901760, %v7409_v9  ;;  %v5876_v48 = vpack.c.bf16 %v1402_v5, %v1395_v32  ;;  %v10650_v11 = vld [vmem:[#allocation30_spill] sm:$0xff]  ;;  %5847 = vmatpush3.bf16.msra.mxu0 %v7665_v17 }
  0xb5   :  { %10647 = vst [vmem:[#allocation25_spill] sm:$0xff] %v7681_v58  ;;  %v1409_v60 = vand.u32 4294901760, %v1408_v21  ;;  %v1416_v7 = vand.u32 4294901760, %v1415_v31  ;;  %v10651_v29 = vand.u32 4294901760, %v10650_v11  ;;  %v10653_v1 = vand.u32 4294901760, %v10652_v50  ;;  %5875 = vmatpush3.bf16.msra.mxu1 %v5874_v0 }
  0xb6   :  { %v1422_v41 = vsub.f32 %v7378_v34, %v10648_v12  ;;  %v1429_v26 = vsub.f32 %v7409_v9, %v10649_v23  ;;  %v1297_v13 = vand.u32 4294901760, %v1296_v25  ;;  %v1304_v30 = vand.u32 4294901760, %v1303_v59  ;;  %5849 = vmatprep.subr.bf16.mxu0 %v7675_v36  ;;  %5877 = vmatprep.subr.bf16.mxu1 %v5876_v48 }
  0xb7   :  { %v7694_v53 = vpack.c.bf16 %v10653_v1, %v10651_v29  ;;  %v10654_v12 = vand.u32 4294901760, %v7418_v45  ;;  %v10655_v23 = vand.u32 4294901760, %v7423_v37  ;;  %v7705_v32 = vsub.f32 %v10646_v39, %v7681_v58  ;;  %v10657_v1 = vld [vmem:[#allocation34_spill] sm:$0xff] }
  0xb8   :  { %v10658_v50 = vand.u32 4294901760, %v10657_v1  ;;  %v10659_v29 = vand.u32 4294901760, %v7320_v40  ;;  %v5878_v21 = vpack.c.bf16 %v1290_v57, %v1283_v56  ;;  %v1423_v31 = vand.u32 4294901760, %v1422_v41  ;;  %v10665_v57 = vld [vmem:[#allocation38_spill] sm:$0xff] }
  0xb9   :  { %v1310_v62 = vsub.f32 %v7418_v45, %v10654_v12  ;;  %v1317_v33 = vsub.f32 %v7423_v37, %v10655_v23  ;;  %10656 = vst [vmem:[#allocation36_spill] sm:$0xff] %v7705_v32  ;;  %v1430_v25 = vand.u32 4294901760, %v1429_v26  ;;  %v5880_v59 = vpack.c.bf16 %v1416_v7, %v1409_v60  ;;  %5851 = vmatpush3.bf16.msra.mxu0 %v7694_v53 }
  0xba   :  { %v7712_v5 = vpack.c.bf16 %v10659_v29, %v10658_v50  ;;  %v10660_v11 = vand.u32 4294901760, %v7428_v43  ;;  %v10661_v39 = vand.u32 4294901760, %v7436_v54  ;;  %v10662_v0 = vand.u32 4294901760, %v7342_v15  ;;  %5879 = vmatpush3.bf16.msra.mxu1 %v5878_v21  ;;  %v10671_v21 = vld [vmem:[#allocation39_spill] sm:$0xff] }
  0xbb   :  { %v10663_v1 = vand.u32 4294901760, %v7344_v51  ;;  %v10664_v56 = vand.u32 4294901760, %v7346_v14  ;;  %v10666_v41 = vand.u32 4294901760, %v10665_v57  ;;  %v5882_v48 = vpack.c.bf16 %v1304_v30, %v1297_v13  ;;  %5881 = vmatprep.subr.bf16.mxu1 %v5880_v59  ;;  %v10676_v57 = vld [vmem:[#allocation43_spill] sm:$0xff] }
  0xbc   :  { %v1436_v12 = vsub.f32 %v7428_v43, %v10660_v11  ;;  %v1443_v23 = vsub.f32 %v7436_v54, %v10661_v39  ;;  %v1311_v60 = vand.u32 4294901760, %v1310_v62  ;;  %v1318_v7 = vand.u32 4294901760, %v1317_v33  ;;  %5853 = vmatprep.subr.bf16.mxu0 %v7712_v5 }
  0xbd   :  { %v7724_v40 = vpack.c.bf16 %v10663_v1, %v10662_v0  ;;  %v7730_v26 = vpack.c.bf16 %v10666_v41, %v10664_v56  ;;  %v10200_v50 = vand.u32 4294901760, %v7705_v32  ;;  %v5884_v15 = vpack.c.bf16 %v1430_v25, %v1423_v31  ;;  %v10673_v25 = vld [vmem:[#allocation40_spill] sm:$0xff] }
  0xbe   :  { %v10667_v51 = vand.u32 4294901760, %v7442_v28  ;;  %v10668_v14 = vand.u32 4294901760, %v7447_v61  ;;  %v1437_v39 = vand.u32 4294901760, %v1436_v12  ;;  %v1444_v0 = vand.u32 4294901760, %v1443_v23  ;;  %v10678_v12 = vld [vmem:[#allocation44_spill] sm:$0xff]  ;;  %5883 = vmatpush3.bf16.msra.mxu1 %v5882_v48 }
  0xbf   :  { %v10669_v13 = vand.u32 4294901760, %v7453_v44  ;;  %v10670_v62 = vand.u32 4294901760, %v7458_v35  ;;  %5855 = vmatpush3.bf16.msra.mxu0 %v7724_v40  ;;  %v10672_v31 = vand.u32 4294901760, %v10671_v21  ;;  %v10674_v1 = vand.u32 4294901760, %v10673_v25  ;;  %5885 = vmatprep.subr.bf16.mxu1 %v5884_v15 }
  0xc0   :  { %v1324_v29 = vsub.f32 %v7442_v28, %v10667_v51  ;;  %v1331_v11 = vsub.f32 %v7447_v61, %v10668_v14  ;;  %v10677_v59 = vand.u32 4294901760, %v10676_v57  ;;  %v10679_v23 = vand.u32 4294901760, %v10678_v12  ;;  %5857 = vmatprep.subr.bf16.mxu0 %v7730_v26 }
  0xc1   :  { %v1450_v30 = vsub.f32 %v7453_v44, %v10669_v13  ;;  %v1457_v33 = vsub.f32 %v7458_v35, %v10670_v62  ;;  %v7752_v56 = vpack.c.bf16 %v10674_v1, %v10672_v31  ;;  %v5886_v51 = vpack.c.bf16 %v1318_v7, %v1311_v60 }
  0xc2   :  { %v7758_v41 = vpack.c.bf16 %v10679_v23, %v10677_v59  ;;  %v1229_v14 = vsub.f32 %v7705_v32, %v10200_v50  ;;  %v1325_v13 = vand.u32 4294901760, %v1324_v29  ;;  %v1332_v62 = vand.u32 4294901760, %v1331_v11  ;;  %v10683_v59 = vld [vmem:[#allocation45_spill] sm:$0xff]  ;;  %v7818_v50 = vld [vmem:[#allocation6 + $0x218] sm:$0xff] }
  0xc3   :  { %10675 = vst [vmem:[#allocation37_spill] sm:$0xff] %v7752_v56  ;;  %v10681_v21 = vand.u32 4294901760, %v7463_v18  ;;  %v10682_v25 = vand.u32 4294901760, %v7477_v22  ;;  %v5888_v57 = vpack.c.bf16 %v1444_v0, %v1437_v39  ;;  %v1451_v60 = vand.u32 4294901760, %v1450_v30  ;;  %5859 = vmatpush3.bf16.msra.mxu0 %v7752_v56  ;;  %v7783_v39 = vld [vmem:[#allocation6 + $0x280] sm:$0xff]  ;;  %5887 = vmatpush3.bf16.msra.mxu1 %v5886_v51  ;;  %v7800_v51 = vld [vmem:[#allocation6 + $0x298] sm:$0xff] }
  0xc4   :  { %10680 = vst [vmem:[#allocation29_spill] sm:$0xff] %v7758_v41  ;;  %v1458_v7 = vand.u32 4294901760, %v1457_v33  ;;  %v10684_v12 = vand.u32 4294901760, %v10683_v59  ;;  %v10685_v48 = vand.u32 4294901760, %v7399_v4  ;;  %v5896_v11 = vpack.c.bf16 %v7125_v10, %v7123_v42  ;;  %10687 = vst [vmem:[#allocation32_spill] sm:$0xff] %v7783_v39  ;;  %5861 = vmatprep.subr.bf16.mxu0 %v7758_v41  ;;  %v7845_v10 = vld [vmem:[#allocation6 + $0x228] sm:$0xff] }
  0xc5   :  { %v1338_v31 = vsub.f32 %v7463_v18, %v10681_v21  ;;  %v1345_v1 = vsub.f32 %v7477_v22, %v10682_v25  ;;  %v5898_v23 = vpack.c.bf16 %v7146_v6, %v7144_v16  ;;  %v5900_v15 = vpack.c.bf16 %v7170_v55, %v7168_v52  ;;  %v7786_v21 = vld [vmem:[#allocation6 + $0x288] sm:$0xff]  ;;  %v7788_v25 = vld [vmem:[#allocation6 + $0x200] sm:$0xff]  ;;  %5889 = vmatprep.subr.bf16.mxu1 %v5888_v57  ;;  %v7798_v55 = vld [vmem:[#allocation6 + $0x290] sm:$0xff] }
  0xc6   :  { %v7775_v29 = vpack.c.bf16 %v10685_v48, %v10684_v12  ;;  %v1230_v0 = vand.u32 4294901760, %v1229_v14  ;;  %v5890_v30 = vpack.c.bf16 %v1332_v62, %v1325_v13  ;;  %10688 = vst [vmem:[#allocation14_spill] sm:$0xff] %v7786_v21  ;;  %10689 = vst [vmem:[#allocation15_spill] sm:$0xff] %v7788_v25  ;;  %v5892_v42 = vpack.c.bf16 %v1458_v7, %v1451_v60  ;;  %v7796_v52 = vld [vmem:[#allocation6 + $0x208] sm:$0xff]  ;;  %v10693_v14 = vld [vmem:[#allocation26_spill] sm:$0xff] }
  0xc7   :  { %v1339_v33 = vand.u32 4294901760, %v1338_v31  ;;  %v1346_v4 = vand.u32 4294901760, %v1345_v1  ;;  %10690 = vst [vmem:[#allocation18_spill] sm:$0xff] %v7796_v52  ;;  %10691 = vst [vmem:[#allocation17_spill] sm:$0xff] %v7798_v55  ;;  %v10201_v1 = vand.u32 4294901760, %v7783_v39  ;;  %v7809_v57 = vld [vmem:[#allocation6 + $0x210] sm:$0xff] }
  0xc8   :  { %10686 = vst [vmem:[#allocation31_spill] sm:$0xff] %v7775_v29  ;;  %10692 = vst [vmem:[#allocation20_spill] sm:$0xff] %v7800_v51  ;;  %5863 = vmatpush3.bf16.msra.mxu0 %v7775_v29  ;;  %v10695_v60 = vld [vmem:[#allocation42_spill] sm:$0xff]  ;;  %v10202_v12 = vand.u32 4294901760, %v7786_v21  ;;  %v10203_v48 = vand.u32 4294901760, %v7788_v25  ;;  %v7820_v62 = vld [vmem:[#allocation6 + $0x2a0] sm:$0xff]  ;;  %5891 = vmatpush3.bf16.msra.mxu1 %v5890_v30  ;;  %v10723_v29 = vpack.c.bf16 %v7219_v19, %v7206_v24 }
  0xc9   :  { %10694 = vst [vmem:[#allocation23_spill] sm:$0xff] %v7809_v57  ;;  %10696 = vst [vmem:[#allocation27_spill] sm:$0xff] %v7818_v50  ;;  %5897 = vmatprep.subr.bf16.mxu0 %v5896_v11  ;;  %v5894_v31 = vpack.c.bf16 %v1346_v4, %v1339_v33  ;;  %v10205_v13 = vand.u32 4294901760, %v7796_v52  ;;  %v10207_v6 = vand.u32 4294901760, %v7798_v55  ;;  %v7825_v16 = vld [vmem:[#allocation6 + $0x2a8] sm:$0xff]  ;;  %5893 = vmatprep.subr.bf16.mxu1 %v5892_v42  ;;  %v7843_v7 = vld [vmem:[#allocation6 + $0x220] sm:$0xff] }
  0xca   :  { %10697 = vst [vmem:[#allocation28_spill] sm:$0xff] %v7820_v62  ;;  %10698 = vst [vmem:[#allocation35_spill] sm:$0xff] %v7825_v16  ;;  %v7839_v4 = vsub.f32 %v7783_v39, %v10201_v1  ;;  %v7847_v11 = vld [vmem:[#allocation6 + $0x2b0] sm:$0xff]  ;;  %v7855_v1 = vsub.f32 %v7786_v21, %v10202_v12  ;;  %v7860_v59 = vsub.f32 %v7788_v25, %v10203_v48  ;;  %v7863_v30 = vld [vmem:[#allocation6 + $0x2b8] sm:$0xff]  ;;  %v10728_v19 = vand.u32 4294901760, %v7845_v10 }
  0xcb   :  { %1231 = vmatmul.mubr.f32.vlgmr.msra.gmra.mrb[6].mxu0 %v1230_v0  ;;  %10699 = vst [vmem:[#allocation30_spill] sm:$0xff] %v7843_v7  ;;  %10700 = vst [vmem:[#allocation33_spill] sm:$0xff] %v7845_v10  ;;  %v10702_v33 = vld [vmem:[#allocation46_spill] sm:$0xff]  ;;  %v7873_v12 = vsub.f32 %v7798_v55, %v10207_v6  ;;  %v10706_v0 = vand.u32 4294901760, %v7800_v51  ;;  %v7893_v21 = vld [vmem:[#allocation6 + $0x2c0] sm:$0xff]  ;;  %v10720_v55 = vpack.c.bf16 %v7201_v20, %v7192_v8 }
  0xcc   :  { %10701 = vst [vmem:[#allocation34_spill] sm:$0xff] %v7847_v11  ;;  %5899 = vmatpush3.bf16.msra.mxu0 %v5898_v23  ;;  %1598 = vmatprep.mubr.f32.mxu0 %v10702_v33  ;;  %10703 = vst [vmem:[#allocation38_spill] sm:$0xff] %v7863_v30  ;;  %v7868_v23 = vsub.f32 %v7796_v52, %v10205_v13  ;;  %v7880_v42 = vld [vmem:[#allocation6 + $0x230] sm:$0xff]  ;;  %v7882_v25 = vld [vmem:[#allocation6 + $0x238] sm:$0xff]  ;;  %v10726_v52 = vand.u32 4294901760, %v10702_v33  ;;  %v10730_v33 = vand.u32 4294901760, %v7863_v30 }
  0xcd   :  { %5901 = vmatprep.subr.bf16.mxu0 %v5900_v15  ;;  %5895 = vmatpush3.bf16.msra.mxu1 %v5894_v31  ;;  %10705 = vst [vmem:[#allocation40_spill] sm:$0xff] %v7873_v12  ;;  %v7878_v48 = vsub.f32 %v7800_v51, %v10706_v0  ;;  %10708 = vst [vmem:[#allocation44_spill] sm:$0xff] %v7880_v42  ;;  %v10710_v15 = vld [vmem:[#allocation16_spill] sm:$0xff]  ;;  %v10711_v31 = vand.u32 4294901760, %v7809_v57  ;;  %v10715_v51 = vand.u32 4294901760, %v7818_v50  ;;  %v10724_v8 = vld [vmem:[#allocation22_spill] sm:$0xff] }
  0xce   :  { %10704 = vst [vmem:[#allocation39_spill] sm:$0xff] %v7868_v23  ;;  %10709 = vst [vmem:[#allocation45_spill] sm:$0xff] %v7882_v25  ;;  %5929 = vmatprep.subr.bf16.mxu1 %v10710_v15  ;;  %v7895_v0 = vld [vmem:[#allocation6 + $0x2c8] sm:$0xff]  ;;  %v10717_v15 = vand.u32 4294901760, %v7820_v62  ;;  %v8022_v32 = vld [vmem:[#allocation6 + $0x278] sm:$0xff] }
  0xcf   :  { %10707 = vst [vmem:[#allocation43_spill] sm:$0xff] %v7878_v48  ;;  %v7888_v13 = vsub.f32 %v7809_v57, %v10711_v31  ;;  %10713 = vst [vmem:[#allocation42_spill] sm:$0xff] %v7893_v21  ;;  %v7900_v39 = vsub.f32 %v7818_v50, %v10715_v51  ;;  %v7909_v57 = vld [vmem:[#allocation6 + $0x240] sm:$0xff]  ;;  %v10721_v51 = vand.u32 4294901760, %v7825_v16  ;;  %v7923_v6 = vld [vmem:[#allocation6 + $0x248] sm:$0xff] }
  0xd0   :  { %10714 = vst [vmem:[#allocation46_spill] sm:$0xff] %v7895_v0  ;;  %v7905_v31 = vsub.f32 %v7820_v62, %v10717_v15  ;;  %10719 = vst [vmem:[#allocation68_spill] sm:$0xff] %v7909_v57  ;;  %5903 = vmatpush3.bf16.msra.mxu0 %v10720_v55  ;;  %1463 = vmatmul.mubr.f32.vlgmr.msra.gmra.mrb[6].mxu1 %v7681_v58  ;;  %v10727_v62 = vand.u32 4294901760, %v7843_v7  ;;  %v10729_v55 = vand.u32 4294901760, %v7847_v11  ;;  %v7964_v58 = vld [vmem:[#allocation6 + $0x250] sm:$0xff]  ;;  %v10733_v15 = vand.u32 4294901760, %v7880_v42 }
  0xd1   :  { %10712 = vst [vmem:[#allocation26_spill] sm:$0xff] %v7888_v13  ;;  %10716 = vst [vmem:[#allocation66_spill] sm:$0xff] %v7900_v39  ;;  %v7918_v50 = vsub.f32 %v7825_v16, %v10721_v51  ;;  %5905 = vmatprep.subr.bf16.mxu0 %v10723_v29  ;;  %5931 = vmatpush3.bf16.msra.mxu1 %v10724_v8  ;;  %v10725_v16 = vld [vmem:[#allocation21_spill] sm:$0xff]  ;;  %v7944_v29 = vsub.f32 %v7845_v10, %v10728_v19  ;;  %v7962_v10 = vld [vmem:[#allocation6 + $0x2d8] sm:$0xff]  ;;  %v10746_v41 = vand.u32 4294901760, %v7923_v6 }
  0xd2   :  { %10718 = vst [vmem:[#allocation67_spill] sm:$0xff] %v7905_v31  ;;  %5933 = vmatprep.subr.bf16.mxu1 %v10725_v16  ;;  %1705 = vmatprep.mubr.f32.mxu1 %v10726_v52  ;;  %v7939_v24 = vsub.f32 %v7843_v7, %v10727_v62  ;;  %v7949_v20 = vsub.f32 %v7847_v11, %v10729_v55  ;;  %v7960_v19 = vld [vmem:[#allocation6 + $0x2d0] sm:$0xff]  ;;  %10731 = vst [vmem:[#allocation70_spill] sm:$0xff] %v7964_v58  ;;  %v10734_v62 = vand.u32 4294901760, %v7882_v25  ;;  %v7981_v11 = vld [vmem:[#allocation6 + $0x258] sm:$0xff] }
  0xd3   :  { %10722 = vst [vmem:[#allocation69_spill] sm:$0xff] %v7918_v50  ;;  %v7955_v52 = vsub.f32 %v7863_v30, %v10730_v33  ;;  %v10732_v55 = vpack.c.bf16 %v7229_v47, %v7224_v2  ;;  %v7972_v33 = vsub.f32 %v7880_v42, %v10733_v15  ;;  %10735 = vst [vmem:[#allocation71_spill] sm:$0xff] %v7981_v11  ;;  %v7983_v16 = vld [vmem:[#allocation6 + $0x2e0] sm:$0xff]  ;;  %v7985_v2 = vld [vmem:[#allocation6 + $0x2e8] sm:$0xff]  ;;  %v10739_v7 = vand.u32 4294901760, %v7895_v0 }
  0xd4   :  { %v7977_v51 = vsub.f32 %v7882_v25, %v10734_v62  ;;  %v10736_v47 = vpack.c.bf16 %v7257_v49, %v10693_v14  ;;  %v10737_v15 = vld [vmem:[#allocation64_spill] sm:$0xff]  ;;  %v8007_v14 = vld [vmem:[#allocation6 + $0x2f0] sm:$0xff]  ;;  %v8018_v42 = vld [vmem:[#allocation6 + $0x2f8] sm:$0xff]  ;;  %v10747_v25 = vpack.c.bf16 %v7304_v46, %v7299_v63  ;;  %v10751_v18 = vand.u32 4294901760, %v7960_v19 }
  0xd5   :  { %5907 = vmatpush3.bf16.msra.mxu0 %v10732_v55  ;;  %5935 = vmatpush3.bf16.msra.mxu1 %v10737_v15  ;;  %v10738_v55 = vand.u32 4294901760, %v7893_v21  ;;  %v7999_v30 = vsub.f32 %v7895_v0, %v10739_v7  ;;  %v8003_v8 = vld [vmem:[#allocation6 + $0x260] sm:$0xff]  ;;  %v8005_v49 = vld [vmem:[#allocation6 + $0x268] sm:$0xff]  ;;  %10741 = vst [vmem:[#allocation73_spill] sm:$0xff] %v8007_v14  ;;  %10744 = vst [vmem:[#allocation74_spill] sm:$0xff] %v8018_v42  ;;  %v10754_v63 = vand.u32 4294901760, %v7964_v58 }
  0xd6   :  { %5909 = vmatprep.subr.bf16.mxu0 %v10736_v47  ;;  %10740 = vst [vmem:[#allocation72_spill] sm:$0xff] %v8005_v49  ;;  %v10742_v47 = vld [vmem:[#allocation19_spill] sm:$0xff]  ;;  %v8020_v15 = vld [vmem:[#allocation6 + $0x270] sm:$0xff]  ;;  %v8051_v22 = vsub.f32 %v7960_v19, %v10751_v18  ;;  %v10756_v0 = vand.u32 4294901760, %v7983_v16  ;;  %v10757_v7 = vpack.c.bf16 %v10695_v60, %v7357_v27  ;;  %v10760_v18 = vand.u32 4294901760, %v8005_v49 }
  0xd7   :  { %v7994_v62 = vsub.f32 %v7893_v21, %v10738_v55  ;;  %5937 = vmatprep.subr.bf16.mxu1 %v10742_v47  ;;  %v10743_v55 = vand.u32 4294901760, %v7909_v57  ;;  %10745 = vst [vmem:[#allocation75_spill] sm:$0xff] %v8020_v15  ;;  %v8027_v47 = vsub.f32 %v7923_v6, %v10746_v41  ;;  %v10748_v41 = vpack.c.bf16 %v7335_v3, %v7330_v38 }
  0xd8   :  { %v10753_v38 = vand.u32 4294901760, %v7962_v10  ;;  %v8063_v46 = vsub.f32 %v7964_v58, %v10754_v63  ;;  %v10759_v58 = vand.u32 4294901760, %v8003_v8  ;;  %v10763_v60 = vpack.c.bf16 %v7409_v9, %v7378_v34 }
  0xd9   :  { %v8013_v21 = vsub.f32 %v7909_v57, %v10743_v55  ;;  %5911 = vmatpush3.bf16.msra.mxu0 %v10747_v25  ;;  %v10749_v55 = vld [vmem:[#allocation13_spill] sm:$0xff]  ;;  %v10750_v25 = vld [vmem:[#allocation24_spill] sm:$0xff]  ;;  %v10755_v57 = vand.u32 4294901760, %v7981_v11  ;;  %v10782_v34 = vand.u32 4294901760, %v7900_v39 }
  0xda   :  { %5913 = vmatprep.subr.bf16.mxu0 %v10748_v41  ;;  %5939 = vmatpush3.bf16.msra.mxu1 %v10749_v55  ;;  %10752 = vst [vmem:[#allocation13_spill] sm:$0xff] %v8051_v22  ;;  %v8056_v3 = vsub.f32 %v7962_v10, %v10753_v38  ;;  %v8074_v38 = vsub.f32 %v7983_v16, %v10756_v0  ;;  %v10758_v41 = vand.u32 4294901760, %v7985_v2  ;;  %v10761_v0 = vand.u32 4294901760, %v8007_v14 }
  0xdb   :  { %5941 = vmatprep.subr.bf16.mxu1 %v10750_v25  ;;  %v8068_v56 = vsub.f32 %v7981_v11, %v10755_v57  ;;  %v8087_v57 = vsub.f32 %v8003_v8, %v10759_v58  ;;  %v8092_v11 = vsub.f32 %v8005_v49, %v10760_v18  ;;  %v10764_v58 = vand.u32 4294901760, %v8018_v42 }
  0xdc   :  { %v8082_v63 = vsub.f32 %v7985_v2, %v10758_v41  ;;  %v8097_v27 = vsub.f32 %v8007_v14, %v10761_v0  ;;  %v10766_v18 = vand.u32 4294901760, %v8020_v15  ;;  %v10768_v0 = vand.u32 4294901760, %v8022_v32 }
  0xdd   :  { %5915 = vmatpush3.bf16.msra.mxu0 %v10757_v7  ;;  %v8107_v41 = vsub.f32 %v8018_v42, %v10764_v58  ;;  %v10771_v7 = vpack.c.bf16 %v7436_v54, %v7428_v43  ;;  %v10773_v58 = vand.u32 4294901760, %v7855_v1  ;;  %v10775_v43 = vand.u32 4294901760, %v7860_v59 }
  0xde   :  { %10762 = vst [vmem:[#allocation24_spill] sm:$0xff] %v8097_v27  ;;  %5917 = vmatprep.subr.bf16.mxu0 %v10763_v60  ;;  %5943 = vmatpush3.bf16.msra.mxu1 %v7665_v17  ;;  %v8112_v49 = vsub.f32 %v8020_v15, %v10766_v18  ;;  %v8117_v14 = vsub.f32 %v8022_v32, %v10768_v0  ;;  %v10776_v54 = vand.u32 4294901760, %v7868_v23  ;;  %v10778_v15 = vand.u32 4294901760, %v7873_v12 }
  0xdf   :  { %10765 = vst [vmem:[#allocation76_spill] sm:$0xff] %v8107_v41  ;;  %5945 = vmatprep.subr.bf16.mxu1 %v7675_v36  ;;  %v10770_v0 = vpack.c.bf16 %v7423_v37, %v7418_v45  ;;  %v10779_v45 = vand.u32 4294901760, %v7878_v48  ;;  %v10781_v37 = vand.u32 4294901760, %v7888_v13 }
  0xe0   :  { %10767 = vst [vmem:[#allocation77_spill] sm:$0xff] %v8112_v49  ;;  %10769 = vst [vmem:[#allocation78_spill] sm:$0xff] %v8117_v14 }
  0xe1   :  { %5919 = vmatpush3.bf16.msra.mxu0 %v10770_v0  ;;  %v10772_v0 = vand.u32 4294901760, %v7839_v4  ;;  %v8160_v42 = vpack.c.bf16 %v10779_v45, %v10778_v15  ;;  %v8166_v9 = vpack.c.bf16 %v10782_v34, %v10781_v37  ;;  %v10790_v15 = vand.u32 4294901760, %v7949_v20 }
  0xe2   :  { %5921 = vmatprep.subr.bf16.mxu0 %v10771_v7  ;;  %5947 = vmatpush3.bf16.msra.mxu1 %v7694_v53  ;;  %v8154_v7 = vpack.c.bf16 %v10776_v54, %v10775_v43  ;;  %v10787_v43 = vand.u32 4294901760, %v7939_v24  ;;  %v10788_v54 = vand.u32 4294901760, %v7944_v29  ;;  %v10791_v45 = vand.u32 4294901760, %v7955_v52 }
  0xe3   :  { %5949 = vmatprep.subr.bf16.mxu1 %v7712_v5  ;;  %v8148_v60 = vpack.c.bf16 %v10773_v58, %v10772_v0  ;;  %10780 = vst [vmem:[#allocation81_spill] sm:$0xff] %v8160_v42  ;;  %10783 = vst [vmem:[#allocation82_spill] sm:$0xff] %v8166_v9  ;;  %v10784_v58 = vand.u32 4294901760, %v7905_v31  ;;  %v10785_v0 = vand.u32 4294901760, %v7918_v50  ;;  %v10793_v34 = vand.u32 4294901760, %v7972_v33 }
  0xe4   :  { %10777 = vst [vmem:[#allocation80_spill] sm:$0xff] %v8154_v7  ;;  %v8178_v7 = vpack.c.bf16 %v10788_v54, %v10787_v43  ;;  %v8184_v42 = vpack.c.bf16 %v10791_v45, %v10790_v15  ;;  %v10794_v37 = vand.u32 4294901760, %v7977_v51  ;;  %v10798_v43 = vand.u32 4294901760, %v7999_v30 }
  0xe5   :  { %10774 = vst [vmem:[#allocation79_spill] sm:$0xff] %v8148_v60  ;;  %v8172_v18 = vpack.c.bf16 %v10785_v0, %v10784_v58  ;;  %v10796_v58 = vpack.c.bf16 %v7447_v61, %v7442_v28  ;;  %v10797_v0 = vand.u32 4294901760, %v7994_v62  ;;  %v10801_v15 = vand.u32 4294901760, %v8027_v47  ;;  %v10872_v60 = vld [vmem:[#allocation18_spill] sm:$0xff] }
  0xe6   :  { %10789 = vst [vmem:[#allocation84_spill] sm:$0xff] %v8178_v7  ;;  %10792 = vst [vmem:[#allocation85_spill] sm:$0xff] %v8184_v42  ;;  %v8190_v9 = vpack.c.bf16 %v10794_v37, %v10793_v34  ;;  %v10800_v7 = vand.u32 4294901760, %v8013_v21  ;;  %v10803_v42 = vand.u32 4294901760, %v8051_v22  ;;  %v10804_v34 = vand.u32 4294901760, %v8056_v3  ;;  %5951 = vmatpush3.bf16.msra.mxu1 %v7724_v40 }
  0xe7   :  { %10786 = vst [vmem:[#allocation83_spill] sm:$0xff] %v8172_v18  ;;  %5923 = vmatpush3.bf16.msra.mxu0 %v10796_v58  ;;  %v8199_v54 = vpack.c.bf16 %v10798_v43, %v10797_v0  ;;  %v10806_v28 = vand.u32 4294901760, %v8063_v46  ;;  %v10807_v61 = vand.u32 4294901760, %v8068_v56  ;;  %v10809_v0 = vpack.c.bf16 %v7458_v35, %v7453_v44  ;;  %5953 = vmatprep.subr.bf16.mxu1 %v7730_v26  ;;  %v10845_v18 = vld [vmem:[#allocation56_spill] sm:$0xff] }
  0xe8   :  { %10795 = vst [vmem:[#allocation86_spill] sm:$0xff] %v8190_v9  ;;  %v8205_v45 = vpack.c.bf16 %v10801_v15, %v10800_v7  ;;  %v8211_v37 = vpack.c.bf16 %v10804_v34, %v10803_v42  ;;  %v10810_v7 = vand.u32 4294901760, %v8074_v38  ;;  %v10811_v43 = vand.u32 4294901760, %v8082_v63  ;;  %v10841_v9 = vld [vmem:[#allocation54_spill] sm:$0xff] }
  0xe9   :  { %10799 = vst [vmem:[#allocation87_spill] sm:$0xff] %v8199_v54  ;;  %v8217_v58 = vpack.c.bf16 %v10807_v61, %v10806_v28  ;;  %5925 = vmatprep.subr.bf16.mxu0 %v10809_v0  ;;  %v10813_v42 = vand.u32 4294901760, %v8087_v57  ;;  %v10814_v34 = vand.u32 4294901760, %v8092_v11  ;;  %v10816_v28 = vand.u32 4294901760, %v8097_v27  ;;  %v10839_v54 = vld [vmem:[#allocation22_spill] sm:$0xff] }
  0xea   :  { %10802 = vst [vmem:[#allocation88_spill] sm:$0xff] %v8205_v45  ;;  %10805 = vst [vmem:[#allocation89_spill] sm:$0xff] %v8211_v37  ;;  %v8227_v15 = vpack.c.bf16 %v10811_v43, %v10810_v7  ;;  %v10817_v61 = vand.u32 4294901760, %v8107_v41  ;;  %v10819_v44 = vand.u32 4294901760, %v8112_v49  ;;  %v10820_v0 = vand.u32 4294901760, %v8117_v14  ;;  %v10822_v43 = vld [vmem:[#allocation48_spill] sm:$0xff] }
  0xeb   :  { %10808 = vst [vmem:[#allocation90_spill] sm:$0xff] %v8217_v58  ;;  %v8233_v37 = vpack.c.bf16 %v10814_v34, %v10813_v42  ;;  %v10825_v42 = vld [vmem:[#allocation49_spill] sm:$0xff]  ;;  %v10831_v45 = vld [vmem:[#allocation51_spill] sm:$0xff] }
  0xec   :  { %10812 = vst [vmem:[#allocation91_spill] sm:$0xff] %v8227_v15  ;;  %v8239_v35 = vpack.c.bf16 %v10817_v61, %v10816_v28  ;;  %v8246_v7 = vpack.c.bf16 %v10820_v0, %v10819_v44  ;;  %v10823_v15 = vld [vmem:[#allocation47_spill] sm:$0xff]  ;;  %v10826_v34 = vld [vmem:[#allocation37_spill] sm:$0xff]  ;;  %v10828_v28 = vld [vmem:[#allocation36_spill] sm:$0xff] }
  0xed   :  { %10815 = vst [vmem:[#allocation92_spill] sm:$0xff] %v8233_v37  ;;  %v10824_v58 = vpack.c.bf16 %v10822_v43, %v10823_v15  ;;  %5955 = vmatpush3.bf16.msra.mxu1 %v10826_v34  ;;  %v10827_v37 = vld [vmem:[#allocation29_spill] sm:$0xff]  ;;  %v10829_v61 = vld [vmem:[#allocation50_spill] sm:$0xff]  ;;  %v10832_v44 = vld [vmem:[#allocation31_spill] sm:$0xff]  ;;  %v10836_v43 = vand.u32 4294901760, %v10828_v28 }
  0xee   :  { %10818 = vst [vmem:[#allocation93_spill] sm:$0xff] %v8239_v35  ;;  %10821 = vst [vmem:[#allocation94_spill] sm:$0xff] %v8246_v7  ;;  %5957 = vmatprep.subr.bf16.mxu1 %v10827_v37  ;;  %v10830_v35 = vld [vmem:[#allocation41_spill] sm:$0xff]  ;;  %v8259_v0 = vld [vmem:[#allocation3 + $0x8] sm:$0xff] }
  0xef   :  { %5927 = vmatpush3.bf16.msra.mxu0 %v10824_v58  ;;  %10833 = vst [vmem:[#allocation48_spill] sm:$0xff] %v8259_v0  ;;  %v10834_v15 = vld [vmem:[#allocation16_spill] sm:$0xff]  ;;  %v10881_v14 = vld [vmem:[#allocation25_spill] sm:$0xff] }
  0xf0   :  { %5961 = vmatprep.subr.bf16.mxu0 %v10825_v42  ;;  %v10835_v58 = vld [vmem:[#allocation52_spill] sm:$0xff] }
  0xf1   :  { %5959 = vmatpush3.bf16.msra.mxu1 %v10832_v44  ;;  %v10837_v42 = vld [vmem:[#allocation12_spill] sm:$0xff] }
  0xf2   :  { %1601 = vmatmul.mubr.f32.vlgmr.msra.gmra.mrb[8].mxu0 %v10828_v28  ;;  %5993 = vmatprep.subr.bf16.mxu1 %v10834_v15  ;;  %v8267_v7 = vrot.slane %v8259_v0, %v10837_v42  ;;  %v10843_v28 = vld [vmem:[#allocation64_spill] sm:$0xff]  ;;  %v10867_v42 = vand.u32 4294901760, %v7900_v39  ;;  %v10870_v0 = vld [vmem:[#allocation15_spill] sm:$0xff] }
  0xf3   :  { %5963 = vmatpush3.bf16.msra.mxu0 %v10829_v61  ;;  %1875 = vmatprep.mubr.f32.mxu0 %v10830_v35  ;;  %v10838_v61 = vld [vmem:[#allocation53_spill] sm:$0xff] }
  0xf4   :  { %5965 = vmatprep.subr.bf16.mxu0 %v10831_v45  ;;  %1709 = vmatmul.mubr.f32.vlgmr.msra.gmra.mrb[8].mxu1 %v10836_v43  ;;  %v10840_v45 = vld [vmem:[#allocation21_spill] sm:$0xff]  ;;  %v242_v15 = vcombine.high %v8267_v7, %v8267_v7  ;;  %v10844_v43 = vld [vmem:[#allocation19_spill] sm:$0xff] }
  0xf5   :  { %5995 = vmatpush3.bf16.msra.mxu1 %v10839_v54  ;;  %1979 = vmatprep.mubr.f32.mxu1 %v10830_v35  ;;  %v10847_v54 = vld [vmem:[#allocation57_spill] sm:$0xff] }
  0xf6   :  { %5997 = vmatprep.subr.bf16.mxu1 %v10840_v45  ;;  %v10850_v45 = vld [vmem:[#allocation59_spill] sm:$0xff] }
  0xf7   :  { %5967 = vmatpush3.bf16.msra.mxu0 %v10835_v58  ;;  %v10842_v58 = vld [vmem:[#allocation55_spill] sm:$0xff] }
  0xf8   :  { %5969 = vmatprep.subr.bf16.mxu0 %v10838_v61  ;;  %v8280_v61 = vand.u32 4294901760, %v242_v15 }
  0xf9   :  { %5999 = vmatpush3.bf16.msra.mxu1 %v10843_v28  ;;  %v10852_v28 = vld [vmem:[#allocation61_spill] sm:$0xff] }
  0xfa   :  { %6001 = vmatprep.subr.bf16.mxu1 %v10844_v43  ;;  %10846 = vst [vmem:[#allocation47_spill] sm:$0xff] %v8280_v61  ;;  %v8287_v35 = vsub.f32 %v242_v15, %v8280_v61  ;;  %v10854_v15 = vand.u32 4294901760, %v7855_v1  ;;  %v10855_v43 = vld [vmem:[#allocation62_spill] sm:$0xff] }
  0xfb   :  { %5971 = vmatpush3.bf16.msra.mxu0 %v10841_v9  ;;  %v10848_v9 = vld [vmem:[#allocation58_spill] sm:$0xff] }
  0xfc   :  { %5973 = vmatprep.subr.bf16.mxu0 %v10842_v58  ;;  %10849 = vst [vmem:[#allocation49_spill] sm:$0xff] %v8287_v35  ;;  %v10243_v58 = vand.u32 4294901760, %v8287_v35 }
  0xfd   :  { %6003 = vmatpush3.bf16.msra.mxu1 %v10749_v55  ;;  %v10853_v55 = vand.u32 4294901760, %v7839_v4 }
  0xfe   :  { %6005 = vmatprep.subr.bf16.mxu1 %v10750_v25 }
  0xff   :  { %5975 = vmatpush3.bf16.msra.mxu0 %v10845_v18  ;;  %v10851_v18 = vld [vmem:[#allocation60_spill] sm:$0xff]  ;;  %v2214_v25 = vsub.f32 %v7839_v4, %v10853_v55 }
 0x100   :  { %5977 = vmatprep.subr.bf16.mxu0 %v10847_v54  ;;  %v10856_v54 = vld [vmem:[#allocation63_spill] sm:$0xff] }
 0x101   :  { %6007 = vmatpush3.bf16.msra.mxu1 %v7665_v17  ;;  %v2221_v17 = vsub.f32 %v7855_v1, %v10854_v15  ;;  %v10863_v15 = vand.u32 4294901760, %v7868_v23 }
 0x102   :  { %6009 = vmatprep.subr.bf16.mxu1 %v7675_v36  ;;  %v2085_v36 = vsub.f32 %v8287_v35, %v10243_v58  ;;  %v2215_v58 = vand.u32 4294901760, %v2214_v25  ;;  %v10873_v35 = vand.u32 4294901760, %v10872_v60 }
 0x103   :  { %5979 = vmatpush3.bf16.msra.mxu0 %v10848_v9  ;;  %v10859_v9 = vld [vmem:[#allocation14_spill] sm:$0xff] }
 0x104   :  { %5981 = vmatprep.subr.bf16.mxu0 %v10850_v45  ;;  %v10860_v45 = vand.u32 4294901760, %v10859_v9  ;;  %v10865_v9 = vand.u32 4294901760, %v7878_v48 }
 0x105   :  { %6011 = vmatpush3.bf16.msra.mxu1 %v7694_v53  ;;  %v10857_v53 = vld [vmem:[#allocation32_spill] sm:$0xff] }
 0x106   :  { %6013 = vmatprep.subr.bf16.mxu1 %v7712_v5  ;;  %v10858_v5 = vand.u32 4294901760, %v10857_v53 }
 0x107   :  { %5983 = vmatpush3.bf16.msra.mxu0 %v10851_v18 }
 0x108   :  { %5985 = vmatprep.subr.bf16.mxu0 %v10852_v28  ;;  %v8313_v18 = vpack.c.bf16 %v10860_v45, %v10858_v5  ;;  %v10862_v28 = vand.u32 4294901760, %v7860_v59  ;;  %v2235_v5 = vsub.f32 %v7878_v48, %v10865_v9  ;;  %v10866_v45 = vand.u32 4294901760, %v7888_v13 }
 0x109   :  { %6015 = vmatpush3.bf16.msra.mxu1 %v7724_v40  ;;  %v10864_v40 = vand.u32 4294901760, %v7873_v12  ;;  %v10875_v9 = vand.u32 4294901760, %v7918_v50 }
 0x10a   :  { %10861 = vst [vmem:[#allocation37_spill] sm:$0xff] %v8313_v18  ;;  %v2102_v55 = vsub.f32 %v7860_v59, %v10862_v28  ;;  %6017 = vmatprep.subr.bf16.mxu1 %v7730_v26  ;;  %v2116_v28 = vsub.f32 %v7888_v13, %v10866_v45  ;;  %v10868_v26 = vand.u32 4294901760, %v7905_v31  ;;  %v2086_v13 = vand.u32 4294901760, %v2085_v36  ;;  %v10882_v36 = vld [vmem:[#allocation23_spill] sm:$0xff] }
 0x10b   :  { %5987 = vmatpush3.bf16.msra.mxu0 %v10855_v43  ;;  %v2109_v43 = vsub.f32 %v7868_v23, %v10863_v15  ;;  %v2228_v53 = vsub.f32 %v7873_v12, %v10864_v40  ;;  %v2123_v15 = vsub.f32 %v7900_v39, %v10867_v42  ;;  %v10871_v40 = vand.u32 4294901760, %v10870_v0  ;;  %v10876_v42 = vld [vmem:[#allocation17_spill] sm:$0xff] }
 0x10c   :  { %5989 = vmatprep.subr.bf16.mxu0 %v10856_v54  ;;  %v2222_v54 = vand.u32 4294901760, %v2221_v17  ;;  %v2242_v25 = vsub.f32 %v7905_v31, %v10868_v26  ;;  %v10869_v17 = vld [vmem:[#allocation65_spill] sm:$0xff]  ;;  %v2249_v45 = vsub.f32 %v7918_v50, %v10875_v9  ;;  %v10877_v39 = vand.u32 4294901760, %v10876_v42  ;;  %v10878_v26 = vld [vmem:[#allocation20_spill] sm:$0xff] }
 0x10d   :  { %v8342_v12 = vpack.c.bf16 %v10873_v35, %v10871_v40  ;;  %6019 = vmatpush3.bf16.msra.mxu1 %v10826_v34  ;;  %v10879_v31 = vand.u32 4294901760, %v10878_v26  ;;  %v2103_v0 = vand.u32 4294901760, %v2102_v55  ;;  %v2110_v48 = vand.u32 4294901760, %v2109_v43 }
 0x10e   :  { %6021 = vmatprep.subr.bf16.mxu1 %v10827_v37  ;;  %v6056_v60 = vpack.c.bf16 %v2222_v54, %v2215_v58  ;;  %v2229_v35 = vand.u32 4294901760, %v2228_v53  ;;  %v2236_v40 = vand.u32 4294901760, %v2235_v5  ;;  %v10883_v9 = vand.u32 4294901760, %v10882_v36  ;;  %v10891_v53 = vld [vmem:[#allocation35_spill] sm:$0xff] }
 0x10f   :  { %5991 = vmatpush3.bf16.msra.mxu0 %v10869_v17  ;;  %10874 = vst [vmem:[#allocation29_spill] sm:$0xff] %v8342_v12  ;;  %v8353_v17 = vpack.c.bf16 %v10879_v31, %v10877_v39  ;;  %v2117_v42 = vand.u32 4294901760, %v2116_v28  ;;  %v2124_v23 = vand.u32 4294901760, %v2123_v15  ;;  %v2243_v26 = vand.u32 4294901760, %v2242_v25 }
 0x110   :  { %6025 = vmatprep.subr.bf16.mxu0 %v8313_v18  ;;  %v10884_v18 = vld [vmem:[#allocation27_spill] sm:$0xff]  ;;  %v2250_v39 = vand.u32 4294901760, %v2249_v45  ;;  %v10886_v31 = vand.u32 4294901760, %v7939_v24  ;;  %v10887_v58 = vand.u32 4294901760, %v7944_v29  ;;  %v10888_v43 = vand.u32 4294901760, %v7949_v20 }
 0x111   :  { %10880 = vst [vmem:[#allocation36_spill] sm:$0xff] %v8353_v17  ;;  %v10885_v50 = vand.u32 4294901760, %v10884_v18  ;;  %6023 = vmatpush3.bf16.msra.mxu1 %v10832_v44  ;;  %v10892_v5 = vand.u32 4294901760, %v10891_v53  ;;  %v6058_v15 = vpack.c.bf16 %v2110_v48, %v2103_v0  ;;  %v10893_v25 = vand.u32 4294901760, %v7955_v52  ;;  %v10898_v44 = vld [vmem:[#allocation34_spill] sm:$0xff] }
 0x112   :  { %1877 = vmatmul.mubr.f32.vlgmr.msra.gmra.mrb[10].mxu0 %v10881_v14  ;;  %v2130_v37 = vsub.f32 %v7939_v24, %v10886_v31  ;;  %v2137_v55 = vsub.f32 %v7944_v29, %v10887_v58  ;;  %v2256_v18 = vsub.f32 %v7949_v20, %v10888_v43  ;;  %6057 = vmatprep.subr.bf16.mxu1 %v6056_v60 }
 0x113   :  { %v8361_v34 = vpack.c.bf16 %v10885_v50, %v10883_v9  ;;  %6027 = vmatpush3.bf16.msra.mxu0 %v8342_v12  ;;  %2087 = vmatprep.mubr.f32.mxu0 %v2086_v13  ;;  %v10889_v50 = vld [vmem:[#allocation28_spill] sm:$0xff]  ;;  %v2263_v45 = vsub.f32 %v7955_v52, %v10893_v25  ;;  %v6060_v36 = vpack.c.bf16 %v2236_v40, %v2229_v35  ;;  %v10894_v9 = vld [vmem:[#allocation30_spill] sm:$0xff]  ;;  %v10896_v13 = vld [vmem:[#allocation33_spill] sm:$0xff] }
 0x114   :  { %6029 = vmatprep.subr.bf16.mxu0 %v8353_v17  ;;  %v10890_v54 = vand.u32 4294901760, %v10889_v50  ;;  %v10895_v31 = vand.u32 4294901760, %v10894_v9  ;;  %v10897_v58 = vand.u32 4294901760, %v10896_v13  ;;  %v10899_v17 = vand.u32 4294901760, %v10898_v44  ;;  %v10900_v50 = vld [vmem:[#allocation38_spill] sm:$0xff]  ;;  %1981 = vmatmul.mubr.f32.vlgmr.msra.gmra.mrb[10].mxu1 %v10881_v14  ;;  %v10911_v9 = vld [vmem:[#allocation45_spill] sm:$0xff] }
 0x115   :  { %v10901_v12 = vand.u32 4294901760, %v10900_v50  ;;  %v6064_v48 = vpack.c.bf16 %v2250_v39, %v2243_v26  ;;  %v2131_v0 = vand.u32 4294901760, %v2130_v37  ;;  %v2138_v60 = vand.u32 4294901760, %v2137_v55  ;;  %6059 = vmatpush3.bf16.msra.mxu1 %v6058_v15  ;;  %2323 = vmatprep.mubr.f32.mxu1 %v8280_v61  ;;  %v10909_v15 = vld [vmem:[#allocation44_spill] sm:$0xff]  ;;  %v10915_v50 = vld [vmem:[#allocation46_spill] sm:$0xff] }
 0x116   :  { %v8379_v28 = vpack.c.bf16 %v10892_v5, %v10890_v54  ;;  %v8388_v43 = vpack.c.bf16 %v10897_v58, %v10895_v31  ;;  %v6062_v54 = vpack.c.bf16 %v2124_v23, %v2117_v42  ;;  %v2257_v35 = vand.u32 4294901760, %v2256_v18  ;;  %6061 = vmatprep.subr.bf16.mxu1 %v6060_v36  ;;  %v10913_v58 = vld [vmem:[#allocation42_spill] sm:$0xff] }
 0x117   :  { %v8394_v53 = vpack.c.bf16 %v10901_v12, %v10899_v17  ;;  %6031 = vmatpush3.bf16.msra.mxu0 %v8361_v34  ;;  %v2264_v40 = vand.u32 4294901760, %v2263_v45  ;;  %v10903_v5 = vand.u32 4294901760, %v7972_v33  ;;  %v10904_v12 = vand.u32 4294901760, %v7977_v51 }
 0x118   :  { %6033 = vmatprep.subr.bf16.mxu0 %v8379_v28  ;;  %v10905_v17 = vand.u32 4294901760, %v7994_v62  ;;  %v10906_v42 = vand.u32 4294901760, %v7999_v30  ;;  %v10907_v39 = vand.u32 4294901760, %v8013_v21  ;;  %v10908_v55 = vand.u32 4294901760, %v8027_v47 }
 0x119   :  { %10902 = vst [vmem:[#allocation50_spill] sm:$0xff] %v8394_v53  ;;  %v2144_v25 = vsub.f32 %v7972_v33, %v10903_v5  ;;  %v2151_v23 = vsub.f32 %v7977_v51, %v10904_v12  ;;  %v10910_v45 = vand.u32 4294901760, %v10909_v15  ;;  %v10912_v31 = vand.u32 4294901760, %v10911_v9  ;;  %6063 = vmatpush3.bf16.msra.mxu1 %v6062_v54 }
 0x11a   :  { %v2270_v14 = vsub.f32 %v7994_v62, %v10905_v17  ;;  %v2277_v26 = vsub.f32 %v7999_v30, %v10906_v42  ;;  %v2158_v37 = vsub.f32 %v8013_v21, %v10907_v39  ;;  %v2165_v18 = vsub.f32 %v8027_v47, %v10908_v55  ;;  %v10917_v17 = vld [vmem:[#allocation68_spill] sm:$0xff]  ;;  %6065 = vmatprep.subr.bf16.mxu1 %v6064_v48 }
 0x11b   :  { %v8422_v13 = vpack.c.bf16 %v10912_v31, %v10910_v45  ;;  %v8425_v36 = vand.u32 4294901760, %v8267_v7  ;;  %6035 = vmatpush3.bf16.msra.mxu0 %v8388_v43  ;;  %v10914_v44 = vand.u32 4294901760, %v10913_v58  ;;  %v10916_v5 = vand.u32 4294901760, %v10915_v50 }
 0x11c   :  { %v10918_v42 = vand.u32 4294901760, %v10917_v17  ;;  %v10919_v39 = vand.u32 4294901760, %v7923_v6  ;;  %v10921_v15 = vand.u32 4294901760, %v8051_v22  ;;  %v10922_v9 = vand.u32 4294901760, %v8056_v3  ;;  %6037 = vmatprep.subr.bf16.mxu0 %v8394_v53 }
 0x11d   :  { %v8432_v12 = vpack.c.bf16 %v10916_v5, %v10914_v44  ;;  %v6066_v58 = vpack.c.bf16 %v2138_v60, %v2131_v0  ;;  %v6068_v44 = vpack.c.bf16 %v2264_v40, %v2257_v35  ;;  %v2145_v50 = vand.u32 4294901760, %v2144_v25  ;;  %v10929_v60 = vld [vmem:[#allocation70_spill] sm:$0xff]  ;;  %v10931_v35 = vld [vmem:[#allocation71_spill] sm:$0xff] }
 0x11e   :  { %v8438_v55 = vpack.c.bf16 %v10919_v39, %v10918_v42  ;;  %v2284_v45 = vsub.f32 %v8051_v22, %v10921_v15  ;;  %v2291_v31 = vsub.f32 %v8056_v3, %v10922_v9  ;;  %v2152_v5 = vand.u32 4294901760, %v2151_v23 }
 0x11f   :  { %v2271_v17 = vand.u32 4294901760, %v2270_v14  ;;  %v2278_v6 = vand.u32 4294901760, %v2277_v26  ;;  %v2159_v42 = vand.u32 4294901760, %v2158_v37  ;;  %v2166_v39 = vand.u32 4294901760, %v2165_v18  ;;  %6039 = vmatpush3.bf16.msra.mxu0 %v8422_v13  ;;  %6067 = vmatpush3.bf16.msra.mxu1 %v6066_v58 }
 0x120   :  { %10920 = vst [vmem:[#allocation41_spill] sm:$0xff] %v8438_v55  ;;  %v10923_v61 = vand.u32 4294901760, %v7960_v19  ;;  %v10924_v15 = vand.u32 4294901760, %v7962_v10  ;;  %v10926_v9 = vand.u32 4294901760, %v8063_v46  ;;  %v10927_v54 = vand.u32 4294901760, %v8068_v56  ;;  %6041 = vmatprep.subr.bf16.mxu0 %v8432_v12  ;;  %6069 = vmatprep.subr.bf16.mxu1 %v6068_v44 }
 0x121   :  { %v8461_v48 = vsub.f32 %v8267_v7, %v8425_v36  ;;  %v10930_v19 = vand.u32 4294901760, %v10929_v60  ;;  %v10932_v10 = vand.u32 4294901760, %v10931_v35  ;;  %v2285_v40 = vand.u32 4294901760, %v2284_v45 }
 0x122   :  { %v8451_v22 = vpack.c.bf16 %v10924_v15, %v10923_v61  ;;  %v2172_v53 = vsub.f32 %v8063_v46, %v10926_v9  ;;  %v2179_v0 = vsub.f32 %v8068_v56, %v10927_v54  ;;  %v2292_v25 = vand.u32 4294901760, %v2291_v31  ;;  %v10939_v54 = vld [vmem:[#allocation72_spill] sm:$0xff] }
 0x123   :  { %10928 = vst [vmem:[#allocation31_spill] sm:$0xff] %v8461_v48  ;;  %v8468_v61 = vpack.c.bf16 %v10932_v10, %v10930_v19  ;;  %v10934_v23 = vand.u32 4294901760, %v8074_v38  ;;  %v6070_v26 = vpack.c.bf16 %v2152_v5, %v2145_v50  ;;  %v10935_v7 = vand.u32 4294901760, %v7983_v16  ;;  %v10941_v50 = vld [vmem:[#allocation73_spill] sm:$0xff]  ;;  %v10943_v16 = vld [vmem:[#allocation74_spill] sm:$0xff]  ;;  %6043 = vmatpush3.bf16.msra.mxu0 %v8438_v55 }
 0x124   :  { %10925 = vst [vmem:[#allocation51_spill] sm:$0xff] %v8451_v22  ;;  %v10936_v37 = vand.u32 4294901760, %v7985_v2  ;;  %v10937_v15 = vand.u32 4294901760, %v8082_v63  ;;  %v6072_v45 = vpack.c.bf16 %v2278_v6, %v2271_v17  ;;  %v10938_v31 = vand.u32 4294901760, %v8003_v8  ;;  %v8499_v8 = vld [vmem:[#allocation6 + $0x380] sm:$0xff]  ;;  %6045 = vmatprep.subr.bf16.mxu0 %v8451_v22  ;;  %v8564_v55 = vld [vmem:[#allocation6 + $0x3a8] sm:$0xff] }
 0x125   :  { %10933 = vst [vmem:[#allocation16_spill] sm:$0xff] %v8468_v61  ;;  %v2298_v14 = vsub.f32 %v8074_v38, %v10934_v23  ;;  %v10940_v60 = vand.u32 4294901760, %v10939_v54  ;;  %v6074_v58 = vpack.c.bf16 %v2166_v39, %v2159_v42  ;;  %v10942_v5 = vand.u32 4294901760, %v10941_v50  ;;  %10946 = vst [vmem:[#allocation52_spill] sm:$0xff] %v8499_v8  ;;  %v10947_v42 = vld [vmem:[#allocation75_spill] sm:$0xff]  ;;  %v8511_v54 = vld [vmem:[#allocation6 + $0x388] sm:$0xff]  ;;  %6071 = vmatpush3.bf16.msra.mxu1 %v6070_v26 }
 0x126   :  { %v8478_v18 = vpack.c.bf16 %v10936_v37, %v10935_v7  ;;  %v2305_v9 = vsub.f32 %v8082_v63, %v10937_v15  ;;  %v10944_v35 = vand.u32 4294901760, %v10943_v16  ;;  %v2173_v10 = vand.u32 4294901760, %v2172_v53  ;;  %10951 = vst [vmem:[#allocation53_spill] sm:$0xff] %v8511_v54  ;;  %v8523_v16 = vld [vmem:[#allocation6 + $0x300] sm:$0xff]  ;;  %6073 = vmatprep.subr.bf16.mxu1 %v6072_v45  ;;  %v8543_v26 = vld [vmem:[#allocation6 + $0x398] sm:$0xff]  ;;  %10967 = vst [vmem:[#allocation56_spill] sm:$0xff] %v8564_v55 }
 0x127   :  { %v8487_v19 = vpack.c.bf16 %v10940_v60, %v10938_v31  ;;  %v2180_v23 = vand.u32 4294901760, %v2179_v0  ;;  %v10274_v7 = vand.u32 4294901760, %v8461_v48  ;;  %v10945_v44 = vand.u32 4294901760, %v8087_v57  ;;  %10955 = vst [vmem:[#allocation22_spill] sm:$0xff] %v8523_v16  ;;  %10960 = vst [vmem:[#allocation54_spill] sm:$0xff] %v8543_v26  ;;  %6047 = vmatpush3.bf16.msra.mxu0 %v8468_v61  ;;  %v10961_v22 = vld [vmem:[#allocation40_spill] sm:$0xff] }
 0x128   :  { %v8493_v2 = vpack.c.bf16 %v10944_v35, %v10942_v5  ;;  %v6076_v6 = vpack.c.bf16 %v2292_v25, %v2285_v40  ;;  %v10948_v39 = vand.u32 4294901760, %v10947_v42  ;;  %v10949_v37 = vand.u32 4294901760, %v8022_v32  ;;  %v8525_v35 = vld [vmem:[#allocation6 + $0x308] sm:$0xff]  ;;  %v10958_v42 = vld [vmem:[#allocation78_spill] sm:$0xff]  ;;  %6049 = vmatprep.subr.bf16.mxu0 %v8478_v18  ;;  %v8555_v61 = vld [vmem:[#allocation6 + $0x3a0] sm:$0xff] }
 0x129   :  { %v2186_v17 = vsub.f32 %v8087_v57, %v10945_v44  ;;  %v2299_v31 = vand.u32 4294901760, %v2298_v14  ;;  %v10950_v53 = vand.u32 4294901760, %v8092_v11  ;;  %v2306_v60 = vand.u32 4294901760, %v2305_v9  ;;  %10956 = vst [vmem:[#allocation21_spill] sm:$0xff] %v8525_v35  ;;  %v10957_v9 = vld [vmem:[#allocation39_spill] sm:$0xff]  ;;  %6075 = vmatpush3.bf16.msra.mxu1 %v6074_v58  ;;  %10965 = vst [vmem:[#allocation19_spill] sm:$0xff] %v8555_v61 }
 0x12a   :  { %v8506_v15 = vpack.c.bf16 %v10949_v37, %v10948_v39  ;;  %v10952_v50 = vand.u32 4294901760, %v8097_v27  ;;  %v10953_v25 = vand.u32 4294901760, %v8107_v41  ;;  %v10954_v14 = vand.u32 4294901760, %v8112_v49  ;;  %6077 = vmatprep.subr.bf16.mxu1 %v6076_v6  ;;  %v8566_v58 = vld [vmem:[#allocation6 + $0x320] sm:$0xff] }
 0x12b   :  { %v2193_v0 = vsub.f32 %v8092_v11, %v10950_v53  ;;  %v10959_v39 = vand.u32 4294901760, %v10958_v42  ;;  %v8550_v53 = vld [vmem:[#allocation6 + $0x310] sm:$0xff]  ;;  %10968 = vst [vmem:[#allocation57_spill] sm:$0xff] %v8566_v58  ;;  %6051 = vmatpush3.bf16.msra.mxu0 %v8487_v19 }
 0x12c   :  { %v2312_v40 = vsub.f32 %v8097_v27, %v10952_v50  ;;  %v2319_v32 = vsub.f32 %v8107_v41, %v10953_v25  ;;  %v2200_v5 = vsub.f32 %v8112_v49, %v10954_v14  ;;  %v6078_v50 = vpack.c.bf16 %v2180_v23, %v2173_v10  ;;  %v8541_v49 = vld [vmem:[#allocation6 + $0x390] sm:$0xff]  ;;  %10963 = vst [vmem:[#allocation55_spill] sm:$0xff] %v8550_v53  ;;  %v8588_v23 = vld [vmem:[#allocation6 + $0x328] sm:$0xff] }
 0x12d   :  { %v2207_v37 = vsub.f32 %v10958_v42, %v10959_v39  ;;  %v8538_v25 = vsub.f32 %v8461_v48, %v10274_v7  ;;  %v2187_v14 = vand.u32 4294901760, %v2186_v17  ;;  %v2194_v44 = vand.u32 4294901760, %v2193_v0  ;;  %v10962_v39 = vld [vmem:[#allocation43_spill] sm:$0xff]  ;;  %10972 = vst [vmem:[#allocation58_spill] sm:$0xff] %v8588_v23  ;;  %6053 = vmatprep.subr.bf16.mxu0 %v8493_v2 }
 0x12e   :  { %v8552_v7 = vld [vmem:[#allocation6 + $0x318] sm:$0xff]  ;;  %v6080_v17 = vpack.c.bf16 %v2306_v60, %v2299_v31  ;;  %v2313_v45 = vand.u32 4294901760, %v2312_v40  ;;  %v2320_v48 = vand.u32 4294901760, %v2319_v32  ;;  %v2201_v41 = vand.u32 4294901760, %v2200_v5  ;;  %6079 = vmatpush3.bf16.msra.mxu1 %v6078_v50 }
 0x12f   :  { %10964 = vst [vmem:[#allocation64_spill] sm:$0xff] %v8552_v7  ;;  %v2208_v0 = vand.u32 4294901760, %v2207_v37  ;;  %v10966_v42 = vand.u32 4294901760, %v8499_v8  ;;  %v2092_v31 = vand.u32 4294901760, %v8538_v25  ;;  %v10969_v60 = vand.u32 4294901760, %v8511_v54  ;;  %v10973_v40 = vld [vmem:[#allocation26_spill] sm:$0xff]  ;;  %6055 = vmatpush3.bf16.msra.mxu0 %v8506_v15 }
 0x130   :  { %v6082_v5 = vpack.c.bf16 %v2194_v44, %v2187_v14  ;;  %v10971_v27 = vand.u32 4294901760, %v8525_v35  ;;  %v6084_v32 = vpack.c.bf16 %v2320_v48, %v2313_v45  ;;  %v10974_v44 = vld [vmem:[#allocation66_spill] sm:$0xff]  ;;  %6081 = vmatprep.subr.bf16.mxu1 %v6080_v17  ;;  %v10982_v50 = vand.u32 4294901760, %v8555_v61 }
 0x131   :  { %v8560_v10 = vsub.f32 %v8499_v8, %v10966_v42  ;;  %v8572_v6 = vsub.f32 %v8511_v54, %v10969_v60  ;;  %v10970_v42 = vand.u32 4294901760, %v8523_v16  ;;  %v6094_v14 = vpack.c.bf16 %v10974_v44, %v10973_v40  ;;  %v8608_v45 = vld [vmem:[#allocation6 + $0x3b8] sm:$0xff] }
 0x132   :  { %v8585_v25 = vsub.f32 %v8525_v35, %v10971_v27  ;;  %v6086_v27 = vpack.c.bf16 %v2208_v0, %v2201_v41  ;;  %v10976_v35 = vand.u32 4294901760, %v8541_v49  ;;  %v10977_v8 = vand.u32 4294901760, %v8543_v26  ;;  %10978 = vst [vmem:[#allocation60_spill] sm:$0xff] %v8608_v45  ;;  %6083 = vmatpush3.bf16.msra.mxu1 %v6082_v5  ;;  %2093 = vmatmul.mubr.f32.vlgmr.msra.gmra.mrb[12].mxu0 %v2092_v31 }
 0x133   :  { %v8580_v37 = vsub.f32 %v8523_v16, %v10970_v42  ;;  %v8595_v16 = vld [vmem:[#allocation6 + $0x3b0] sm:$0xff]  ;;  %v10979_v40 = vand.u32 4294901760, %v8550_v53  ;;  %v10980_v41 = vand.u32 4294901760, %v8552_v7  ;;  %v8628_v42 = vsub.f32 %v8555_v61, %v10982_v50  ;;  %6085 = vmatprep.subr.bf16.mxu1 %v6084_v32 }
 0x134   :  { %10975 = vst [vmem:[#allocation59_spill] sm:$0xff] %v8595_v16  ;;  %v8600_v60 = vsub.f32 %v8541_v49, %v10976_v35  ;;  %v8605_v48 = vsub.f32 %v8543_v26, %v10977_v8  ;;  %v8622_v8 = vld [vmem:[#allocation6 + $0x330] sm:$0xff]  ;;  %v10984_v0 = vpack.c.bf16 %v7855_v1, %v7839_v4  ;;  %v10985_v35 = vand.u32 4294901760, %v8564_v55  ;;  %v8676_v1 = vld [vmem:[#allocation6 + $0x340] sm:$0xff] }
 0x135   :  { %v8613_v44 = vsub.f32 %v8550_v53, %v10979_v40  ;;  %v8618_v17 = vsub.f32 %v8552_v7, %v10980_v41  ;;  %10981 = vst [vmem:[#allocation61_spill] sm:$0xff] %v8622_v8  ;;  %v8633_v7 = vld [vmem:[#allocation6 + $0x338] sm:$0xff]  ;;  %v10986_v50 = vand.u32 4294901760, %v8566_v58  ;;  %v10988_v41 = vand.u32 4294901760, %v8560_v10  ;;  %10997 = vst [vmem:[#allocation18_spill] sm:$0xff] %v8676_v1 }
 0x136   :  { %10983 = vst [vmem:[#allocation62_spill] sm:$0xff] %v8633_v7  ;;  %6089 = vmatprep.subr.bf16.mxu0 %v10984_v0  ;;  %v8641_v53 = vsub.f32 %v8564_v55, %v10985_v35  ;;  %v10989_v61 = vand.u32 4294901760, %v8572_v6  ;;  %v8658_v35 = vld [vmem:[#allocation6 + $0x3c0] sm:$0xff]  ;;  %v8660_v0 = vld [vmem:[#allocation6 + $0x3c8] sm:$0xff]  ;;  %v10994_v54 = vand.u32 4294901760, %v8585_v25  ;;  %v11004_v4 = vand.u32 4294901760, %v8600_v60  ;;  %6087 = vmatpush3.bf16.msra.mxu1 %v6086_v27 }
 0x137   :  { %v8646_v40 = vsub.f32 %v8566_v58, %v10986_v50  ;;  %10991 = vst [vmem:[#allocation14_spill] sm:$0xff] %v8658_v35  ;;  %10992 = vst [vmem:[#allocation65_spill] sm:$0xff] %v8660_v0  ;;  %v10993_v50 = vand.u32 4294901760, %v8580_v37  ;;  %v11005_v5 = vand.u32 4294901760, %v8605_v48  ;;  %v10295_v27 = vand.u32 4294901760, %v8628_v42 }
 0x138   :  { %v8653_v26 = vpack.c.bf16 %v10989_v61, %v10988_v41  ;;  %v10996_v61 = vand.u32 4294901760, %v8588_v23  ;;  %v8689_v41 = vld [vmem:[#allocation6 + $0x348] sm:$0xff] }
 0x139   :  { %10987 = vst [vmem:[#allocation63_spill] sm:$0xff] %v8646_v40  ;;  %v8666_v58 = vpack.c.bf16 %v10994_v54, %v10993_v50  ;;  %v10999_v54 = vld [vmem:[#allocation67_spill] sm:$0xff]  ;;  %v11000_v50 = vld [vmem:[#allocation69_spill] sm:$0xff]  ;;  %11003 = vst [vmem:[#allocation17_spill] sm:$0xff] %v8689_v41  ;;  %v8695_v55 = vpack.c.bf16 %v11005_v5, %v11004_v4  ;;  %2325 = vmatmul.mubr.f32.vlgmr.msra.gmra.mrb[12].mxu1 %v8425_v36 }
 0x13a   :  { %10990 = vst [vmem:[#allocation32_spill] sm:$0xff] %v8653_v26  ;;  %v8671_v32 = vsub.f32 %v8588_v23, %v10996_v61  ;;  %v10998_v26 = vpack.c.bf16 %v10957_v9, %v7860_v59  ;;  %v6096_v31 = vpack.c.bf16 %v11000_v50, %v10999_v54  ;;  %v11002_v61 = vand.u32 4294901760, %v8595_v16  ;;  %v11012_v5 = vld [vmem:[#allocation37_spill] sm:$0xff] }
 0x13b   :  { %10995 = vst [vmem:[#allocation15_spill] sm:$0xff] %v8666_v58  ;;  %v11001_v58 = vld [vmem:[#allocation49_spill] sm:$0xff]  ;;  %11006 = vst [vmem:[#allocation20_spill] sm:$0xff] %v8695_v55  ;;  %v11007_v59 = vpack.c.bf16 %v10962_v39, %v10961_v22  ;;  %6121 = vmatprep.subr.bf16.mxu1 %v11012_v5  ;;  %v11013_v22 = vand.u32 4294901760, %v8622_v8  ;;  %v11014_v50 = vand.u32 4294901760, %v8633_v7 }
 0x13c   :  { %6091 = vmatpush3.bf16.msra.mxu0 %v10998_v26  ;;  %2460 = vmatprep.mubr.f32.mxu0 %v11001_v58  ;;  %v8687_v23 = vsub.f32 %v8595_v16, %v11002_v61  ;;  %v11008_v26 = vand.u32 4294901760, %v8608_v45  ;;  %v11009_v61 = vand.u32 4294901760, %v8613_v44  ;;  %v11010_v16 = vand.u32 4294901760, %v8618_v17  ;;  %v8730_v55 = vld [vmem:[#allocation6 + $0x3d0] sm:$0xff] }
 0x13d   :  { %6093 = vmatprep.subr.bf16.mxu0 %v11007_v59  ;;  %v8717_v39 = vsub.f32 %v8622_v8, %v11013_v22  ;;  %v8725_v54 = vsub.f32 %v8633_v7, %v11014_v50  ;;  %11015 = vst [vmem:[#allocation23_spill] sm:$0xff] %v8730_v55  ;;  %v6098_v22 = vpack.c.bf16 %v7944_v29, %v7939_v24  ;;  %v8737_v59 = vld [vmem:[#allocation6 + $0x3d8] sm:$0xff]  ;;  %v11017_v50 = vand.u32 4294901760, %v8641_v53  ;;  %v8756_v29 = vld [vmem:[#allocation6 + $0x350] sm:$0xff] }
 0x13e   :  { %v8703_v9 = vsub.f32 %v8608_v45, %v11008_v26  ;;  %v8711_v4 = vpack.c.bf16 %v11010_v16, %v11009_v61  ;;  %v6100_v26 = vpack.c.bf16 %v7955_v52, %v7949_v20  ;;  %11016 = vst [vmem:[#allocation27_spill] sm:$0xff] %v8737_v59  ;;  %v11022_v24 = vand.u32 4294901760, %v8660_v0  ;;  %11024 = vst [vmem:[#allocation33_spill] sm:$0xff] %v8756_v29  ;;  %v8758_v52 = vld [vmem:[#allocation6 + $0x358] sm:$0xff]  ;;  %v8777_v45 = vld [vmem:[#allocation6 + $0x3e0] sm:$0xff] }
 0x13f   :  { %v8743_v16 = vpack.c.bf16 %v11017_v50, %v10295_v27  ;;  %11025 = vst [vmem:[#allocation34_spill] sm:$0xff] %v8758_v52  ;;  %v11026_v50 = vand.u32 4294901760, %v8646_v40  ;;  %v6102_v8 = vpack.c.bf16 %v7977_v51, %v7972_v33  ;;  %v8807_v33 = vld [vmem:[#allocation6 + $0x368] sm:$0xff]  ;;  %v8832_v51 = vld [vmem:[#allocation6 + $0x3f0] sm:$0xff] }
 0x140   :  { %11011 = vst [vmem:[#allocation25_spill] sm:$0xff] %v8711_v4  ;;  %6095 = vmatpush3.bf16.msra.mxu0 %v6094_v14  ;;  %v11019_v4 = vld [vmem:[#allocation29_spill] sm:$0xff]  ;;  %v11020_v14 = vand.u32 4294901760, %v8658_v35  ;;  %v8754_v20 = vsub.f32 %v8660_v0, %v11022_v24  ;;  %v8789_v0 = vld [vmem:[#allocation6 + $0x360] sm:$0xff]  ;;  %11040 = vst [vmem:[#allocation70_spill] sm:$0xff] %v8807_v33 }
 0x141   :  { %11018 = vst [vmem:[#allocation28_spill] sm:$0xff] %v8743_v16  ;;  %6097 = vmatprep.subr.bf16.mxu0 %v6096_v31  ;;  %6123 = vmatpush3.bf16.msra.mxu1 %v11019_v4  ;;  %v11027_v31 = vand.u32 4294901760, %v8671_v32  ;;  %v11029_v16 = vld [vmem:[#allocation36_spill] sm:$0xff]  ;;  %11036 = vst [vmem:[#allocation46_spill] sm:$0xff] %v8789_v0 }
 0x142   :  { %v8749_v61 = vsub.f32 %v8658_v35, %v11020_v14  ;;  %11023 = vst [vmem:[#allocation30_spill] sm:$0xff] %v8754_v20  ;;  %6125 = vmatprep.subr.bf16.mxu1 %v11029_v16  ;;  %v11030_v14 = vand.u32 4294901760, %v11001_v58  ;;  %v11031_v35 = vand.u32 4294901760, %v8676_v1  ;;  %v11038_v58 = vand.u32 4294901760, %v8703_v9  ;;  %11045 = vst [vmem:[#allocation72_spill] sm:$0xff] %v8832_v51 }
 0x143   :  { %v8764_v27 = vpack.c.bf16 %v11027_v31, %v11026_v50  ;;  %v11033_v50 = vand.u32 4294901760, %v8689_v41 }
 0x144   :  { %11021 = vst [vmem:[#allocation35_spill] sm:$0xff] %v8749_v61  ;;  %2567 = vmatprep.mubr.f32.mxu1 %v11030_v14  ;;  %v8772_v24 = vsub.f32 %v8676_v1, %v11031_v35  ;;  %v10303_v14 = vand.u32 4294901760, %v8717_v39  ;;  %6099 = vmatpush3.bf16.msra.mxu0 %v6098_v22  ;;  %v6104_v35 = vpack.c.bf16 %v7999_v30, %v7994_v62  ;;  %v11041_v1 = vand.u32 4294901760, %v8725_v54 }
 0x145   :  { %11028 = vst [vmem:[#allocation38_spill] sm:$0xff] %v8764_v27  ;;  %v8782_v31 = vsub.f32 %v8689_v41, %v11033_v50  ;;  %v8787_v27 = vld [vmem:[#allocation6 + $0x3e8] sm:$0xff]  ;;  %v11037_v50 = vand.u32 4294901760, %v8687_v23  ;;  %6101 = vmatprep.subr.bf16.mxu0 %v6100_v26  ;;  %6127 = vmatpush3.bf16.msra.mxu1 %v8361_v34  ;;  %v6106_v22 = vpack.c.bf16 %v8027_v47, %v8013_v21  ;;  %v11043_v62 = vand.u32 4294901760, %v8730_v55 }
 0x146   :  { %11032 = vst [vmem:[#allocation44_spill] sm:$0xff] %v8772_v24  ;;  %11035 = vst [vmem:[#allocation42_spill] sm:$0xff] %v8787_v27  ;;  %v8813_v7 = vpack.c.bf16 %v11041_v1, %v10303_v14  ;;  %6129 = vmatprep.subr.bf16.mxu1 %v8379_v28  ;;  %v11046_v30 = vand.u32 4294901760, %v8756_v29  ;;  %v8847_v14 = vld [vmem:[#allocation6 + $0x370] sm:$0xff]  ;;  %v11051_v26 = vand.u32 4294901760, %v8749_v61 }
 0x147   :  { %11034 = vst [vmem:[#allocation45_spill] sm:$0xff] %v8782_v31  ;;  %v8799_v41 = vpack.c.bf16 %v11038_v58, %v11037_v50  ;;  %v8823_v47 = vsub.f32 %v8730_v55, %v11043_v62  ;;  %v11044_v50 = vand.u32 4294901760, %v8737_v59  ;;  %v11047_v62 = vand.u32 4294901760, %v8758_v52  ;;  %11050 = vst [vmem:[#allocation75_spill] sm:$0xff] %v8847_v14 }
 0x148   :  { %11042 = vst [vmem:[#allocation71_spill] sm:$0xff] %v8813_v7  ;;  %6103 = vmatpush3.bf16.msra.mxu0 %v6102_v8  ;;  %v8837_v21 = vsub.f32 %v8756_v29, %v11046_v30  ;;  %v8845_v7 = vld [vmem:[#allocation6 + $0x3f8] sm:$0xff]  ;;  %v11052_v8 = vand.u32 4294901760, %v8754_v20  ;;  %v11054_v30 = vld [vmem:[#allocation13_spill] sm:$0xff] }
 0x149   :  { %11039 = vst [vmem:[#allocation68_spill] sm:$0xff] %v8799_v41  ;;  %v8828_v1 = vsub.f32 %v8737_v59, %v11044_v50  ;;  %v8842_v58 = vsub.f32 %v8758_v52, %v11047_v62  ;;  %11049 = vst [vmem:[#allocation74_spill] sm:$0xff] %v8845_v7  ;;  %6105 = vmatprep.subr.bf16.mxu0 %v6104_v35  ;;  %6131 = vmatpush3.bf16.msra.mxu1 %v8388_v43  ;;  %v8860_v50 = vld [vmem:[#allocation6 + $0x378] sm:$0xff]  ;;  %v11056_v52 = vand.u32 4294901760, %v8772_v24 }
 0x14a   :  { %v8853_v41 = vpack.c.bf16 %v11052_v8, %v11051_v26  ;;  %v6108_v29 = vpack.c.bf16 %v8056_v3, %v11054_v30  ;;  %v6110_v62 = vpack.c.bf16 %v8068_v56, %v8063_v46  ;;  %11055 = vst [vmem:[#allocation40_spill] sm:$0xff] %v8860_v50  ;;  %v11057_v59 = vand.u32 4294901760, %v8782_v31  ;;  %v11059_v20 = vld [vmem:[#allocation50_spill] sm:$0xff] }
 0x14b   :  { %11048 = vst [vmem:[#allocation73_spill] sm:$0xff] %v8842_v58  ;;  %6133 = vmatprep.subr.bf16.mxu1 %v11059_v20  ;;  %v11060_v35 = vand.u32 4294901760, %v8777_v45  ;;  %v11062_v3 = vand.u32 4294901760, %v8787_v27  ;;  %v11064_v56 = vand.u32 4294901760, %v8789_v0  ;;  %v10312_v30 = vand.u32 4294901760, %v8823_v47 }
 0x14c   :  { %11053 = vst [vmem:[#allocation39_spill] sm:$0xff] %v8853_v41  ;;  %v8866_v55 = vpack.c.bf16 %v11057_v59, %v11056_v52  ;;  %6107 = vmatpush3.bf16.msra.mxu0 %v6106_v22  ;;  %v11066_v41 = vand.u32 4294901760, %v8807_v33  ;;  %v10315_v59 = vand.u32 4294901760, %v8842_v58  ;;  %v6112_v52 = vpack.c.bf16 %v8082_v63, %v8074_v38 }
 0x14d   :  { %v8872_v26 = vsub.f32 %v8777_v45, %v11060_v35  ;;  %v8877_v8 = vsub.f32 %v8787_v27, %v11062_v3  ;;  %v8882_v46 = vsub.f32 %v8789_v0, %v11064_v56  ;;  %v10316_v56 = vand.u32 4294901760, %v8837_v21  ;;  %6109 = vmatprep.subr.bf16.mxu0 %v6108_v29  ;;  %6135 = vmatpush3.bf16.msra.mxu1 %v8422_v13 }
 0x14e   :  { %11058 = vst [vmem:[#allocation43_spill] sm:$0xff] %v8866_v55  ;;  %v10311_v55 = vand.u32 4294901760, %v8828_v1  ;;  %v8892_v3 = vsub.f32 %v8807_v33, %v11066_v41  ;;  %6137 = vmatprep.subr.bf16.mxu1 %v8432_v12  ;;  %v4622_v41 = vpop.f32.mrb[0].mxu0  ;;  %v6114_v27 = vpack.c.bf16 %v8092_v11, %v8087_v57  ;;  %v206_v29 = vstv %s10093_s2  ;;  %s6685_s2 = smov [#allocation8]  }
 0x14f   :  { %11061 = vst [vmem:[#allocation26_spill] sm:$0xff] %v8872_v26  ;;  %11063 = vst [vmem:[#allocation66_spill] sm:$0xff] %v8877_v8  ;;  %v11069_v35 = vand.u32 4294901760, %v8832_v51  ;;  %v8921_v63 = vpack.c.bf16 %v10315_v59, %v10316_v56  ;;  %v11074_v57 = vand.u32 4294901760, %v8847_v14  ;;  %v11076_v59 = vand.u32 4294901760, %v8860_v50  ;;  %s4579_s11 = sshll.u32 %s6685_s2, 4  ;;  %s4580_s11 = int_to_ptr.vmem [resolvable:$true] %s4579_s11 }
 0x150   :  { %11065 = vst [vmem:[#allocation67_spill] sm:$0xff] %v8882_v46  ;;  %11067 = vst [vmem:[#allocation69_spill] sm:$0xff] %v8892_v3  ;;  %v8904_v22 = vpack.c.bf16 %v10311_v55, %v10312_v30  ;;  %v4623_v55 = vpop.f32.mrb[1].mxu0  ;;  %v11072_v30 = vand.u32 4294901760, %v8845_v7  ;;  %6111 = vmatpush3.bf16.msra.mxu0 %v6110_v62  ;;  %v11082_v62 = vld [vmem:[#allocation51_spill] sm:$0xff]  ;;  %s6652_s12 = scalar_lea.vmem %s4580_s11, 32  ;;  %p6657_p3 = scmp.lt.s32.totalorder %s4580_s11, %s4580_s11 }
 0x151   :  { %v8915_v38 = vsub.f32 %v8832_v51, %v11069_v35  ;;  %11071 = vst [vmem:[#allocation29_spill] sm:$0xff] %v8921_v63  ;;  %v10326_v35 = vand.u32 4294901760, %v8872_v26  ;;  %v10325_v51 = vand.u32 4294901760, %v8877_v8  ;;  %v4624_v33 = vadd.f32 %v4623_v55, %v4622_v41  ;;  %6113 = vmatprep.subr.bf16.mxu0 %v6112_v52  ;;  %v4657_v41 = vpop.f32.mrb[0].mxu1  ;;  %v11084_v26 = vld [vmem:[#allocation77_spill] sm:$0xff]  ;;  %v11085_v8 = vld [vmem:[#allocation78_spill] sm:$0xff]  ;;  %p6653_p2 = scmp.ne.s32.totalorder %s4580_s11, %s6652_s12  ;;  %p6658_p4 = scmp.lt.s32.totalorder %s6652_s12, %s6652_s12 }
 0x152   :  { %11068 = vst [vmem:[#allocation49_spill] sm:$0xff] %v8904_v22  ;;  %v8926_v11 = vsub.f32 %v8845_v7, %v11072_v30  ;;  %v8931_v22 = vsub.f32 %v8847_v14, %v11074_v57  ;;  %v8938_v56 = vsub.f32 %v8860_v50, %v11076_v59  ;;  %v10337_v63 = vand.u32 4294901760, %v8882_v46  ;;  %v11078_v7 = vld [vmem:[#allocation41_spill] sm:$0xff]  ;;  %v11079_v57 = vld [vmem:[#allocation24_spill] sm:$0xff] }
 0x153   :  { %11070 = vst [vmem:[#allocation37_spill] sm:$0xff] %v8915_v38  ;;  %v10336_v30 = vand.u32 4294901760, %v8892_v3  ;;  %6139 = vmatpush3.bf16.msra.mxu1 %v11078_v7  ;;  %v11080_v14 = vld [vmem:[#allocation76_spill] sm:$0xff]  ;;  %v8949_v55 = vpack.c.bf16 %v10325_v51, %v10326_v35  ;;  %v371_v52 = vadd.f32 %v4624_v33, %v206_v29  ;;  %v10332_v50 = vand.u32 4294901760, %v8915_v38  ;;  %p6659_p5 = por %p6658_p4, %p6657_p3 }
 0x154   :  { %11073 = vst [vmem:[#allocation36_spill] sm:$0xff] %v8926_v11  ;;  %11075 = vst [vmem:[#allocation13_spill] sm:$0xff] %v8931_v22  ;;  %v6116_v0 = vpack.c.bf16 %v11080_v14, %v11079_v57  ;;  %6141 = vmatprep.subr.bf16.mxu1 %v11082_v62  ;;  %v10331_v14 = vand.u32 4294901760, %v8926_v11  ;;  %6115 = vmatpush3.bf16.msra.mxu0 %v6114_v27  ;;  %v4658_v57 = vpop.f32.mrb[1].mxu1  ;;  %v6118_v51 = vpack.c.bf16 %v11085_v8, %v11084_v26  ;;  %v11086_v3 = vld [vmem:[#allocation16_spill] sm:$0xff]  ;;  %v11089_v8 = vld [vmem:[#allocation79_spill] sm:$0xff] }
 0x155   :  { %11077 = vst [vmem:[#allocation50_spill] sm:$0xff] %v8938_v56  ;;  %11081 = vst [vmem:[#allocation41_spill] sm:$0xff] %v8949_v55  ;;  %v8956_v59 = vpack.c.bf16 %v10336_v30, %v10337_v63  ;;  %v10335_v35 = vand.u32 4294901760, %v8931_v22  ;;  %v10334_v55 = vand.u32 4294901760, %v8938_v56  ;;  %v4659_v46 = vadd.f32 %v4658_v57, %v4657_v41  ;;  %v11091_v29 = vld [vmem:[#allocation80_spill] sm:$0xff]  ;;  %v11092_v41 = vld [vmem:[#allocation47_spill] sm:$0xff]  ;;  %p6660_p6 = pnand %p6659_p5, %p6653_p2 }
 0x156   :  { %6117 = vmatprep.subr.bf16.mxu0 %v6116_v0  ;;  %v8969_v33 = vpack.c.bf16 %v10331_v14, %v10332_v50  ;;  %v11090_v0 = vld [vmem:[#allocation31_spill] sm:$0xff]  ;;  %v11093_v57 = vld [vmem:[#allocation48_spill] sm:$0xff]  ;;  %v11094_v50 = vld [vmem:[#allocation81_spill] sm:$0xff] }
 0x157   :  { %11083 = vst [vmem:[#allocation24_spill] sm:$0xff] %v8956_v59  ;;  %6143 = vmatpush3.bf16.msra.mxu1 %v11086_v3  ;;  %v8976_v27 = vpack.c.bf16 %v10334_v55, %v10335_v35  ;;  %v603_v26 = vadd.f32 %v4659_v46, %v371_v52  ;;  %v227_v14 = vcombine.high %v11093_v57, %v11093_v57  ;;  %v11096_v46 = vand.u32 4294901760, %v11090_v0  ;;  %v11097_v52 = vld [vmem:[#allocation12_spill] sm:$0xff]  ;;  %v11100_v57 = vld [vmem:[#allocation85_spill] sm:$0xff] }
 0x158   :  { %11087 = vst [vmem:[#allocation76_spill] sm:$0xff] %v8969_v33  ;;  %6145 = vmatprep.subr.bf16.mxu1 %v8478_v18  ;;  %6119 = vmatpush3.bf16.msra.mxu0 %v6118_v51  ;;  %v11095_v51 = vld [vmem:[#allocation82_spill] sm:$0xff] }
 0x159   :  { %11088 = vst [vmem:[#allocation51_spill] sm:$0xff] %v8976_v27  ;;  %6153 = vmatprep.subr.bf16.mxu0 %v11089_v8  ;;  %v8993_v8 = vrot.slane %v227_v14, %v11097_v52  ;;  %v11101_v14 = vld [vmem:[#allocation86_spill] sm:$0xff]  ;;  %v11144_v27 = vld [vmem:[#allocation57_spill] sm:$0xff] }
 0x15a   :  { %v11106_v52 = vld [vmem:[#allocation90_spill] sm:$0xff] }
 0x15b   :  { %6147 = vmatpush3.bf16.msra.mxu1 %v8487_v19  ;;  %2463 = vmatmul.mubr.f32.vlgmr.msra.gmra.mrb[14].mxu0 %v11090_v0  ;;  %v11146_v33 = vld [vmem:[#allocation58_spill] sm:$0xff] }
 0x15c   :  { %6149 = vmatprep.subr.bf16.mxu1 %v8493_v2  ;;  %6155 = vmatpush3.bf16.msra.mxu0 %v11091_v29  ;;  %v11098_v29 = vld [vmem:[#allocation83_spill] sm:$0xff]  ;;  %v11147_v59 = vand.u32 4294901760, %v11146_v33  ;;  %v11152_v33 = vld [vmem:[#allocation60_spill] sm:$0xff] }
 0x15d   :  { %2737 = vmatprep.mubr.f32.mxu0 %v11092_v41  ;;  %6157 = vmatprep.subr.bf16.mxu0 %v11094_v50  ;;  %v11099_v50 = vld [vmem:[#allocation84_spill] sm:$0xff] }
 0x15f   :  { %6151 = vmatpush3.bf16.msra.mxu1 %v8506_v15 }
 0x160   :  { %6185 = vmatprep.subr.bf16.mxu1 %v11012_v5  ;;  %6159 = vmatpush3.bf16.msra.mxu0 %v11095_v51  ;;  %v243_v5 = vcombine.high %v8993_v8, %v8993_v8  ;;  %v11105_v51 = vld [vmem:[#allocation89_spill] sm:$0xff] }
 0x161   :  { %6161 = vmatprep.subr.bf16.mxu0 %v11098_v29  ;;  %v11107_v29 = vld [vmem:[#allocation91_spill] sm:$0xff] }
 0x162   :  { %2571 = vmatmul.mubr.f32.vlgmr.msra.gmra.mrb[14].mxu1 %v11096_v46  ;;  %v9006_v0 = vand.u32 4294901760, %v243_v5 }
 0x163   :  { %6187 = vmatpush3.bf16.msra.mxu1 %v11019_v4  ;;  %2841 = vmatprep.mubr.f32.mxu1 %v11092_v41  ;;  %v11103_v4 = vld [vmem:[#allocation87_spill] sm:$0xff] }
 0x164   :  { %6189 = vmatprep.subr.bf16.mxu1 %v11029_v16  ;;  %6163 = vmatpush3.bf16.msra.mxu0 %v11099_v50  ;;  %11102 = vst [vmem:[#allocation77_spill] sm:$0xff] %v9006_v0  ;;  %v11104_v16 = vld [vmem:[#allocation88_spill] sm:$0xff]  ;;  %v9013_v41 = vsub.f32 %v243_v5, %v9006_v0  ;;  %v11109_v5 = vand.u32 4294901760, %v8572_v6 }
 0x165   :  { %6165 = vmatprep.subr.bf16.mxu0 %v11100_v57 }
 0x167   :  { %6191 = vmatpush3.bf16.msra.mxu1 %v8361_v34  ;;  %v4692_v34 = vpop.f32.mrb[2].mxu0 }
 0x168   :  { %6193 = vmatprep.subr.bf16.mxu1 %v8379_v28  ;;  %6167 = vmatpush3.bf16.msra.mxu0 %v11101_v14  ;;  %v4693_v28 = vpop.f32.mrb[3].mxu0  ;;  %v11110_v14 = vld [vmem:[#allocation92_spill] sm:$0xff] }
 0x169   :  { %6169 = vmatprep.subr.bf16.mxu0 %v11103_v4  ;;  %v4694_v46 = vadd.f32 %v4693_v28, %v4692_v34  ;;  %v11113_v34 = vld [vmem:[#allocation53_spill] sm:$0xff] }
 0x16a   :  { %v11114_v28 = vand.u32 4294901760, %v11113_v34 }
 0x16b   :  { %6195 = vmatpush3.bf16.msra.mxu1 %v8388_v43  ;;  %v10333_v43 = vand.u32 4294901760, %v9013_v41  ;;  %v741_v57 = vadd.f32 %v4694_v46, %v603_v26 }
 0x16c   :  { %6197 = vmatprep.subr.bf16.mxu1 %v11059_v20  ;;  %6171 = vmatpush3.bf16.msra.mxu0 %v11104_v16  ;;  %v11108_v20 = vand.u32 4294901760, %v8560_v10  ;;  %v11111_v16 = vld [vmem:[#allocation52_spill] sm:$0xff] }
 0x16d   :  { %6173 = vmatprep.subr.bf16.mxu0 %v11105_v51  ;;  %v11112_v51 = vand.u32 4294901760, %v11111_v16  ;;  %v2947_v26 = vsub.f32 %v9013_v41, %v10333_v43  ;;  %v11125_v43 = vld [vmem:[#allocation21_spill] sm:$0xff] }
 0x16e   :  { %v3076_v50 = vsub.f32 %v8560_v10, %v11108_v20 }
 0x16f   :  { %6199 = vmatpush3.bf16.msra.mxu1 %v8422_v13  ;;  %v3083_v13 = vsub.f32 %v8572_v6, %v11109_v5  ;;  %v2948_v35 = vand.u32 4294901760, %v2947_v26 }
 0x170   :  { %6201 = vmatprep.subr.bf16.mxu1 %v8432_v12  ;;  %6175 = vmatpush3.bf16.msra.mxu0 %v11106_v52  ;;  %v4727_v12 = vpop.f32.mrb[2].mxu1  ;;  %v11115_v52 = vand.u32 4294901760, %v8580_v37  ;;  %v3077_v20 = vand.u32 4294901760, %v3076_v50 }
 0x171   :  { %6177 = vmatprep.subr.bf16.mxu0 %v11107_v29  ;;  %v4728_v4 = vpop.f32.mrb[3].mxu1  ;;  %v3084_v5 = vand.u32 4294901760, %v3083_v13  ;;  %v11121_v13 = vand.u32 4294901760, %v8618_v17 }
 0x172   :  { %v2964_v29 = vsub.f32 %v8580_v37, %v11115_v52  ;;  %v4729_v46 = vadd.f32 %v4728_v4, %v4727_v12 }
 0x173   :  { %6203 = vmatpush3.bf16.msra.mxu1 %v11078_v7  ;;  %v9034_v7 = vpack.c.bf16 %v11114_v28, %v11112_v51  ;;  %v11118_v51 = vand.u32 4294901760, %v8600_v60  ;;  %v11119_v28 = vand.u32 4294901760, %v8605_v48  ;;  %v2985_v52 = vsub.f32 %v8618_v17, %v11121_v13 }
 0x174   :  { %6205 = vmatprep.subr.bf16.mxu1 %v11082_v62  ;;  %6179 = vmatpush3.bf16.msra.mxu0 %v11110_v14  ;;  %v11116_v62 = vld [vmem:[#allocation93_spill] sm:$0xff]  ;;  %v11117_v14 = vand.u32 4294901760, %v8585_v25  ;;  %v9054_v4 = vadd.f32 %v4729_v46, %v741_v57  ;;  %v11127_v57 = vand.u32 4294901760, %v8541_v49  ;;  %v11128_v46 = vld [vmem:[#allocation54_spill] sm:$0xff]  ;;  %v6248_v13 = vpack.c.bf16 %v3084_v5, %v3077_v20 }
 0x175   :  { %6181 = vmatprep.subr.bf16.mxu0 %v11116_v62  ;;  %v3090_v34 = vsub.f32 %v8600_v60, %v11118_v51  ;;  %v3097_v12 = vsub.f32 %v8605_v48, %v11119_v28  ;;  %v11122_v62 = vld [vmem:[#allocation94_spill] sm:$0xff]  ;;  %v11126_v51 = vand.u32 4294901760, %v11125_v43  ;;  %v11129_v28 = vand.u32 4294901760, %v11128_v46 }
 0x176   :  { %v2971_v16 = vsub.f32 %v8585_v25, %v11117_v14  ;;  %v2965_v30 = vand.u32 4294901760, %v2964_v29  ;;  %v11132_v20 = vand.u32 4294901760, %v8646_v40 }
 0x177   :  { %6207 = vmatpush3.bf16.msra.mxu1 %v11086_v3  ;;  %v11120_v3 = vand.u32 4294901760, %v8613_v44  ;;  %v3098_v43 = vand.u32 4294901760, %v3097_v12  ;;  %v11136_v12 = vld [vmem:[#allocation64_spill] sm:$0xff] }
 0x178   :  { %6209 = vmatprep.subr.bf16.mxu1 %v8478_v18  ;;  %6183 = vmatpush3.bf16.msra.mxu0 %v11122_v62  ;;  %v11123_v18 = vld [vmem:[#allocation22_spill] sm:$0xff]  ;;  %v2972_v62 = vand.u32 4294901760, %v2971_v16  ;;  %v2992_v29 = vsub.f32 %v8646_v40, %v11132_v20  ;;  %v11134_v16 = vld [vmem:[#allocation55_spill] sm:$0xff]  ;;  %v11137_v46 = vand.u32 4294901760, %v11136_v12  ;;  %v11145_v20 = vand.u32 4294901760, %v11144_v27 }
 0x179   :  { %v2978_v50 = vsub.f32 %v8613_v44, %v11120_v3  ;;  %v11124_v14 = vand.u32 4294901760, %v11123_v18  ;;  %6217 = vmatprep.subr.bf16.mxu0 %v9034_v7  ;;  %v9075_v3 = vpack.c.bf16 %v11129_v28, %v11127_v57  ;;  %v3091_v18 = vand.u32 4294901760, %v3090_v34  ;;  %v11150_v27 = vld [vmem:[#allocation59_spill] sm:$0xff] }
 0x17a   :  { %v2986_v57 = vand.u32 4294901760, %v2985_v52  ;;  %v11135_v34 = vand.u32 4294901760, %v11134_v16  ;;  %v9108_v40 = vpack.c.bf16 %v11147_v59, %v11145_v20  ;;  %v11148_v16 = vand.u32 4294901760, %v8687_v23 }
 0x17b   :  { %v9067_v55 = vpack.c.bf16 %v11126_v51, %v11124_v14  ;;  %6211 = vmatpush3.bf16.msra.mxu1 %v8487_v19  ;;  %v11130_v14 = vand.u32 4294901760, %v8628_v42  ;;  %v11131_v51 = vand.u32 4294901760, %v8641_v53  ;;  %2739 = vmatmul.mubr.f32.vlgmr.msra.gmra.mrb[16].mxu0 %v8425_v36  ;;  %v2979_v49 = vand.u32 4294901760, %v2978_v50  ;;  %v11141_v50 = vld [vmem:[#allocation56_spill] sm:$0xff] }
 0x17c   :  { %6213 = vmatprep.subr.bf16.mxu1 %v8493_v2  ;;  %v11133_v2 = vand.u32 4294901760, %v8671_v32  ;;  %v9096_v28 = vpack.c.bf16 %v11137_v46, %v11135_v34  ;;  %v11142_v52 = vand.u32 4294901760, %v11141_v50  ;;  %2949 = vmatprep.mubr.f32.mxu0 %v2948_v35  ;;  %v3118_v34 = vsub.f32 %v8687_v23, %v11148_v16 }
 0x17d   :  { %v3104_v26 = vsub.f32 %v8628_v42, %v11130_v14  ;;  %v3111_v19 = vsub.f32 %v8641_v53, %v11131_v51  ;;  %6219 = vmatpush3.bf16.msra.mxu0 %v9067_v55  ;;  %v11139_v14 = vld [vmem:[#allocation19_spill] sm:$0xff]  ;;  %v11149_v12 = vand.u32 4294901760, %v8703_v9  ;;  %v11153_v59 = vand.u32 4294901760, %v11152_v33  ;;  %v11162_v33 = vld [vmem:[#allocation61_spill] sm:$0xff] }
 0x17e   :  { %v2999_v5 = vsub.f32 %v8671_v32, %v11133_v2  ;;  %11138 = vst [vmem:[#allocation78_spill] sm:$0xff] %v9096_v28  ;;  %v11140_v51 = vand.u32 4294901760, %v11139_v14  ;;  %6221 = vmatprep.subr.bf16.mxu0 %v9075_v3  ;;  %v6250_v2 = vpack.c.bf16 %v2972_v62, %v2965_v30  ;;  %v11151_v14 = vand.u32 4294901760, %v11150_v27 }
 0x17f   :  { %6215 = vmatpush3.bf16.msra.mxu1 %v8506_v15  ;;  %v3125_v46 = vsub.f32 %v8703_v9, %v11149_v12  ;;  %v6252_v35 = vpack.c.bf16 %v3098_v43, %v3091_v18  ;;  %v3105_v50 = vand.u32 4294901760, %v3104_v26  ;;  %v6254_v15 = vpack.c.bf16 %v2986_v57, %v2979_v49  ;;  %v11158_v43 = vld [vmem:[#allocation30_spill] sm:$0xff] }
 0x180   :  { %v9102_v63 = vpack.c.bf16 %v11142_v52, %v11140_v51  ;;  %6249 = vmatprep.subr.bf16.mxu1 %v6248_v13  ;;  %v9122_v51 = vpack.c.bf16 %v11153_v59, %v11151_v14  ;;  %v3112_v52 = vand.u32 4294901760, %v3111_v19  ;;  %v2993_v30 = vand.u32 4294901760, %v2992_v29 }
 0x181   :  { %v3000_v62 = vand.u32 4294901760, %v2999_v5  ;;  %v11155_v20 = vand.u32 4294901760, %v8717_v39  ;;  %6223 = vmatpush3.bf16.msra.mxu0 %v9096_v28  ;;  %v11156_v13 = vand.u32 4294901760, %v8725_v54  ;;  %v11157_v27 = vand.u32 4294901760, %v8749_v61 }
 0x182   :  { %11143 = vst [vmem:[#allocation16_spill] sm:$0xff] %v9102_v63  ;;  %11154 = vst [vmem:[#allocation79_spill] sm:$0xff] %v9122_v51  ;;  %2843 = vmatmul.mubr.f32.vlgmr.msra.gmra.mrb[16].mxu1 %v8425_v36  ;;  %v11159_v26 = vand.u32 4294901760, %v11158_v43  ;;  %6225 = vmatprep.subr.bf16.mxu0 %v9102_v63  ;;  %v3119_v49 = vand.u32 4294901760, %v3118_v34  ;;  %v3126_v57 = vand.u32 4294901760, %v3125_v46  ;;  %v11160_v29 = vand.u32 4294901760, %v8772_v24 }
 0x183   :  { %v3006_v16 = vsub.f32 %v8717_v39, %v11155_v20  ;;  %v3013_v12 = vsub.f32 %v8725_v54, %v11156_v13  ;;  %v3132_v18 = vsub.f32 %v8749_v61, %v11157_v27  ;;  %6251 = vmatpush3.bf16.msra.mxu1 %v6250_v2  ;;  %v11161_v5 = vand.u32 4294901760, %v8782_v31  ;;  %v11164_v20 = vld [vmem:[#allocation62_spill] sm:$0xff]  ;;  %v11169_v2 = vld [vmem:[#allocation65_spill] sm:$0xff]  ;;  %3185 = vmatprep.mubr.f32.mxu1 %v9006_v0 }
 0x184   :  { %v3139_v19 = vsub.f32 %v11158_v43, %v11159_v26  ;;  %v3020_v36 = vsub.f32 %v8772_v24, %v11160_v29  ;;  %6253 = vmatprep.subr.bf16.mxu1 %v6252_v35  ;;  %v11163_v59 = vand.u32 4294901760, %v11162_v33  ;;  %v11165_v13 = vand.u32 4294901760, %v11164_v20  ;;  %v11167_v26 = vld [vmem:[#allocation14_spill] sm:$0xff]  ;;  %v11173_v61 = vld [vmem:[#allocation17_spill] sm:$0xff] }
 0x185   :  { %v3027_v14 = vsub.f32 %v8782_v31, %v11161_v5  ;;  %v11168_v63 = vand.u32 4294901760, %v11167_v26  ;;  %v11170_v34 = vand.u32 4294901760, %v11169_v2  ;;  %v6256_v43 = vpack.c.bf16 %v3112_v52, %v3105_v50  ;;  %v11171_v29 = vld [vmem:[#allocation18_spill] sm:$0xff]  ;;  %v11176_v31 = vld [vmem:[#allocation23_spill] sm:$0xff]  ;;  %6227 = vmatpush3.bf16.msra.mxu0 %v9108_v40 }
 0x186   :  { %v9149_v27 = vpack.c.bf16 %v11165_v13, %v11163_v59  ;;  %v11172_v24 = vand.u32 4294901760, %v11171_v29  ;;  %v11174_v5 = vand.u32 4294901760, %v11173_v61  ;;  %v6258_v33 = vpack.c.bf16 %v3000_v62, %v2993_v30  ;;  %v11178_v59 = vld [vmem:[#allocation27_spill] sm:$0xff]  ;;  %6229 = vmatprep.subr.bf16.mxu0 %v9122_v51 }
 0x187   :  { %v9155_v46 = vpack.c.bf16 %v11170_v34, %v11168_v63  ;;  %v11177_v20 = vand.u32 4294901760, %v11176_v31  ;;  %v11179_v13 = vand.u32 4294901760, %v11178_v59  ;;  %v9171_v26 = vand.u32 4294901760, %v8993_v8  ;;  %6255 = vmatpush3.bf16.msra.mxu1 %v6254_v15  ;;  %v11183_v31 = vld [vmem:[#allocation34_spill] sm:$0xff] }
 0x188   :  { %11166 = vst [vmem:[#allocation31_spill] sm:$0xff] %v9149_v27  ;;  %v9162_v35 = vpack.c.bf16 %v11174_v5, %v11172_v24  ;;  %v3007_v63 = vand.u32 4294901760, %v3006_v16  ;;  %v3014_v50 = vand.u32 4294901760, %v3013_v12  ;;  %v3133_v52 = vand.u32 4294901760, %v3132_v18  ;;  %v11181_v24 = vld [vmem:[#allocation33_spill] sm:$0xff]  ;;  %6257 = vmatprep.subr.bf16.mxu1 %v6256_v43 }
 0x189   :  { %v9168_v28 = vpack.c.bf16 %v11179_v13, %v11177_v20  ;;  %v3140_v2 = vand.u32 4294901760, %v3139_v19  ;;  %v6260_v61 = vpack.c.bf16 %v3126_v57, %v3119_v49  ;;  %v11182_v30 = vand.u32 4294901760, %v11181_v24  ;;  %v11192_v24 = vld [vmem:[#allocation26_spill] sm:$0xff]  ;;  %6231 = vmatpush3.bf16.msra.mxu0 %v9149_v27 }
 0x18a   :  { %11175 = vst [vmem:[#allocation80_spill] sm:$0xff] %v9162_v35  ;;  %v11184_v62 = vand.u32 4294901760, %v11183_v31  ;;  %v3021_v29 = vand.u32 4294901760, %v3020_v36  ;;  %v3028_v5 = vand.u32 4294901760, %v3027_v14  ;;  %v11185_v20 = vand.u32 4294901760, %v8823_v47  ;;  %v11190_v14 = vld [vmem:[#allocation42_spill] sm:$0xff]  ;;  %6233 = vmatprep.subr.bf16.mxu0 %v9155_v46 }
 0x18b   :  { %11180 = vst [vmem:[#allocation47_spill] sm:$0xff] %v9168_v28  ;;  %v11186_v12 = vand.u32 4294901760, %v8828_v1  ;;  %v11187_v15 = vand.u32 4294901760, %v8837_v21  ;;  %v11188_v49 = vand.u32 4294901760, %v8842_v58  ;;  %v11189_v36 = vand.u32 4294901760, %v8777_v45  ;;  %6259 = vmatpush3.bf16.msra.mxu1 %v6258_v33 }
 0x18c   :  { %v9179_v34 = vpack.c.bf16 %v11184_v62, %v11182_v30  ;;  %v3146_v16 = vsub.f32 %v8823_v47, %v11185_v20  ;;  %v11191_v43 = vand.u32 4294901760, %v11190_v14  ;;  %v9201_v13 = vsub.f32 %v8993_v8, %v9171_v26  ;;  %v11194_v62 = vld [vmem:[#allocation66_spill] sm:$0xff]  ;;  %v11200_v8 = vld [vmem:[#allocation67_spill] sm:$0xff]  ;;  %6261 = vmatprep.subr.bf16.mxu1 %v6260_v61 }
 0x18d   :  { %v3153_v18 = vsub.f32 %v8828_v1, %v11186_v12  ;;  %v3034_v19 = vsub.f32 %v8837_v21, %v11187_v15  ;;  %v3041_v57 = vsub.f32 %v8842_v58, %v11188_v49  ;;  %v11193_v30 = vand.u32 4294901760, %v11192_v24  ;;  %v11196_v49 = vld [vmem:[#allocation46_spill] sm:$0xff]  ;;  %6235 = vmatpush3.bf16.msra.mxu0 %v9162_v35 }
 0x18e   :  { %v9197_v59 = vpack.c.bf16 %v11191_v43, %v11189_v36  ;;  %v11195_v20 = vand.u32 4294901760, %v11194_v62  ;;  %v6262_v15 = vpack.c.bf16 %v3014_v50, %v3007_v63  ;;  %v6264_v45 = vpack.c.bf16 %v3140_v2, %v3133_v52  ;;  %v11198_v36 = vld [vmem:[#allocation70_spill] sm:$0xff]  ;;  %v11206_v50 = vld [vmem:[#allocation69_spill] sm:$0xff]  ;;  %6237 = vmatprep.subr.bf16.mxu0 %v9168_v28 }
 0x18f   :  { %v3160_v31 = vsub.f32 %v11192_v24, %v11193_v30  ;;  %v11197_v14 = vand.u32 4294901760, %v11196_v49  ;;  %v11199_v43 = vand.u32 4294901760, %v11198_v36  ;;  %v11201_v51 = vand.u32 4294901760, %v11200_v8  ;;  %v11202_v24 = vld [vmem:[#allocation72_spill] sm:$0xff]  ;;  %v9271_v35 = vld [vmem:[#allocation6 + $0x490] sm:$0xff] }
 0x190   :  { %v3167_v12 = vsub.f32 %v11194_v62, %v11195_v20  ;;  %v6266_v30 = vpack.c.bf16 %v3028_v5, %v3021_v29  ;;  %v11203_v20 = vand.u32 4294901760, %v11202_v24  ;;  %v11204_v62 = vld [vmem:[#allocation74_spill] sm:$0xff]  ;;  %v11207_v52 = vand.u32 4294901760, %v11206_v50  ;;  %6263 = vmatpush3.bf16.msra.mxu1 %v6262_v15  ;;  %11220 = vst [vmem:[#allocation12_spill] sm:$0xff] %v9271_v35 }
 0x191   :  { %v9214_v0 = vpack.c.bf16 %v11199_v43, %v11197_v14  ;;  %v3048_v58 = vsub.f32 %v11200_v8, %v11201_v51  ;;  %v11205_v27 = vand.u32 4294901760, %v11204_v62  ;;  %v3147_v49 = vand.u32 4294901760, %v3146_v16  ;;  %v9229_v51 = vld [vmem:[#allocation6 + $0x480] sm:$0xff]  ;;  %v9235_v62 = vld [vmem:[#allocation6 + $0x488] sm:$0xff]  ;;  %6265 = vmatprep.subr.bf16.mxu1 %v6264_v45  ;;  %v9273_v45 = vld [vmem:[#allocation6 + $0x498] sm:$0xff]  ;;  %6239 = vmatpush3.bf16.msra.mxu0 %v9179_v34 }
 0x192   :  { %v3055_v2 = vsub.f32 %v11206_v50, %v11207_v52  ;;  %v3154_v14 = vand.u32 4294901760, %v3153_v18  ;;  %v3035_v36 = vand.u32 4294901760, %v3034_v19  ;;  %v3042_v43 = vand.u32 4294901760, %v3041_v57  ;;  %11208 = vst [vmem:[#allocation48_spill] sm:$0xff] %v9229_v51  ;;  %11210 = vst [vmem:[#allocation81_spill] sm:$0xff] %v9235_v62  ;;  %v11213_v16 = vld [vmem:[#allocation40_spill] sm:$0xff]  ;;  %6241 = vmatprep.subr.bf16.mxu0 %v9197_v59 }
 0x193   :  { %v9224_v63 = vpack.c.bf16 %v11205_v27, %v11203_v20  ;;  %v3161_v29 = vand.u32 4294901760, %v3160_v31  ;;  %v3168_v5 = vand.u32 4294901760, %v3167_v12  ;;  %v11209_v24 = vand.u32 4294901760, %v8915_v38  ;;  %v11211_v20 = vld [vmem:[#allocation75_spill] sm:$0xff]  ;;  %11221 = vst [vmem:[#allocation83_spill] sm:$0xff] %v9273_v45  ;;  %v9278_v15 = vld [vmem:[#allocation6 + $0x410] sm:$0xff] }
 0x194   :  { %v11212_v61 = vand.u32 4294901760, %v11211_v20  ;;  %v11214_v18 = vand.u32 4294901760, %v11213_v16  ;;  %v3049_v52 = vand.u32 4294901760, %v3048_v58  ;;  %v11215_v31 = vand.u32 4294901760, %v8926_v11  ;;  %v9257_v57 = vld [vmem:[#allocation6 + $0x400] sm:$0xff]  ;;  %v9259_v58 = vld [vmem:[#allocation6 + $0x408] sm:$0xff]  ;;  %6267 = vmatpush3.bf16.msra.mxu1 %v6266_v30 }
 0x195   :  { %v3174_v27 = vsub.f32 %v8915_v38, %v11209_v24  ;;  %v3056_v24 = vand.u32 4294901760, %v3055_v2  ;;  %v11216_v33 = vand.u32 4294901760, %v8931_v22  ;;  %v11217_v16 = vand.u32 4294901760, %v8938_v56  ;;  %11218 = vst [vmem:[#allocation82_spill] sm:$0xff] %v9257_v57  ;;  %v4762_v38 = vpop.f32.mrb[4].mxu0  ;;  %11222 = vst [vmem:[#allocation84_spill] sm:$0xff] %v9278_v15  ;;  %6243 = vmatpush3.bf16.msra.mxu0 %v9214_v0 }
 0x196   :  { %v9242_v19 = vpack.c.bf16 %v11214_v18, %v11212_v61  ;;  %v3181_v12 = vsub.f32 %v8926_v11, %v11215_v31  ;;  %v6268_v31 = vpack.c.bf16 %v3154_v14, %v3147_v49  ;;  %v6270_v28 = vpack.c.bf16 %v3042_v43, %v3035_v36  ;;  %6245 = vmatprep.subr.bf16.mxu0 %v9224_v63 }
 0x197   :  { %v3062_v20 = vsub.f32 %v8931_v22, %v11216_v33  ;;  %v3069_v61 = vsub.f32 %v8938_v56, %v11217_v16  ;;  %v10364_v2 = vand.u32 4294901760, %v9235_v62  ;;  %v4763_v33 = vpop.f32.mrb[5].mxu0  ;;  %v11219_v22 = vand.u32 4294901760, %v9201_v13 }
 0x198   :  { %v6272_v18 = vpack.c.bf16 %v3168_v5, %v3161_v29  ;;  %v3175_v56 = vand.u32 4294901760, %v3174_v27  ;;  %v4764_v49 = vadd.f32 %v4763_v33, %v4762_v38  ;;  %v3182_v14 = vand.u32 4294901760, %v3181_v12  ;;  %v9288_v12 = vld [vmem:[#allocation6 + $0x4a0] sm:$0xff]  ;;  %6269 = vmatprep.subr.bf16.mxu1 %v6268_v31 }
 0x199   :  { %v9267_v16 = vsub.f32 %v9201_v13, %v11219_v22  ;;  %v10367_v36 = vand.u32 4294901760, %v9257_v57  ;;  %v9280_v22 = vld [vmem:[#allocation6 + $0x418] sm:$0xff]  ;;  %v6274_v29 = vpack.c.bf16 %v3056_v24, %v3049_v52  ;;  %v3063_v5 = vand.u32 4294901760, %v3062_v20  ;;  %11225 = vst [vmem:[#allocation86_spill] sm:$0xff] %v9288_v12  ;;  %v9298_v24 = vld [vmem:[#allocation6 + $0x4a8] sm:$0xff]  ;;  %v9300_v20 = vld [vmem:[#allocation6 + $0x420] sm:$0xff]  ;;  %6271 = vmatpush3.bf16.msra.mxu1 %v6270_v28  ;;  %6247 = vmatpush3.bf16.msra.mxu0 %v9242_v19 }
 0x19a   :  { %11223 = vst [vmem:[#allocation85_spill] sm:$0xff] %v9280_v22  ;;  %v3070_v27 = vand.u32 4294901760, %v3069_v61  ;;  %v11224_v11 = vand.u32 4294901760, %v9229_v51  ;;  %v1017_v33 = vadd.f32 %v4764_v49, %v9054_v4  ;;  %v9294_v43 = vsub.f32 %v9235_v62, %v10364_v2  ;;  %11226 = vst [vmem:[#allocation87_spill] sm:$0xff] %v9300_v20  ;;  %6273 = vmatprep.subr.bf16.mxu1 %v6272_v18 }
 0x19b   :  { %v2954_v61 = vand.u32 4294901760, %v9267_v16  ;;  %v6276_v30 = vpack.c.bf16 %v3182_v14, %v3175_v56  ;;  %v9311_v52 = vsub.f32 %v9257_v57, %v10367_v36  ;;  %v11227_v62 = vand.u32 4294901760, %v9259_v58  ;;  %v9324_v36 = vld [vmem:[#allocation6 + $0x4b0] sm:$0xff] }
 0x19c   :  { %v9286_v38 = vsub.f32 %v9229_v51, %v11224_v11  ;;  %v4797_v11 = vpop.f32.mrb[4].mxu1  ;;  %v9319_v51 = vld [vmem:[#allocation6 + $0x428] sm:$0xff]  ;;  %v6278_v49 = vpack.c.bf16 %v3070_v27, %v3063_v5  ;;  %11229 = vst [vmem:[#allocation89_spill] sm:$0xff] %v9324_v36  ;;  %v11230_v57 = vand.u32 4294901760, %v9271_v35  ;;  %v11231_v4 = vand.u32 4294901760, %v9273_v45  ;;  %v9338_v27 = vld [vmem:[#allocation6 + $0x4b8] sm:$0xff] }
 0x19d   :  { %v4798_v2 = vpop.f32.mrb[5].mxu1  ;;  %v9316_v16 = vsub.f32 %v9259_v58, %v11227_v62  ;;  %11228 = vst [vmem:[#allocation88_spill] sm:$0xff] %v9319_v51  ;;  %11232 = vst [vmem:[#allocation90_spill] sm:$0xff] %v9338_v27  ;;  %v11233_v18 = vand.u32 4294901760, %v9278_v15  ;;  %v11236_v5 = vand.u32 4294901760, %v9288_v12  ;;  %6275 = vmatpush3.bf16.msra.mxu1 %v6274_v29  ;;  %2955 = vmatmul.mubr.f32.vlgmr.msra.gmra.mrb[18].mxu0 %v2954_v61 }
 0x19e   :  { %v4799_v31 = vadd.f32 %v4798_v2, %v4797_v11  ;;  %v9329_v62 = vsub.f32 %v9271_v35, %v11230_v57  ;;  %v9334_v2 = vsub.f32 %v9273_v45, %v11231_v4  ;;  %v11234_v57 = vand.u32 4294901760, %v9280_v22  ;;  %v9353_v45 = vld [vmem:[#allocation6 + $0x430] sm:$0xff]  ;;  %6277 = vmatprep.subr.bf16.mxu1 %v6276_v30  ;;  %3322 = vmatprep.mubr.f32.mxu0 %v9013_v41 }
 0x19f   :  { %v9345_v14 = vsub.f32 %v9278_v15, %v11233_v18  ;;  %11235 = vst [vmem:[#allocation91_spill] sm:$0xff] %v9353_v45  ;;  %v9364_v15 = vld [vmem:[#allocation6 + $0x438] sm:$0xff]  ;;  %v11239_v4 = vand.u32 4294901760, %v9298_v24  ;;  %v11241_v28 = vand.u32 4294901760, %v9286_v38  ;;  %v11247_v18 = vand.u32 4294901760, %v9316_v16 }
 0x1a0   :  { %v9340_v11 = vadd.f32 %v4799_v31, %v1017_v33  ;;  %v9350_v56 = vsub.f32 %v9280_v22, %v11234_v57  ;;  %v9359_v33 = vsub.f32 %v9288_v12, %v11236_v5  ;;  %11237 = vst [vmem:[#allocation92_spill] sm:$0xff] %v9364_v15  ;;  %v11238_v57 = vpack.c.bf16 %v8572_v6, %v8560_v10  ;;  %v9407_v10 = vld [vmem:[#allocation6 + $0x440] sm:$0xff] }
 0x1a1   :  { %v9372_v22 = vsub.f32 %v9298_v24, %v11239_v4  ;;  %v11240_v5 = vand.u32 4294901760, %v9300_v20  ;;  %v11242_v12 = vand.u32 4294901760, %v9294_v43  ;;  %v9389_v4 = vld [vmem:[#allocation6 + $0x4c0] sm:$0xff]  ;;  %11250 = vst [vmem:[#allocation22_spill] sm:$0xff] %v9407_v10  ;;  %v6288_v61 = vpack.c.bf16 %v8641_v53, %v8628_v42  ;;  %6279 = vmatpush3.bf16.msra.mxu1 %v6278_v49  ;;  %v9471_v49 = vld [vmem:[#allocation6 + $0x4d8] sm:$0xff] }
 0x1a2   :  { %6281 = vmatprep.subr.bf16.mxu0 %v11238_v57  ;;  %11244 = vst [vmem:[#allocation53_spill] sm:$0xff] %v9389_v4  ;;  %v9391_v57 = vld [vmem:[#allocation6 + $0x4c8] sm:$0xff]  ;;  %v11255_v6 = vand.u32 4294901760, %v9334_v2  ;;  %v11258_v53 = vand.u32 4294901760, %v9338_v27  ;;  %6313 = vmatprep.subr.bf16.mxu1 %v9034_v7  ;;  %11267 = vst [vmem:[#allocation19_spill] sm:$0xff] %v9471_v49 }
 0x1a3   :  { %v9377_v31 = vsub.f32 %v9300_v20, %v11240_v5  ;;  %v9384_v35 = vpack.c.bf16 %v11242_v12, %v11241_v28  ;;  %11245 = vst [vmem:[#allocation93_spill] sm:$0xff] %v9391_v57  ;;  %v11246_v5 = vand.u32 4294901760, %v9311_v52  ;;  %v11249_v12 = vand.u32 4294901760, %v9319_v51 }
 0x1a4   :  { %v11254_v28 = vand.u32 4294901760, %v9329_v62  ;;  %3187 = vmatmul.mubr.f32.vlgmr.msra.gmra.mrb[18].mxu1 %v9171_v26  ;;  %v11269_v42 = vand.u32 4294901760, %v9372_v22 }
 0x1a5   :  { %11243 = vst [vmem:[#allocation52_spill] sm:$0xff] %v9384_v35  ;;  %v9397_v20 = vpack.c.bf16 %v11247_v18, %v11246_v5  ;;  %v9402_v30 = vsub.f32 %v9319_v51, %v11249_v12  ;;  %v11251_v35 = vpack.c.bf16 %v8585_v25, %v8580_v37  ;;  %v11252_v18 = vand.u32 4294901760, %v9324_v36  ;;  %v9420_v12 = vld [vmem:[#allocation6 + $0x448] sm:$0xff]  ;;  %6315 = vmatpush3.bf16.msra.mxu1 %v9067_v55 }
 0x1a6   :  { %11253 = vst [vmem:[#allocation21_spill] sm:$0xff] %v9420_v12  ;;  %v9426_v29 = vpack.c.bf16 %v11255_v6, %v11254_v28  ;;  %v11257_v37 = vpack.c.bf16 %v8605_v48, %v8600_v60  ;;  %v9434_v25 = vsub.f32 %v9338_v27, %v11258_v53  ;;  %v11262_v60 = vand.u32 4294901760, %v9353_v45  ;;  %6317 = vmatprep.subr.bf16.mxu1 %v9075_v3  ;;  %v11294_v27 = vld [vmem:[#allocation45_spill] sm:$0xff] }
 0x1a7   :  { %11248 = vst [vmem:[#allocation94_spill] sm:$0xff] %v9397_v20  ;;  %6283 = vmatpush3.bf16.msra.mxu0 %v11251_v35  ;;  %v9418_v5 = vsub.f32 %v9324_v36, %v11252_v18  ;;  %v11259_v18 = vand.u32 4294901760, %v9345_v14  ;;  %v11260_v20 = vand.u32 4294901760, %v9350_v56  ;;  %v11263_v53 = vand.u32 4294901760, %v9364_v15 }
 0x1a8   :  { %11256 = vst [vmem:[#allocation54_spill] sm:$0xff] %v9426_v29  ;;  %6285 = vmatprep.subr.bf16.mxu0 %v11257_v37  ;;  %v9448_v48 = vsub.f32 %v9353_v45, %v11262_v60  ;;  %v11265_v60 = vpack.c.bf16 %v8618_v17, %v8613_v44  ;;  %v11266_v37 = vld [vmem:[#allocation63_spill] sm:$0xff]  ;;  %v11271_v44 = vand.u32 4294901760, %v9389_v4 }
 0x1a9   :  { %v9442_v6 = vpack.c.bf16 %v11260_v20, %v11259_v18  ;;  %v9456_v35 = vsub.f32 %v9364_v15, %v11263_v53  ;;  %v6290_v28 = vpack.c.bf16 %v8671_v32, %v11266_v37  ;;  %v6292_v53 = vpack.c.bf16 %v8703_v9, %v8687_v23  ;;  %v9490_v9 = vld [vmem:[#allocation6 + $0x450] sm:$0xff]  ;;  %v9492_v37 = vld [vmem:[#allocation6 + $0x458] sm:$0xff] }
 0x1aa   :  { %v11268_v20 = vand.u32 4294901760, %v9359_v33  ;;  %v9483_v17 = vsub.f32 %v9389_v4, %v11271_v44  ;;  %v11273_v32 = vand.u32 4294901760, %v9391_v57  ;;  %11275 = vst [vmem:[#allocation59_spill] sm:$0xff] %v9490_v9  ;;  %11276 = vst [vmem:[#allocation60_spill] sm:$0xff] %v9492_v37  ;;  %v11281_v44 = vand.u32 4294901760, %v9407_v10  ;;  %v9511_v4 = vld [vmem:[#allocation6 + $0x4e0] sm:$0xff] }
 0x1ab   :  { %11261 = vst [vmem:[#allocation55_spill] sm:$0xff] %v9442_v6  ;;  %v9461_v6 = vld [vmem:[#allocation6 + $0x4d0] sm:$0xff]  ;;  %6287 = vmatpush3.bf16.msra.mxu0 %v11265_v60  ;;  %v11280_v60 = vand.u32 4294901760, %v9013_v41  ;;  %11282 = vst [vmem:[#allocation62_spill] sm:$0xff] %v9511_v4  ;;  %v11288_v41 = vand.u32 4294901760, %v9434_v25  ;;  %v11297_v29 = vand.u32 4294901760, %v9456_v35 }
 0x1ac   :  { %11264 = vst [vmem:[#allocation64_spill] sm:$0xff] %v9461_v6  ;;  %v9477_v18 = vpack.c.bf16 %v11269_v42, %v11268_v20  ;;  %6289 = vmatprep.subr.bf16.mxu0 %v6288_v61  ;;  %11272 = vst [vmem:[#allocation57_spill] sm:$0xff] %v9483_v17  ;;  %v9488_v23 = vsub.f32 %v9391_v57, %v11273_v32  ;;  %v11277_v42 = vand.u32 4294901760, %v9377_v31  ;;  %v11278_v61 = vand.u32 4294901760, %v9402_v30  ;;  %v11292_v15 = vld [vmem:[#allocation30_spill] sm:$0xff] }
 0x1ad   :  { %3429 = vmatprep.mubr.f32.mxu1 %v11280_v60  ;;  %v9506_v32 = vsub.f32 %v9407_v10, %v11281_v44  ;;  %v6294_v57 = vpack.c.bf16 %v8725_v54, %v8717_v39  ;;  %v11290_v44 = vld [vmem:[#allocation78_spill] sm:$0xff]  ;;  %v11291_v60 = vld [vmem:[#allocation35_spill] sm:$0xff]  ;;  %v9541_v39 = vld [vmem:[#allocation6 + $0x468] sm:$0xff]  ;;  %v11296_v10 = vand.u32 4294901760, %v9448_v48  ;;  %v11302_v54 = vand.u32 4294901760, %v9471_v49 }
 0x1ae   :  { %11270 = vst [vmem:[#allocation56_spill] sm:$0xff] %v9477_v18  ;;  %11274 = vst [vmem:[#allocation58_spill] sm:$0xff] %v9488_v23  ;;  %v9498_v20 = vpack.c.bf16 %v11278_v61, %v11277_v42  ;;  %v11283_v42 = vand.u32 4294901760, %v9420_v12  ;;  %v9523_v18 = vld [vmem:[#allocation6 + $0x460] sm:$0xff]  ;;  %6319 = vmatpush3.bf16.msra.mxu1 %v11290_v44  ;;  %v6296_v45 = vpack.c.bf16 %v11292_v15, %v11291_v60  ;;  %v11300_v60 = vand.u32 4294901760, %v9461_v6 }
 0x1af   :  { %11286 = vst [vmem:[#allocation18_spill] sm:$0xff] %v9523_v18  ;;  %6291 = vmatpush3.bf16.msra.mxu0 %v6290_v28  ;;  %v11293_v28 = vld [vmem:[#allocation44_spill] sm:$0xff]  ;;  %11295 = vst [vmem:[#allocation23_spill] sm:$0xff] %v9541_v39  ;;  %v9547_v51 = vpack.c.bf16 %v11297_v29, %v11296_v10  ;;  %v9562_v10 = vsub.f32 %v9471_v49, %v11302_v54  ;;  %v11305_v15 = vand.u32 4294901760, %v9490_v9  ;;  %v9581_v29 = vld [vmem:[#allocation6 + $0x470] sm:$0xff] }
 0x1b0   :  { %11279 = vst [vmem:[#allocation61_spill] sm:$0xff] %v9498_v20  ;;  %v9516_v61 = vsub.f32 %v9420_v12, %v11283_v42  ;;  %v9521_v20 = vld [vmem:[#allocation6 + $0x4e8] sm:$0xff]  ;;  %v11287_v42 = vand.u32 4294901760, %v9418_v5  ;;  %6293 = vmatprep.subr.bf16.mxu0 %v6292_v53  ;;  %v6298_v36 = vpack.c.bf16 %v11294_v27, %v11293_v28  ;;  %v9557_v28 = vsub.f32 %v9461_v6, %v11300_v60  ;;  %v9594_v54 = vld [vmem:[#allocation6 + $0x478] sm:$0xff] }
 0x1b1   :  { %11285 = vst [vmem:[#allocation65_spill] sm:$0xff] %v9521_v20  ;;  %11298 = vst [vmem:[#allocation27_spill] sm:$0xff] %v9547_v51  ;;  %v9566_v51 = vld [vmem:[#allocation6 + $0x4f0] sm:$0xff]  ;;  %v9571_v27 = vsub.f32 %v9490_v9, %v11305_v15  ;;  %v11307_v60 = vand.u32 4294901760, %v9492_v37  ;;  %v11311_v53 = vand.u32 4294901760, %v9483_v17  ;;  %v6300_v15 = vpack.c.bf16 %v8828_v1, %v8823_v47 }
 0x1b2   :  { %11284 = vst [vmem:[#allocation14_spill] sm:$0xff] %v9516_v61  ;;  %v9533_v12 = vpack.c.bf16 %v11288_v41, %v11287_v42  ;;  %v11299_v41 = vld [vmem:[#allocation16_spill] sm:$0xff]  ;;  %11301 = vst [vmem:[#allocation33_spill] sm:$0xff] %v9557_v28  ;;  %v11316_v9 = vand.u32 4294901760, %v9506_v32  ;;  %v11317_v6 = vand.u32 4294901760, %v9516_v61  ;;  %v11321_v47 = vand.u32 4294901760, %v9521_v20 }
 0x1b3   :  { %6321 = vmatprep.subr.bf16.mxu1 %v11299_v41  ;;  %11303 = vst [vmem:[#allocation34_spill] sm:$0xff] %v9562_v10  ;;  %11304 = vst [vmem:[#allocation42_spill] sm:$0xff] %v9566_v51  ;;  %6295 = vmatpush3.bf16.msra.mxu0 %v6294_v57  ;;  %v9576_v42 = vsub.f32 %v9492_v37, %v11307_v60  ;;  %v11312_v57 = vand.u32 4294901760, %v9488_v23  ;;  %v11314_v60 = vld [vmem:[#allocation73_spill] sm:$0xff]  ;;  %v11319_v23 = vld [vmem:[#allocation79_spill] sm:$0xff] }
 0x1b4   :  { %11289 = vst [vmem:[#allocation17_spill] sm:$0xff] %v9533_v12  ;;  %11306 = vst [vmem:[#allocation46_spill] sm:$0xff] %v9571_v27  ;;  %v9579_v12 = vld [vmem:[#allocation6 + $0x4f8] sm:$0xff]  ;;  %6297 = vmatprep.subr.bf16.mxu0 %v6296_v45  ;;  %6323 = vmatpush3.bf16.msra.mxu1 %v9108_v40  ;;  %v6302_v37 = vpack.c.bf16 %v11314_v60, %v8837_v21  ;;  %v9600_v17 = vpack.c.bf16 %v11317_v6, %v11316_v9  ;;  %v11320_v45 = vand.u32 4294901760, %v9511_v4 }
 0x1b5   :  { %11308 = vst [vmem:[#allocation70_spill] sm:$0xff] %v9576_v42  ;;  %11309 = vst [vmem:[#allocation67_spill] sm:$0xff] %v9579_v12  ;;  %v9587_v49 = vpack.c.bf16 %v11312_v57, %v11311_v53  ;;  %6325 = vmatprep.subr.bf16.mxu1 %v11319_v23  ;;  %v9611_v1 = vsub.f32 %v9521_v20, %v11321_v47  ;;  %v11323_v21 = vand.u32 4294901760, %v9523_v18  ;;  %v11325_v9 = vld [vmem:[#allocation31_spill] sm:$0xff]  ;;  %v11326_v60 = vld [vmem:[#allocation26_spill] sm:$0xff]  ;;  %v11331_v6 = vand.u32 4294901760, %v9566_v51 }
 0x1b6   :  { %11310 = vst [vmem:[#allocation72_spill] sm:$0xff] %v9581_v29  ;;  %11315 = vst [vmem:[#allocation69_spill] sm:$0xff] %v9594_v54  ;;  %v9606_v53 = vsub.f32 %v9511_v4, %v11320_v45  ;;  %v11328_v45 = vand.u32 4294901760, %v9557_v28  ;;  %v6306_v20 = vpack.c.bf16 %v11206_v50, %v11200_v8 }
 0x1b7   :  { %11313 = vst [vmem:[#allocation74_spill] sm:$0xff] %v9587_v49  ;;  %11318 = vst [vmem:[#allocation75_spill] sm:$0xff] %v9600_v17  ;;  %v9616_v57 = vsub.f32 %v9523_v18, %v11323_v21  ;;  %6299 = vmatpush3.bf16.msra.mxu0 %v6298_v36  ;;  %v11324_v49 = vand.u32 4294901760, %v9541_v39  ;;  %v10397_v21 = vand.u32 4294901760, %v9571_v27  ;;  %v11327_v18 = vld [vmem:[#allocation66_spill] sm:$0xff]  ;;  %v11329_v36 = vand.u32 4294901760, %v9562_v10 }
 0x1b8   :  { %11322 = vst [vmem:[#allocation40_spill] sm:$0xff] %v9611_v1  ;;  %6301 = vmatprep.subr.bf16.mxu0 %v6300_v15  ;;  %6327 = vmatpush3.bf16.msra.mxu1 %v11325_v9  ;;  %v6304_v17 = vpack.c.bf16 %v11327_v18, %v11326_v60  ;;  %v9646_v15 = vsub.f32 %v9566_v51, %v11331_v6  ;;  %v11333_v18 = vand.u32 4294901760, %v9576_v42  ;;  %v10406_v50 = vand.u32 4294901760, %v9606_v53 }
 0x1b9   :  { %v9626_v47 = vsub.f32 %v9541_v39, %v11324_v49  ;;  %v9638_v4 = vpack.c.bf16 %v11329_v36, %v11328_v45  ;;  %v4832_v49 = vpop.f32.mrb[6].mxu0  ;;  %6329 = vmatprep.subr.bf16.mxu1 %v9155_v46  ;;  %v11335_v45 = vand.u32 4294901760, %v9579_v12  ;;  %v10405_v6 = vand.u32 4294901760, %v9611_v1  ;;  %v11344_v1 = vld [vmem:[#allocation13_spill] sm:$0xff] }
 0x1ba   :  { %11332 = vst [vmem:[#allocation78_spill] sm:$0xff] %v9646_v15  ;;  %v9652_v60 = vpack.c.bf16 %v11333_v18, %v10397_v21  ;;  %v4833_v39 = vpop.f32.mrb[7].mxu0  ;;  %v11337_v18 = vand.u32 4294901760, %v9594_v54 }
 0x1bb   :  { %11330 = vst [vmem:[#allocation63_spill] sm:$0xff] %v9638_v4  ;;  %v9657_v36 = vsub.f32 %v9579_v12, %v11335_v45  ;;  %v11336_v4 = vand.u32 4294901760, %v9581_v29  ;;  %v4834_v51 = vadd.f32 %v4833_v39, %v4832_v49  ;;  %6303 = vmatpush3.bf16.msra.mxu0 %v6302_v37  ;;  %v10407_v45 = vand.u32 4294901760, %v9626_v47  ;;  %v11338_v12 = vld [vmem:[#allocation80_spill] sm:$0xff]  ;;  %v11342_v49 = vld [vmem:[#allocation47_spill] sm:$0xff] }
 0x1bc   :  { %11334 = vst [vmem:[#allocation35_spill] sm:$0xff] %v9652_v60  ;;  %v9669_v21 = vsub.f32 %v9594_v54, %v11337_v18  ;;  %v10413_v60 = vand.u32 4294901760, %v9616_v57  ;;  %6305 = vmatprep.subr.bf16.mxu0 %v6304_v17  ;;  %6331 = vmatpush3.bf16.msra.mxu1 %v11338_v12  ;;  %v9680_v37 = vpack.c.bf16 %v10405_v6, %v10406_v50  ;;  %v4867_v18 = vpop.f32.mrb[6].mxu1  ;;  %v10412_v54 = vand.u32 4294901760, %v9646_v15  ;;  %v11345_v6 = vld [vmem:[#allocation50_spill] sm:$0xff] }
 0x1bd   :  { %v9662_v8 = vsub.f32 %v9581_v29, %v11336_v4  ;;  %v11339_v4 = vld [vmem:[#allocation37_spill] sm:$0xff]  ;;  %v11340_v29 = vld [vmem:[#allocation36_spill] sm:$0xff]  ;;  %v1233_v39 = vadd.f32 %v4834_v51, %v9340_v11  ;;  %6333 = vmatprep.subr.bf16.mxu1 %v11342_v49  ;;  %v6310_v50 = vpack.c.bf16 %v11345_v6, %v11344_v1 }
 0x1be   :  { %v6308_v42 = vpack.c.bf16 %v11340_v29, %v11339_v4  ;;  %11341 = vst [vmem:[#allocation30_spill] sm:$0xff] %v9680_v37  ;;  %v9688_v17 = vpack.c.bf16 %v10407_v45, %v10413_v60  ;;  %v10411_v29 = vand.u32 4294901760, %v9657_v36  ;;  %v4868_v4 = vpop.f32.mrb[7].mxu1  ;;  %v10409_v11 = vand.u32 4294901760, %v9669_v21  ;;  %v11348_v6 = vld [vmem:[#allocation32_spill] sm:$0xff] }
 0x1bf   :  { %6307 = vmatpush3.bf16.msra.mxu0 %v6306_v20  ;;  %v10410_v51 = vand.u32 4294901760, %v9662_v8  ;;  %v4869_v37 = vadd.f32 %v4868_v4, %v4867_v18  ;;  %v11350_v18 = vld [vmem:[#allocation77_spill] sm:$0xff]  ;;  %v11351_v4 = vld [vmem:[#allocation20_spill] sm:$0xff] }
 0x1c0   :  { %11343 = vst [vmem:[#allocation44_spill] sm:$0xff] %v9688_v17  ;;  %6309 = vmatprep.subr.bf16.mxu0 %v6308_v42  ;;  %6335 = vmatpush3.bf16.msra.mxu1 %v9179_v34  ;;  %v9701_v45 = vpack.c.bf16 %v10411_v29, %v10412_v54  ;;  %v11349_v42 = vld [vmem:[#allocation15_spill] sm:$0xff] }
 0x1c1   :  { %6337 = vmatprep.subr.bf16.mxu1 %v9197_v59  ;;  %v9708_v20 = vpack.c.bf16 %v10409_v11, %v10410_v51  ;;  %v1465_v1 = vadd.f32 %v4869_v37, %v1233_v39  ;;  %v11352_v37 = vld [vmem:[#allocation25_spill] sm:$0xff]  ;;  %v11354_v39 = vld [vmem:[#allocation28_spill] sm:$0xff]  ;;  %v11378_v11 = vand.u32 4294901760, %v9259_v58 }
 0x1c2   :  { %11346 = vst [vmem:[#allocation45_spill] sm:$0xff] %v9701_v45 }
 0x1c3   :  { %11347 = vst [vmem:[#allocation16_spill] sm:$0xff] %v9708_v20  ;;  %6311 = vmatpush3.bf16.msra.mxu0 %v6310_v50  ;;  %v11353_v50 = vand.u32 4294901760, %v9201_v13  ;;  %v11392_v20 = vand.u32 4294901760, %v9377_v31 }
 0x1c4   :  { %6345 = vmatprep.subr.bf16.mxu0 %v11348_v6  ;;  %6339 = vmatpush3.bf16.msra.mxu1 %v9214_v0  ;;  %v9724_v6 = vld.sshfl [vmem:[#allocation3 + $0x10] sm:$0x33 pattern:$0x76325410] }
 0x1c5   :  { %6341 = vmatprep.subr.bf16.mxu1 %v9224_v63 }
 0x1c6   :  { %3325 = vmatmul.mubr.f32.vlgmr.msra.gmra.mrb[20].mxu0 %v9201_v13  ;;  %v11357_v13 = vld [vmem:[#allocation71_spill] sm:$0xff] }
 0x1c7   :  { %6347 = vmatpush3.bf16.msra.mxu0 %v11349_v42  ;;  %3599 = vmatprep.mubr.f32.mxu0 %v11350_v18  ;;  %v11355_v42 = vld [vmem:[#allocation38_spill] sm:$0xff] }
 0x1c8   :  { %6349 = vmatprep.subr.bf16.mxu0 %v11351_v4  ;;  %6343 = vmatpush3.bf16.msra.mxu1 %v9242_v19  ;;  %v11356_v4 = vld [vmem:[#allocation68_spill] sm:$0xff] }
 0x1c9   :  { %6377 = vmatprep.subr.bf16.mxu1 %v9034_v7  ;;  %v251_v7 = vcombine.high %v9724_v6, %v9724_v6 }
 0x1cb   :  { %6351 = vmatpush3.bf16.msra.mxu0 %v11352_v37  ;;  %3433 = vmatmul.mubr.f32.vlgmr.msra.gmra.mrb[20].mxu1 %v11353_v50  ;;  %v11359_v37 = vld [vmem:[#allocation39_spill] sm:$0xff]  ;;  %v11361_v50 = vld [vmem:[#allocation49_spill] sm:$0xff] }
 0x1cc   :  { %6353 = vmatprep.subr.bf16.mxu0 %v11354_v39  ;;  %6379 = vmatpush3.bf16.msra.mxu1 %v9067_v55  ;;  %v9735_v55 = vand.u32 4294901760, %v251_v7 }
 0x1cd   :  { %6381 = vmatprep.subr.bf16.mxu1 %v9075_v3  ;;  %3703 = vmatprep.mubr.f32.mxu1 %v11350_v18  ;;  %v11360_v3 = vld [vmem:[#allocation43_spill] sm:$0xff] }
 0x1ce   :  { %11358 = vst [vmem:[#allocation73_spill] sm:$0xff] %v9735_v55  ;;  %v9742_v18 = vsub.f32 %v251_v7, %v9735_v55  ;;  %v11364_v7 = vand.u32 4294901760, %v9286_v38 }
 0x1cf   :  { %6355 = vmatpush3.bf16.msra.mxu0 %v11355_v42  ;;  %v11362_v42 = vld [vmem:[#allocation29_spill] sm:$0xff] }
 0x1d0   :  { %6357 = vmatprep.subr.bf16.mxu0 %v11356_v4  ;;  %6383 = vmatpush3.bf16.msra.mxu1 %v11290_v44  ;;  %v4902_v44 = vpop.f32.mrb[8].mxu0  ;;  %v11363_v4 = vld [vmem:[#allocation41_spill] sm:$0xff] }
 0x1d1   :  { %6385 = vmatprep.subr.bf16.mxu1 %v11299_v41  ;;  %v4903_v41 = vpop.f32.mrb[9].mxu0 }
 0x1d2   :  { %v4904_v39 = vadd.f32 %v4903_v41, %v4902_v44  ;;  %v11367_v44 = vld [vmem:[#allocation48_spill] sm:$0xff] }
 0x1d3   :  { %6359 = vmatpush3.bf16.msra.mxu0 %v11357_v13  ;;  %v11365_v13 = vand.u32 4294901760, %v9294_v43  ;;  %v11368_v41 = vand.u32 4294901760, %v11367_v44 }
 0x1d4   :  { %6361 = vmatprep.subr.bf16.mxu0 %v11359_v37  ;;  %6387 = vmatpush3.bf16.msra.mxu1 %v9108_v40  ;;  %v10408_v40 = vand.u32 4294901760, %v9742_v18  ;;  %v4937_v37 = vpop.f32.mrb[8].mxu1 }
 0x1d5   :  { %6389 = vmatprep.subr.bf16.mxu1 %v11319_v23  ;;  %v1603_v23 = vadd.f32 %v4904_v39, %v1465_v1  ;;  %v11371_v39 = vld [vmem:[#allocation76_spill] sm:$0xff] }
 0x1d7   :  { %6363 = vmatpush3.bf16.msra.mxu0 %v11360_v3  ;;  %v11366_v3 = vld [vmem:[#allocation24_spill] sm:$0xff] }
 0x1d8   :  { %6365 = vmatprep.subr.bf16.mxu0 %v11361_v50  ;;  %6391 = vmatpush3.bf16.msra.mxu1 %v11325_v9  ;;  %v3938_v9 = vsub.f32 %v9286_v38, %v11364_v7  ;;  %v4938_v50 = vpop.f32.mrb[9].mxu1  ;;  %v11372_v7 = vand.u32 4294901760, %v9311_v52 }
 0x1d9   :  { %6393 = vmatprep.subr.bf16.mxu1 %v9155_v46  ;;  %v3945_v46 = vsub.f32 %v9294_v43, %v11365_v13  ;;  %v4939_v1 = vadd.f32 %v4938_v50, %v4937_v37  ;;  %v11375_v50 = vand.u32 4294901760, %v9334_v2 }
 0x1da   :  { %v3826_v13 = vsub.f32 %v9311_v52, %v11372_v7 }
 0x1db   :  { %6367 = vmatpush3.bf16.msra.mxu0 %v11362_v42  ;;  %v11369_v42 = vld [vmem:[#allocation81_spill] sm:$0xff] }
 0x1dc   :  { %6369 = vmatprep.subr.bf16.mxu0 %v11363_v4  ;;  %6395 = vmatpush3.bf16.msra.mxu1 %v11338_v12  ;;  %v11370_v4 = vand.u32 4294901760, %v11369_v42  ;;  %v3946_v42 = vand.u32 4294901760, %v3945_v46  ;;  %v11382_v46 = vld [vmem:[#allocation83_spill] sm:$0xff]  ;;  %v3827_v58 = vand.u32 4294901760, %v3826_v13 }
 0x1dd   :  { %6397 = vmatprep.subr.bf16.mxu1 %v11342_v49  ;;  %v3809_v49 = vsub.f32 %v9742_v18, %v10408_v40  ;;  %v11376_v40 = vld [vmem:[#allocation82_spill] sm:$0xff]  ;;  %v11383_v29 = vand.u32 4294901760, %v11382_v46 }
 0x1de   :  { %v9763_v12 = vpack.c.bf16 %v11370_v4, %v11368_v41  ;;  %v3939_v41 = vand.u32 4294901760, %v3938_v9  ;;  %v11374_v4 = vand.u32 4294901760, %v9329_v62  ;;  %v11377_v7 = vand.u32 4294901760, %v11376_v40 }
 0x1df   :  { %6371 = vmatpush3.bf16.msra.mxu0 %v11366_v3  ;;  %v11373_v3 = vand.u32 4294901760, %v9316_v16 }
 0x1e0   :  { %6373 = vmatprep.subr.bf16.mxu0 %v11371_v39  ;;  %6399 = vmatpush3.bf16.msra.mxu1 %v9179_v34  ;;  %v3952_v37 = vsub.f32 %v9329_v62, %v11374_v4  ;;  %v3959_v34 = vsub.f32 %v9334_v2, %v11375_v50  ;;  %v9783_v39 = vadd.f32 %v4939_v1, %v1603_v23  ;;  %v11384_v4 = vand.u32 4294901760, %v9345_v14 }
 0x1e1   :  { %v3833_v44 = vsub.f32 %v9316_v16, %v11373_v3  ;;  %6401 = vmatprep.subr.bf16.mxu1 %v9197_v59  ;;  %v9789_v51 = vpack.c.bf16 %v11378_v11, %v11377_v7  ;;  %v11379_v3 = vld [vmem:[#allocation51_spill] sm:$0xff]  ;;  %v11380_v59 = vld [vmem:[#allocation12_spill] sm:$0xff]  ;;  %v11385_v23 = vand.u32 4294901760, %v9350_v56  ;;  %v3810_v1 = vand.u32 4294901760, %v3809_v49 }
 0x1e2   :  { %v11381_v9 = vand.u32 4294901760, %v11380_v59  ;;  %v3840_v50 = vsub.f32 %v9345_v14, %v11384_v4  ;;  %v11386_v7 = vand.u32 4294901760, %v9359_v33  ;;  %v3953_v46 = vand.u32 4294901760, %v3952_v37  ;;  %v11388_v49 = vld [vmem:[#allocation84_spill] sm:$0xff] }
 0x1e3   :  { %6375 = vmatpush3.bf16.msra.mxu0 %v11379_v3  ;;  %v3847_v40 = vsub.f32 %v9350_v56, %v11385_v23  ;;  %v3834_v11 = vand.u32 4294901760, %v3833_v44  ;;  %v11387_v3 = vand.u32 4294901760, %v9372_v22  ;;  %v3960_v4 = vand.u32 4294901760, %v3959_v34 }
 0x1e4   :  { %v9796_v54 = vpack.c.bf16 %v11383_v29, %v11381_v9  ;;  %6409 = vmatprep.subr.bf16.mxu0 %v9763_v12  ;;  %6403 = vmatpush3.bf16.msra.mxu1 %v9214_v0  ;;  %v3966_v29 = vsub.f32 %v9359_v33, %v11386_v7  ;;  %v6440_v9 = vpack.c.bf16 %v3946_v42, %v3939_v41  ;;  %v11389_v23 = vand.u32 4294901760, %v11388_v49  ;;  %v11390_v0 = vld [vmem:[#allocation85_spill] sm:$0xff]  ;;  %v11394_v42 = vld [vmem:[#allocation86_spill] sm:$0xff] }
 0x1e5   :  { %v3973_v59 = vsub.f32 %v9372_v22, %v11387_v3  ;;  %6405 = vmatprep.subr.bf16.mxu1 %v9224_v63  ;;  %v11391_v13 = vand.u32 4294901760, %v11390_v0  ;;  %v3841_v7 = vand.u32 4294901760, %v3840_v50  ;;  %v3848_v60 = vand.u32 4294901760, %v3847_v40 }
 0x1e6   :  { %3601 = vmatmul.mubr.f32.vlgmr.msra.gmra.mrb[22].mxu0 %v9171_v26  ;;  %v3854_v3 = vsub.f32 %v9377_v31, %v11392_v20  ;;  %v11393_v63 = vand.u32 4294901760, %v9402_v30  ;;  %v11395_v37 = vand.u32 4294901760, %v11394_v42  ;;  %v11396_v34 = vand.u32 4294901760, %v9298_v24  ;;  %v11401_v42 = vld [vmem:[#allocation88_spill] sm:$0xff] }
 0x1e7   :  { %v9818_v44 = vpack.c.bf16 %v11391_v13, %v11389_v23  ;;  %6411 = vmatpush3.bf16.msra.mxu0 %v9789_v51  ;;  %3811 = vmatprep.mubr.f32.mxu0 %v3810_v1  ;;  %v6442_v50 = vpack.c.bf16 %v3834_v11, %v3827_v58  ;;  %v3967_v40 = vand.u32 4294901760, %v3966_v29  ;;  %v3974_v23 = vand.u32 4294901760, %v3973_v59  ;;  %v11404_v58 = vld [vmem:[#allocation89_spill] sm:$0xff]  ;;  %v11406_v29 = vld [vmem:[#allocation90_spill] sm:$0xff] }
 0x1e8   :  { %v3861_v41 = vsub.f32 %v9402_v30, %v11393_v63  ;;  %6413 = vmatprep.subr.bf16.mxu0 %v9796_v54  ;;  %6407 = vmatpush3.bf16.msra.mxu1 %v9242_v19  ;;  %v9833_v49 = vpack.c.bf16 %v11396_v34, %v11395_v37  ;;  %v6444_v20 = vpack.c.bf16 %v3960_v4, %v3953_v46  ;;  %v11397_v0 = vand.u32 4294901760, %v9418_v5  ;;  %v11399_v19 = vld [vmem:[#allocation87_spill] sm:$0xff] }
 0x1e9   :  { %6441 = vmatprep.subr.bf16.mxu1 %v6440_v9  ;;  %v11398_v1 = vand.u32 4294901760, %v9434_v25  ;;  %v11400_v45 = vand.u32 4294901760, %v11399_v19  ;;  %v11402_v17 = vand.u32 4294901760, %v11401_v42  ;;  %v11405_v11 = vand.u32 4294901760, %v11404_v58  ;;  %v11411_v42 = vld [vmem:[#allocation57_spill] sm:$0xff] }
 0x1ea   :  { %v3980_v13 = vsub.f32 %v9418_v5, %v11397_v0  ;;  %v11407_v59 = vand.u32 4294901760, %v11406_v29  ;;  %v6446_v46 = vpack.c.bf16 %v3848_v60, %v3841_v7  ;;  %v3855_v4 = vand.u32 4294901760, %v3854_v3  ;;  %v11413_v7 = vld [vmem:[#allocation58_spill] sm:$0xff] }
 0x1eb   :  { %v3987_v63 = vsub.f32 %v9434_v25, %v11398_v1  ;;  %v9845_v24 = vpack.c.bf16 %v11402_v17, %v11400_v45  ;;  %6415 = vmatpush3.bf16.msra.mxu0 %v9818_v44  ;;  %3705 = vmatmul.mubr.f32.vlgmr.msra.gmra.mrb[22].mxu1 %v9171_v26  ;;  %v3862_v37 = vand.u32 4294901760, %v3861_v41  ;;  %v6448_v34 = vpack.c.bf16 %v3974_v23, %v3967_v40  ;;  %v11417_v23 = vld [vmem:[#allocation92_spill] sm:$0xff] }
 0x1ec   :  { %v9853_v9 = vpack.c.bf16 %v11407_v59, %v11405_v11  ;;  %6417 = vmatprep.subr.bf16.mxu0 %v9833_v49  ;;  %6443 = vmatpush3.bf16.msra.mxu1 %v6442_v50  ;;  %v11409_v45 = vand.u32 4294901760, %v9448_v48  ;;  %v11410_v0 = vand.u32 4294901760, %v9456_v35  ;;  %v3981_v1 = vand.u32 4294901760, %v3980_v13  ;;  %v11415_v50 = vld [vmem:[#allocation91_spill] sm:$0xff] }
 0x1ed   :  { %11403 = vst [vmem:[#allocation79_spill] sm:$0xff] %v9845_v24  ;;  %6445 = vmatprep.subr.bf16.mxu1 %v6444_v20  ;;  %v3988_v19 = vand.u32 4294901760, %v3987_v63  ;;  %v11412_v58 = vand.u32 4294901760, %v11411_v42  ;;  %v11414_v3 = vand.u32 4294901760, %v11413_v7  ;;  %4047 = vmatprep.mubr.f32.mxu1 %v9735_v55  ;;  %v11416_v40 = vand.u32 4294901760, %v11415_v50  ;;  %v11420_v20 = vld [vmem:[#allocation53_spill] sm:$0xff] }
 0x1ee   :  { %11408 = vst [vmem:[#allocation31_spill] sm:$0xff] %v9853_v9  ;;  %v3868_v17 = vsub.f32 %v9448_v48, %v11409_v45  ;;  %v3875_v26 = vsub.f32 %v9456_v35, %v11410_v0  ;;  %v11418_v11 = vand.u32 4294901760, %v11417_v23  ;;  %v11421_v13 = vand.u32 4294901760, %v11420_v20  ;;  %v11422_v63 = vld [vmem:[#allocation93_spill] sm:$0xff] }
 0x1ef   :  { %v3994_v60 = vsub.f32 %v11411_v42, %v11412_v58  ;;  %v4001_v41 = vsub.f32 %v11413_v7, %v11414_v3  ;;  %6419 = vmatpush3.bf16.msra.mxu0 %v9845_v24  ;;  %v11423_v59 = vand.u32 4294901760, %v11422_v63  ;;  %v6450_v0 = vpack.c.bf16 %v3862_v37, %v3855_v4 }
 0x1f0   :  { %v9873_v29 = vpack.c.bf16 %v11418_v11, %v11416_v40  ;;  %v11425_v58 = vand.u32 4294901760, %v9506_v32  ;;  %v11426_v55 = vand.u32 4294901760, %v9516_v61  ;;  %6421 = vmatprep.subr.bf16.mxu0 %v9853_v9  ;;  %6447 = vmatpush3.bf16.msra.mxu1 %v6446_v46  ;;  %v3869_v40 = vand.u32 4294901760, %v3868_v17 }
 0x1f1   :  { %v9880_v45 = vpack.c.bf16 %v11423_v59, %v11421_v13  ;;  %v3876_v23 = vand.u32 4294901760, %v3875_v26  ;;  %v11427_v11 = vand.u32 4294901760, %v9557_v28  ;;  %v11428_v13 = vand.u32 4294901760, %v9562_v10  ;;  %6449 = vmatprep.subr.bf16.mxu1 %v6448_v34 }
 0x1f2   :  { %11419 = vst [vmem:[#allocation26_spill] sm:$0xff] %v9873_v29  ;;  %v3882_v3 = vsub.f32 %v9506_v32, %v11425_v58  ;;  %v3889_v50 = vsub.f32 %v9516_v61, %v11426_v55  ;;  %v6452_v37 = vpack.c.bf16 %v3988_v19, %v3981_v1  ;;  %v3995_v63 = vand.u32 4294901760, %v3994_v60  ;;  %v11429_v58 = vld [vmem:[#allocation22_spill] sm:$0xff]  ;;  %v11431_v55 = vld [vmem:[#allocation21_spill] sm:$0xff] }
 0x1f3   :  { %11424 = vst [vmem:[#allocation66_spill] sm:$0xff] %v9880_v45  ;;  %v4008_v20 = vsub.f32 %v9557_v28, %v11427_v11  ;;  %v4015_v4 = vsub.f32 %v9562_v10, %v11428_v13  ;;  %v4002_v59 = vand.u32 4294901760, %v4001_v41  ;;  %v11430_v24 = vand.u32 4294901760, %v11429_v58  ;;  %6423 = vmatpush3.bf16.msra.mxu0 %v9873_v29  ;;  %v11434_v1 = vld [vmem:[#allocation70_spill] sm:$0xff]  ;;  %v11438_v41 = vld [vmem:[#allocation19_spill] sm:$0xff]  ;;  %v11442_v10 = vld [vmem:[#allocation40_spill] sm:$0xff] }
 0x1f4   :  { %v11432_v61 = vand.u32 4294901760, %v11431_v55  ;;  %v9902_v46 = vand.u32 4294901760, %v9724_v6  ;;  %v3883_v17 = vand.u32 4294901760, %v3882_v3  ;;  %v3890_v26 = vand.u32 4294901760, %v3889_v50  ;;  %6425 = vmatprep.subr.bf16.mxu0 %v9880_v45  ;;  %6451 = vmatpush3.bf16.msra.mxu1 %v6450_v0  ;;  %v11444_v0 = vld [vmem:[#allocation59_spill] sm:$0xff] }
 0x1f5   :  { %v11433_v11 = vand.u32 4294901760, %v9571_v27  ;;  %v11435_v19 = vand.u32 4294901760, %v11434_v1  ;;  %v11439_v13 = vand.u32 4294901760, %v11438_v41  ;;  %v6454_v55 = vpack.c.bf16 %v3876_v23, %v3869_v40  ;;  %6453 = vmatprep.subr.bf16.mxu1 %v6452_v37  ;;  %v11448_v23 = vld [vmem:[#allocation62_spill] sm:$0xff] }
 0x1f6   :  { %v9899_v9 = vpack.c.bf16 %v11432_v61, %v11430_v24  ;;  %v11436_v61 = vld [vmem:[#allocation64_spill] sm:$0xff]  ;;  %v4009_v3 = vand.u32 4294901760, %v4008_v20  ;;  %v4016_v50 = vand.u32 4294901760, %v4015_v4  ;;  %v6456_v29 = vpack.c.bf16 %v4002_v59, %v3995_v63  ;;  %v11450_v4 = vld [vmem:[#allocation65_spill] sm:$0xff] }
 0x1f7   :  { %v3896_v34 = vsub.f32 %v9571_v27, %v11433_v11  ;;  %v3903_v60 = vsub.f32 %v11434_v1, %v11435_v19  ;;  %v11437_v24 = vand.u32 4294901760, %v11436_v61  ;;  %v11441_v11 = vand.u32 4294901760, %v9606_v53  ;;  %v11446_v61 = vld [vmem:[#allocation60_spill] sm:$0xff] }
 0x1f8   :  { %v11443_v19 = vand.u32 4294901760, %v11442_v10  ;;  %v11445_v1 = vand.u32 4294901760, %v11444_v0  ;;  %v11447_v28 = vand.u32 4294901760, %v11446_v61  ;;  %v9932_v40 = vsub.f32 %v9724_v6, %v9902_v46  ;;  %6427 = vmatpush3.bf16.msra.mxu0 %v9899_v9  ;;  %6455 = vmatpush3.bf16.msra.mxu1 %v6454_v55  ;;  %v4972_v0 = vpop.f32.mrb[10].mxu0 }
 0x1f9   :  { %v9916_v58 = vpack.c.bf16 %v11439_v13, %v11437_v24  ;;  %v4022_v27 = vsub.f32 %v9606_v53, %v11441_v11  ;;  %v11449_v20 = vand.u32 4294901760, %v11448_v23  ;;  %v11451_v37 = vand.u32 4294901760, %v11450_v4  ;;  %6457 = vmatprep.subr.bf16.mxu1 %v6456_v29  ;;  %v4973_v55 = vpop.f32.mrb[11].mxu0 }
 0x1fa   :  { %v4029_v45 = vsub.f32 %v11442_v10, %v11443_v19  ;;  %v9928_v41 = vpack.c.bf16 %v11447_v28, %v11445_v1  ;;  %v6458_v59 = vpack.c.bf16 %v3890_v26, %v3883_v17  ;;  %v3897_v24 = vand.u32 4294901760, %v3896_v34 }
 0x1fb   :  { %11440 = vst [vmem:[#allocation80_spill] sm:$0xff] %v9916_v58  ;;  %v9939_v63 = vpack.c.bf16 %v11451_v37, %v11449_v20  ;;  %v3904_v13 = vand.u32 4294901760, %v3903_v60  ;;  %6429 = vmatprep.subr.bf16.mxu0 %v9916_v58  ;;  %v6460_v28 = vpack.c.bf16 %v4016_v50, %v4009_v3  ;;  %v11453_v1 = vand.u32 4294901760, %v9616_v57  ;;  %v11457_v20 = vld [vmem:[#allocation18_spill] sm:$0xff]  ;;  %v11459_v37 = vld [vmem:[#allocation23_spill] sm:$0xff] }
 0x1fc   :  { %v11454_v11 = vand.u32 4294901760, %v9626_v47  ;;  %v4023_v61 = vand.u32 4294901760, %v4022_v27  ;;  %v4030_v23 = vand.u32 4294901760, %v4029_v45  ;;  %v11455_v17 = vand.u32 4294901760, %v9646_v15  ;;  %6431 = vmatpush3.bf16.msra.mxu0 %v9928_v41  ;;  %v11461_v45 = vld [vmem:[#allocation42_spill] sm:$0xff]  ;;  %6459 = vmatpush3.bf16.msra.mxu1 %v6458_v59 }
 0x1fd   :  { %11452 = vst [vmem:[#allocation37_spill] sm:$0xff] %v9939_v63  ;;  %v3910_v6 = vsub.f32 %v9616_v57, %v11453_v1  ;;  %v11456_v34 = vand.u32 4294901760, %v9657_v36  ;;  %v3814_v3 = vand.u32 4294901760, %v9932_v40  ;;  %v4974_v50 = vadd.f32 %v4973_v55, %v4972_v0  ;;  %6433 = vmatprep.subr.bf16.mxu0 %v9939_v63  ;;  %6461 = vmatprep.subr.bf16.mxu1 %v6460_v28 }
 0x1fe   :  { %v3917_v19 = vsub.f32 %v9626_v47, %v11454_v11  ;;  %v4036_v26 = vsub.f32 %v9646_v15, %v11455_v17  ;;  %v11458_v4 = vand.u32 4294901760, %v11457_v20  ;;  %v11460_v29 = vand.u32 4294901760, %v11459_v37  ;;  %v11463_v11 = vld [vmem:[#allocation67_spill] sm:$0xff] }
 0x1ff   :  { %v4043_v60 = vsub.f32 %v9657_v36, %v11456_v34  ;;  %v11462_v1 = vand.u32 4294901760, %v11461_v45  ;;  %v11464_v17 = vand.u32 4294901760, %v11463_v11  ;;  %v6462_v15 = vpack.c.bf16 %v3904_v13, %v3897_v24  ;;  %v5007_v24 = vpop.f32.mrb[10].mxu1 }
 0x200   :  { %v9960_v27 = vpack.c.bf16 %v11460_v29, %v11458_v4  ;;  %v3911_v34 = vand.u32 4294901760, %v3910_v6  ;;  %v3918_v0 = vand.u32 4294901760, %v3917_v19  ;;  %v11465_v55 = vand.u32 4294901760, %v9662_v8  ;;  %v5008_v13 = vpop.f32.mrb[11].mxu1  ;;  %v11467_v6 = vld [vmem:[#allocation72_spill] sm:$0xff] }
 0x201   :  { %v9966_v58 = vpack.c.bf16 %v11464_v17, %v11462_v1  ;;  %v11466_v37 = vand.u32 4294901760, %v9669_v21  ;;  %v1879_v29 = vadd.f32 %v4974_v50, %v9783_v39  ;;  %v6464_v45 = vpack.c.bf16 %v4030_v23, %v4023_v61  ;;  %v11469_v17 = vld [vmem:[#allocation69_spill] sm:$0xff]  ;;  %6463 = vmatpush3.bf16.msra.mxu1 %v6462_v15 }
 0x202   :  { %v3924_v20 = vsub.f32 %v9662_v8, %v11465_v55  ;;  %v4037_v1 = vand.u32 4294901760, %v4036_v26  ;;  %v4044_v11 = vand.u32 4294901760, %v4043_v60  ;;  %v3815_v59 = vsub.f32 %v9932_v40, %v3814_v3  ;;  %6435 = vmatpush3.bf16.msra.mxu0 %v9960_v27 }
 0x203   :  { %v3931_v4 = vsub.f32 %v9669_v21, %v11466_v37  ;;  %v11468_v19 = vand.u32 4294901760, %v11467_v6  ;;  %v11470_v55 = vand.u32 4294901760, %v11469_v17  ;;  %v6472_v39 = vpack.c.bf16 %v9294_v43, %v9286_v38  ;;  %6437 = vmatprep.subr.bf16.mxu0 %v9966_v58  ;;  %6465 = vmatprep.subr.bf16.mxu1 %v6464_v45  ;;  %v11481_v45 = vld [vmem:[#allocation78_spill] sm:$0xff]  ;;  %v11486_v17 = vld [vmem:[#allocation73_spill] sm:$0xff] }
 0x204   :  { %v5009_v28 = vadd.f32 %v5008_v13, %v5007_v24  ;;  %v6466_v61 = vpack.c.bf16 %v3918_v0, %v3911_v34  ;;  %v3925_v23 = vand.u32 4294901760, %v3924_v20  ;;  %v6468_v60 = vpack.c.bf16 %v4044_v11, %v4037_v1  ;;  %v11482_v24 = vld [vmem:[#allocation80_spill] sm:$0xff] }
 0x205   :  { %v9984_v63 = vpack.c.bf16 %v11470_v55, %v11468_v19  ;;  %v3932_v26 = vand.u32 4294901760, %v3931_v4  ;;  %v3816_v37 = vand.u32 4294901760, %v3815_v59  ;;  %v6474_v6 = vpack.c.bf16 %v9316_v16, %v9311_v52  ;;  %v5042_v0 = vpop.f32.mrb[12].mxu0  ;;  %v11484_v19 = vld [vmem:[#allocation52_spill] sm:$0xff] }
 0x206   :  { %v1983_v50 = vadd.f32 %v5009_v28, %v1879_v29  ;;  %6467 = vmatpush3.bf16.msra.mxu1 %v6466_v61  ;;  %v6476_v43 = vpack.c.bf16 %v9334_v2, %v9329_v62  ;;  %v6478_v15 = vpack.c.bf16 %v9350_v56, %v9345_v14  ;;  %v6480_v34 = vpack.c.bf16 %v9372_v22, %v9359_v33  ;;  %v11472_v62 = vld [vmem:[#allocation14_spill] sm:$0xff]  ;;  %v11473_v33 = vld [vmem:[#allocation79_spill] sm:$0xff]  ;;  %v5043_v20 = vpop.f32.mrb[13].mxu0  ;;  %v11489_v55 = vld [vmem:[#allocation56_spill] sm:$0xff] }
 0x207   :  { %6439 = vmatpush3.bf16.msra.mxu0 %v9984_v63  ;;  %v6470_v38 = vpack.c.bf16 %v3932_v26, %v3925_v23  ;;  %6469 = vmatprep.subr.bf16.mxu1 %v6468_v60  ;;  %v6482_v52 = vpack.c.bf16 %v9402_v30, %v9377_v31  ;;  %v6484_v16 = vpack.c.bf16 %v9434_v25, %v9418_v5  ;;  %v11471_v56 = vand.u32 4294901760, %v9742_v18  ;;  %v11474_v31 = vld [vmem:[#allocation33_spill] sm:$0xff]  ;;  %v11475_v30 = vld [vmem:[#allocation34_spill] sm:$0xff]  ;;  %v11476_v25 = vld [vmem:[#allocation31_spill] sm:$0xff] }
 0x208   :  { %6473 = vmatprep.subr.bf16.mxu0 %v6472_v39  ;;  %v6486_v22 = vpack.c.bf16 %v9456_v35, %v9448_v48  ;;  %v6488_v14 = vpack.c.bf16 %v11413_v7, %v11411_v42  ;;  %v6490_v2 = vpack.c.bf16 %v11472_v62, %v9506_v32  ;;  %v6492_v5 = vpack.c.bf16 %v11475_v30, %v11474_v31  ;;  %v11477_v35 = vld [vmem:[#allocation46_spill] sm:$0xff]  ;;  %v11490_v39 = vld [vmem:[#allocation61_spill] sm:$0xff] }
 0x209   :  { %v11478_v48 = vld [vmem:[#allocation70_spill] sm:$0xff]  ;;  %v6496_v7 = vpack.c.bf16 %v11442_v10, %v9606_v53  ;;  %v5044_v4 = vadd.f32 %v5043_v20, %v5042_v0  ;;  %v6498_v29 = vpack.c.bf16 %v9626_v47, %v9616_v57  ;;  %v6500_v1 = vpack.c.bf16 %v9657_v36, %v11481_v45  ;;  %v11483_v57 = vld [vmem:[#allocation37_spill] sm:$0xff] }
 0x20a   :  { %3817 = vmatmul.mubr.f32.vlgmr.msra.gmra.mrb[24].mxu0 %v3816_v37  ;;  %6471 = vmatpush3.bf16.msra.mxu1 %v6470_v38  ;;  %v11479_v42 = vld [vmem:[#allocation26_spill] sm:$0xff]  ;;  %v6502_v53 = vpack.c.bf16 %v9669_v21, %v9662_v8  ;;  %v11488_v8 = vld [vmem:[#allocation55_spill] sm:$0xff]  ;;  %v11491_v28 = vld [vmem:[#allocation17_spill] sm:$0xff] }
 0x20b   :  { %6475 = vmatpush3.bf16.msra.mxu0 %v6474_v6  ;;  %4184 = vmatprep.mubr.f32.mxu0 %v9742_v18  ;;  %v6494_v18 = vpack.c.bf16 %v11478_v48, %v11477_v35  ;;  %v11480_v32 = vld [vmem:[#allocation66_spill] sm:$0xff]  ;;  %v2095_v11 = vadd.f32 %v5044_v4, %v1983_v50  ;;  %v11498_v50 = vld [vmem:[#allocation44_spill] sm:$0xff] }
 0x20c   :  { %6477 = vmatprep.subr.bf16.mxu0 %v6476_v43  ;;  %6505 = vmatprep.subr.bf16.mxu1 %v9763_v12  ;;  %v5077_v59 = vpop.f32.mrb[12].mxu1  ;;  %v11485_v36 = vld [vmem:[#allocation94_spill] sm:$0xff]  ;;  %v11499_v43 = vld [vmem:[#allocation45_spill] sm:$0xff] }
 0x20d   :  { %4049 = vmatmul.mubr.f32.vlgmr.msra.gmra.mrb[24].mxu1 %v9902_v46  ;;  %v5078_v10 = vpop.f32.mrb[13].mxu1  ;;  %v11487_v21 = vld [vmem:[#allocation54_spill] sm:$0xff] }
 0x20e   :  { %6507 = vmatpush3.bf16.msra.mxu1 %v9789_v51  ;;  %4291 = vmatprep.mubr.f32.mxu1 %v11471_v56  ;;  %v5079_v13 = vadd.f32 %v5078_v10, %v5077_v59  ;;  %v11497_v23 = vld [vmem:[#allocation30_spill] sm:$0xff] }
 0x20f   :  { %6479 = vmatpush3.bf16.msra.mxu0 %v6478_v15  ;;  %6509 = vmatprep.subr.bf16.mxu1 %v9796_v54  ;;  %v11500_v15 = vld [vmem:[#allocation16_spill] sm:$0xff] }
 0x210   :  { %6481 = vmatprep.subr.bf16.mxu0 %v6480_v34  ;;  %v2327_v47 = vadd.f32 %v5079_v13, %v2095_v11 }
 0x212   :  { %6511 = vmatpush3.bf16.msra.mxu1 %v9818_v44 }
 0x213   :  { %6483 = vmatpush3.bf16.msra.mxu0 %v6482_v52  ;;  %6513 = vmatprep.subr.bf16.mxu1 %v9833_v49 }
 0x214   :  { %6485 = vmatprep.subr.bf16.mxu0 %v6484_v16 }
 0x216   :  { %6515 = vmatpush3.bf16.msra.mxu1 %v11473_v33 }
 0x217   :  { %6487 = vmatpush3.bf16.msra.mxu0 %v6486_v22  ;;  %6517 = vmatprep.subr.bf16.mxu1 %v11476_v25 }
 0x218   :  { %6489 = vmatprep.subr.bf16.mxu0 %v6488_v14 }
 0x21a   :  { %6519 = vmatpush3.bf16.msra.mxu1 %v11479_v42 }
 0x21b   :  { %6491 = vmatpush3.bf16.msra.mxu0 %v6490_v2  ;;  %6521 = vmatprep.subr.bf16.mxu1 %v11480_v32 }
 0x21c   :  { %6493 = vmatprep.subr.bf16.mxu0 %v6492_v5 }
 0x21e   :  { %6523 = vmatpush3.bf16.msra.mxu1 %v9899_v9 }
 0x21f   :  { %6495 = vmatpush3.bf16.msra.mxu0 %v6494_v18  ;;  %6525 = vmatprep.subr.bf16.mxu1 %v11482_v24 }
 0x220   :  { %6497 = vmatprep.subr.bf16.mxu0 %v6496_v7 }
 0x222   :  { %6527 = vmatpush3.bf16.msra.mxu1 %v9928_v41 }
 0x223   :  { %6499 = vmatpush3.bf16.msra.mxu0 %v6498_v29  ;;  %6529 = vmatprep.subr.bf16.mxu1 %v11483_v57 }
 0x224   :  { %6501 = vmatprep.subr.bf16.mxu0 %v6500_v1 }
 0x226   :  { %6531 = vmatpush3.bf16.msra.mxu1 %v9960_v27 }
 0x227   :  { %6503 = vmatpush3.bf16.msra.mxu0 %v6502_v53  ;;  %6533 = vmatprep.subr.bf16.mxu1 %v9966_v58 }
 0x228   :  { %6537 = vmatprep.subr.bf16.mxu0 %v11484_v19 }
 0x22a   :  { %4187 = vmatmul.mubr.f32.vlgmr.msra.gmra.mrb[26].mxu0 %v9932_v40  ;;  %6535 = vmatpush3.bf16.msra.mxu1 %v9984_v63  ;;  %v11493_v40 = vld [vmem:[#allocation74_spill] sm:$0xff] }
 0x22b   :  { %6539 = vmatpush3.bf16.msra.mxu0 %v11485_v36  ;;  %4461 = vmatprep.mubr.f32.mxu0 %v11486_v17 }
 0x22c   :  { %6541 = vmatprep.subr.bf16.mxu0 %v11487_v21  ;;  %6569 = vmatprep.subr.bf16.mxu1 %v9763_v12  ;;  %v11492_v12 = vld [vmem:[#allocation27_spill] sm:$0xff] }
 0x22d   :  { %4295 = vmatmul.mubr.f32.vlgmr.msra.gmra.mrb[26].mxu1 %v3814_v3 }
 0x22e   :  { %6571 = vmatpush3.bf16.msra.mxu1 %v9789_v51  ;;  %4565 = vmatprep.mubr.f32.mxu1 %v11486_v17  ;;  %v11494_v51 = vld [vmem:[#allocation75_spill] sm:$0xff]  ;;  %v5112_v3 = vpop.f32.mrb[14].mxu0 }
 0x22f   :  { %6543 = vmatpush3.bf16.msra.mxu0 %v11488_v8  ;;  %6573 = vmatprep.subr.bf16.mxu1 %v9796_v54  ;;  %v11495_v54 = vld [vmem:[#allocation63_spill] sm:$0xff] }
 0x230   :  { %6545 = vmatprep.subr.bf16.mxu0 %v11489_v55 }
 0x232   :  { %6575 = vmatpush3.bf16.msra.mxu1 %v9818_v44  ;;  %v5113_v44 = vpop.f32.mrb[15].mxu0 }
 0x233   :  { %6547 = vmatpush3.bf16.msra.mxu0 %v11490_v39  ;;  %6577 = vmatprep.subr.bf16.mxu1 %v9833_v49  ;;  %v5114_v61 = vadd.f32 %v5113_v44, %v5112_v3  ;;  %v11496_v49 = vld [vmem:[#allocation35_spill] sm:$0xff] }
 0x234   :  { %6549 = vmatprep.subr.bf16.mxu0 %v11491_v28 }
 0x235   :  { %v2465_v26 = vadd.f32 %v5114_v61, %v2327_v47  ;;  %v5147_v60 = vpop.f32.mrb[14].mxu1 }
 0x236   :  { %6579 = vmatpush3.bf16.msra.mxu1 %v11473_v33  ;;  %v5148_v37 = vpop.f32.mrb[15].mxu1 }
 0x237   :  { %6551 = vmatpush3.bf16.msra.mxu0 %v11492_v12  ;;  %6581 = vmatprep.subr.bf16.mxu1 %v11476_v25  ;;  %v5149_v6 = vadd.f32 %v5148_v37, %v5147_v60 }
 0x238   :  { %6553 = vmatprep.subr.bf16.mxu0 %v11493_v40 }
 0x239   :  { %v2573_v38 = vadd.f32 %v5149_v6, %v2465_v26 }
 0x23a   :  { %6583 = vmatpush3.bf16.msra.mxu1 %v11479_v42 }
 0x23b   :  { %6555 = vmatpush3.bf16.msra.mxu0 %v11494_v51  ;;  %6585 = vmatprep.subr.bf16.mxu1 %v11480_v32 }
 0x23c   :  { %6557 = vmatprep.subr.bf16.mxu0 %v11495_v54 }
 0x23e   :  { %6587 = vmatpush3.bf16.msra.mxu1 %v9899_v9 }
 0x23f   :  { %6559 = vmatpush3.bf16.msra.mxu0 %v11496_v49  ;;  %6589 = vmatprep.subr.bf16.mxu1 %v11482_v24 }
 0x240   :  { %6561 = vmatprep.subr.bf16.mxu0 %v11497_v23 }
 0x242   :  { %6591 = vmatpush3.bf16.msra.mxu1 %v9928_v41 }
 0x243   :  { %6563 = vmatpush3.bf16.msra.mxu0 %v11498_v50  ;;  %6593 = vmatprep.subr.bf16.mxu1 %v11483_v57 }
 0x244   :  { %6565 = vmatprep.subr.bf16.mxu0 %v11499_v43 }
 0x246   :  { %6595 = vmatpush3.bf16.msra.mxu1 %v9960_v27 }
 0x247   :  { %6567 = vmatpush3.bf16.msra.mxu0 %v11500_v15  ;;  %6597 = vmatprep.subr.bf16.mxu1 %v9966_v58 }
 0x24a   :  { %4463 = vmatmul.mubr.f32.vlgmr.msra.gmra.mrb[28].mxu0 %v9902_v46  ;;  %6599 = vmatpush3.bf16.msra.mxu1 %v9984_v63 }
 0x24d   :  { %4567 = vmatmul.mubr.f32.vlgmr.msra.gmra.mrb[28].mxu1 %v9902_v46 }
 0x24e   :  { %v5182_v9 = vpop.f32.mrb[16].mxu0 }
 0x24f   :  { %v5183_v34 = vpop.f32.mrb[17].mxu0 }
 0x250   :  { %v5184_v52 = vadd.f32 %v5183_v34, %v5182_v9 }
 0x252   :  { %v2741_v16 = vadd.f32 %v5184_v52, %v2573_v38 }
 0x255   :  { %v5217_v41 = vpop.f32.mrb[16].mxu1 }
 0x256   :  { %v5218_v56 = vpop.f32.mrb[17].mxu1 }
 0x257   :  { %v5219_v22 = vadd.f32 %v5218_v56, %v5217_v41 }
 0x259   :  { %v2845_v14 = vadd.f32 %v5219_v22, %v2741_v16 }
 0x270   :  { %v5252_v62 = vpop.f32.mrb[18].mxu0 }
 0x271   :  { %v5253_v2 = vpop.f32.mrb[19].mxu0 }
 0x272   :  { %v5254_v33 = vadd.f32 %v5253_v2, %v5252_v62 }
 0x274   :  { %v2957_v27 = vadd.f32 %v5254_v33, %v2845_v14 }
 0x277   :  { %v5287_v31 = vpop.f32.mrb[18].mxu1 }
 0x278   :  { %v5288_v58 = vpop.f32.mrb[19].mxu1 }
 0x279   :  { %v5289_v30 = vadd.f32 %v5288_v58, %v5287_v31 }
 0x27b   :  { %v3189_v5 = vadd.f32 %v5289_v30, %v2957_v27 }
 0x299   :  { %v5322_v25 = vpop.f32.mrb[20].mxu0 }
 0x29a   :  { %v5323_v63 = vpop.f32.mrb[21].mxu0 }
 0x29b   :  { %v5324_v35 = vadd.f32 %v5323_v63, %v5322_v25 }
 0x29d   :  { %v3327_v46 = vadd.f32 %v5324_v35, %v3189_v5 }
 0x29e   :  { %v5357_v48 = vpop.f32.mrb[20].mxu1 }
 0x29f   :  { %v5358_v18 = vpop.f32.mrb[21].mxu1 }
 0x2a0   :  { %v5359_v42 = vadd.f32 %v5358_v18, %v5357_v48 }
 0x2a2   :  { %v3435_v7 = vadd.f32 %v5359_v42, %v3327_v46 }
 0x2b9   :  { %v5392_v0 = vpop.f32.mrb[22].mxu0 }
 0x2ba   :  { %v5393_v32 = vpop.f32.mrb[23].mxu0 }
 0x2bb   :  { %v5394_v20 = vadd.f32 %v5393_v32, %v5392_v0 }
 0x2bd   :  { %v3603_v4 = vadd.f32 %v5394_v20, %v3435_v7 }
 0x2be   :  { %v5427_v29 = vpop.f32.mrb[22].mxu1 }
 0x2bf   :  { %v5428_v45 = vpop.f32.mrb[23].mxu1 }
 0x2c0   :  { %v5429_v1 = vadd.f32 %v5428_v45, %v5427_v29 }
 0x2c2   :  { %v3707_v11 = vadd.f32 %v5429_v1, %v3603_v4 }
 0x2dd   :  { %v5462_v24 = vpop.f32.mrb[24].mxu0 }
 0x2de   :  { %v5463_v59 = vpop.f32.mrb[25].mxu0 }
 0x2df   :  { %v5464_v10 = vadd.f32 %v5463_v59, %v5462_v24 }
 0x2e0   :  { %v5497_v13 = vpop.f32.mrb[24].mxu1 }
 0x2e1   :  { %v3819_v53 = vadd.f32 %v5464_v10, %v3707_v11  ;;  %v5498_v57 = vpop.f32.mrb[25].mxu1 }
 0x2e2   :  { %v5499_v47 = vadd.f32 %v5498_v57, %v5497_v13 }
 0x2e4   :  { %v4051_v19 = vadd.f32 %v5499_v47, %v3819_v53 }
 0x2fd   :  { %v5532_v36 = vpop.f32.mrb[26].mxu0 }
 0x2fe   :  { %v5533_v17 = vpop.f32.mrb[27].mxu0 }
 0x2ff   :  { %v5534_v21 = vadd.f32 %v5533_v17, %v5532_v36 }
 0x300   :  { %v5567_v55 = vpop.f32.mrb[26].mxu1 }
 0x301   :  { %v4189_v8 = vadd.f32 %v5534_v21, %v4051_v19  ;;  %v5568_v39 = vpop.f32.mrb[27].mxu1 }
 0x302   :  { %v5569_v28 = vadd.f32 %v5568_v39, %v5567_v55 }
 0x304   :  { %v4297_v12 = vadd.f32 %v5569_v28, %v4189_v8 }
 0x31d   :  { %v5602_v40 = vpop.f32.mrb[28].mxu0 }
 0x31e   :  { %v5603_v51 = vpop.f32.mrb[29].mxu0 }
 0x31f   :  { %v5604_v54 = vadd.f32 %v5603_v51, %v5602_v40 }
 0x320   :  { %v5637_v44 = vpop.f32.mrb[28].mxu1 }
 0x321   :  { %v4465_v3 = vadd.f32 %v5604_v54, %v4297_v12  ;;  %v5638_v61 = vpop.f32.mrb[29].mxu1 }
 0x322   :  { %v5639_v49 = vadd.f32 %v5638_v61, %v5637_v44 }
 0x324   :  { %v4569_v23 = vadd.f32 %v5639_v49, %v4465_v3 }
 0x326   :  { %4572 = vst [vmem:[#allocation8] sm:$0x3] %v4569_v23 }
 0x327   :  { %6663 = shalt.err (!%p6660_p6)
}
 0x328   :  { %s6664_s15 = scalar_lea.hbm %s10094_s3, 32 }
 0x329   :  { %p6665_p7 = scmp.ne.s32.totalorder %s10094_s3, %s6664_s15  ;;  %p6668_p8 = scmp.lt.u32.totalorder %s6664_s15, %s10094_s3 }
 0x32b   :  { %p6670_p9 = pnand %p6668_p8, %p6665_p7 }
 0x32d   :  { %6673 = shalt.err (!%p6670_p9)
}
 0x32e   :  { %4582 = dma.vmem_to_hbm [thread:$0]  %s4580_s11, 32, %s10094_s3, [#allocation5]  }
 0x32f   :  { %6678 = dma.done.wait [#allocation5], 32  }
 0x330   :  { %6679 = vsyncadd [#allocation5], 4294967264 }
 0x331   :  { %4586 = vsyncpa [#allocation4], 1 }
 0x332   :  { %4587 = vsyncpa [#allocation7], 1 }
 0x333   :  { %4588 = vsyncpa [#allocation5], 1 }

</bundles_post_ra>
